<compile_context>
chip_gen: v6e
topology: v6e:2x2x1
jax: 0.10.0
libtpu: 0.0.40
codegen_flags: <defaults>
</compile_context>

<pallas_src>
import functools

import jax
import jax.numpy as jnp
from jax.experimental import pallas as pl
from jax.experimental.pallas import tpu as pltpu

NEG_SLOPE = 0.01  # torch.nn.LeakyReLU default


def _leaky_relu(r):
    return jnp.where(r >= 0, r, NEG_SLOPE * r)


# ----------------------------- Pallas kernels ------------------------------ #
def _mm_fused_kernel(x_ref, w_ref, b_ref, o_ref, *, apply_act):
    """Single K-step: matmul + bias (+ optional LeakyReLU), no scratch."""
    r = jnp.dot(x_ref[...], w_ref[...], preferred_element_type=jnp.float32)
    r = r + b_ref[...]                     # (tm, tn) + (1, tn) broadcast
    if apply_act:
        r = _leaky_relu(r)
    o_ref[...] = r.astype(o_ref.dtype)


def _mm_acc_kernel(x_ref, w_ref, b_ref, o_ref, acc_ref, *, apply_act):
    """Multi K-step: f32 accumulator, bias/act fused on the last step."""
    @pl.when(pl.program_id(2) == 0)
    def _():
        acc_ref[...] = jnp.zeros_like(acc_ref)

    acc_ref[...] += jnp.dot(x_ref[...], w_ref[...],
                            preferred_element_type=jnp.float32)

    @pl.when(pl.program_id(2) == pl.num_programs(2) - 1)
    def _():
        r = acc_ref[...] + b_ref[...]
        if apply_act:
            r = _leaky_relu(r)
        o_ref[...] = r.astype(o_ref.dtype)


def _round_up(x, m):
    return (x + m - 1) // m * m


def matmul_bias_act(x, w, b, *, apply_act, out_dtype=jnp.bfloat16,
                    tn=None, tk=None):
    """y = act(x @ w + b).  Default tiles are full-extent (single grid step).

    Only M is padded (to a multiple of 8, i.e. 2->8 or 140->144); K/N tiles
    must be full-extent or 128-aligned divisors chosen per call site.
    """
    M, K = x.shape
    K2, N = w.shape
    assert K == K2 and b.shape == (1, N)

    Mp = _round_up(M, 8)
    if Mp != M:
        x = jnp.pad(x, ((0, Mp - M), (0, 0)))
    tm = Mp
    tn = N if tn is None else tn
    tk = K if tk is None else tk
    assert N % tn == 0 and K % tk == 0
    nk = K // tk
    grid = (Mp // tm, N // tn, nk)

    if nk == 1:
        kernel = functools.partial(_mm_fused_kernel, apply_act=apply_act)
        scratch = []
    else:
        kernel = functools.partial(_mm_acc_kernel, apply_act=apply_act)
        scratch = [pltpu.VMEM((tm, tn), jnp.float32)]

    out = pl.pallas_call(
        kernel,
        out_shape=jax.ShapeDtypeStruct((Mp, N), out_dtype),
        grid_spec=pltpu.PrefetchScalarGridSpec(
            num_scalar_prefetch=0,
            grid=grid,
            in_specs=[
                pl.BlockSpec((tm, tk), lambda i, j, k: (i, k)),
                pl.BlockSpec((tk, tn), lambda i, j, k: (k, j)),
                pl.BlockSpec((1, tn), lambda i, j, k: (0, j)),
            ],
            out_specs=pl.BlockSpec((tm, tn), lambda i, j, k: (i, j)),
            scratch_shapes=scratch,
        ),
        compiler_params=pltpu.CompilerParams(
            dimension_semantics=("parallel", "parallel", "arbitrary")),
    )(x, w, b)
    return out[:M] if Mp != M else out


# ------------------------------ glue (JAX) --------------------------------- #
def im2col_nhwc(x, kh, kw, stride):
    """x: (N, H, W, C) -> patches (N*Ho*Wo, kh*kw*C), columns in (kh,kw,C) order."""
    N, H, W, C = x.shape
    Ho = (H - kh) // stride + 1
    Wo = (W - kw) // stride + 1
    slabs = [x[:, i:i + stride * Ho:stride, j:j + stride * Wo:stride, :]
             for i in range(kh) for j in range(kw)]
    p = jnp.stack(slabs, axis=3)                       # (N, Ho, Wo, kh*kw, C)
    return p.reshape(N * Ho * Wo, kh * kw * C), (N, Ho, Wo)


def conv2d_lrelu(x, wmat, b, *, kh, kw, stride):
    """Valid-padding conv + bias + LeakyReLU (im2col + fused Pallas matmul)."""
    patches, (N, Ho, Wo) = im2col_nhwc(x, kh, kw, stride)
    cout = wmat.shape[1]
    y = matmul_bias_act(patches, wmat, b, apply_act=True,
                        out_dtype=jnp.bfloat16)
    return y.reshape(N, Ho, Wo, cout)                  # stay NHWC


# ------------------------------- parameters -------------------------------- #
def init_params_torch_layout(key):
    """Random params in the exact layouts torch's Net() would hold (f32)."""
    def uniform(key, shape, fan_in):
        bound = 1.0 / jnp.sqrt(fan_in)
        return jax.random.uniform(key, shape, jnp.float32, -bound, bound)

    ks = jax.random.split(key, 8)
    return {
        "conv1.weight": uniform(ks[0], (64, 1, 5, 5), 1 * 5 * 5),
        "conv1.bias":   uniform(ks[1], (64,), 1 * 5 * 5),
        "conv2.weight": uniform(ks[2], (128, 64, 5, 5), 64 * 5 * 5),
        "conv2.bias":   uniform(ks[3], (128,), 64 * 5 * 5),
        "fc1.weight":   uniform(ks[4], (1024, 8960), 8960),
        "fc1.bias":     uniform(ks[5], (1024,), 8960),
        "fc2.weight":   uniform(ks[6], (2, 1024), 1024),
        "fc2.bias":     uniform(ks[7], (2,), 1024),
    }


def prepare_params(tp):
    """One-time conversion to kernel-friendly layouts (NHWC order, bf16 weights,
    fc2 N padded 2->128 so the forward pass needs no runtime padding)."""
    def conv_wmat(w):                    # (Cout,Cin,kh,kw) -> (kh*kw*Cin, Cout)
        cout, cin, kh, kw = w.shape
        return (w.transpose(2, 3, 1, 0)
                 .reshape(kh * kw * cin, cout).astype(jnp.bfloat16))

    # PyTorch flattens conv2 output in (C,H,W) order; our NHWC flatten is
    # (H,W,C).  Permute fc1's 8960 input features once to keep semantics.
    w_fc1 = tp["fc1.weight"].reshape(1024, 128, 7, 10)
    w_fc1 = w_fc1.transpose(0, 2, 3, 1).reshape(1024, 8960).T   # (8960, 1024)

    w_fc2 = jnp.pad(tp["fc2.weight"].T, ((0, 0), (0, 126)))     # (1024, 128)
    b_fc2 = jnp.pad(tp["fc2.bias"], (0, 126))

    return {
        "w_conv1": conv_wmat(tp["conv1.weight"]),                # (25, 64)
        "b_conv1": tp["conv1.bias"].reshape(1, 64),
        "w_conv2": conv_wmat(tp["conv2.weight"]),                # (1600, 128)
        "b_conv2": tp["conv2.bias"].reshape(1, 128),
        "w_fc1":   w_fc1.astype(jnp.bfloat16),                   # (8960, 1024)
        "b_fc1":   tp["fc1.bias"].reshape(1, 1024),
        "w_fc2":   w_fc2.astype(jnp.bfloat16),                   # (1024, 128)
        "b_fc2":   b_fc2.reshape(1, 128),
    }


# ------------------------------- the model --------------------------------- #
def net_forward(params, x_nchw):
    # x: (N, 1, 40, 52) NCHW like PyTorch -> NHWC bf16 once.
    x = x_nchw.transpose(0, 2, 3, 1).astype(jnp.bfloat16)
    x = conv2d_lrelu(x, params["w_conv1"], params["b_conv1"],
                     kh=5, kw=5, stride=2)                       # (N,18,24,64)
    x = conv2d_lrelu(x, params["w_conv2"], params["b_conv2"],
                     kh=5, kw=5, stride=2)                       # (N,7,10,128)
    x = x.reshape(x.shape[0], -1)                                # (N, 8960) HWC
    # fc1: HBM-bound weight stream -> small M tile, large 128-aligned K tiles,
    # N split in 2 so both v7x TensorCores can stream half the weight.
    x = matmul_bias_act(x, params["w_fc1"], params["b_fc1"],
                        apply_act=False, out_dtype=jnp.bfloat16,
                        tn=512, tk=1792)                         # (N, 1024)
    # fc2 + final LeakyReLU: one grid step on the init-time padded (1024,128).
    x = matmul_bias_act(x, params["w_fc2"], params["b_fc2"],
                        apply_act=True, out_dtype=jnp.float32)   # (N, 128)
    return x[:, :2]                                              # (N, 2)


if __name__ == "__main__":
    key = jax.random.PRNGKey(0)
    pkey, xkey = jax.random.split(key)
    params = prepare_params(init_params_torch_layout(pkey))
    # Spatial size chosen so flatten yields exactly 8960 features:
    # 40x52 -> conv(5,s2) -> 18x24 -> conv(5,s2) -> 7x10 ; 128*7*10 = 8960.
    x = jax.random.normal(xkey, (2, 1, 40, 52), jnp.float32)
    out = jax.jit(net_forward)(params, x)
    out = jax.block_until_ready(out)
    assert out.shape == (2, 2) and out.dtype == jnp.float32
    print("KERNEL_OK")
</pallas_src>

<mosaic_0001>
module attributes {stable_mosaic.version = 11 : i64} {
  func.func @_mm_fused_kernel(%arg0: i32, %arg1: i32, %arg2: i32, %arg3: memref<864x25xbf16, #tpu.memory_space<vmem>>, %arg4: memref<25x64xbf16, #tpu.memory_space<vmem>>, %arg5: memref<1x64xf32, #tpu.memory_space<vmem>>, %arg6: memref<864x64xbf16, #tpu.memory_space<vmem>>) attributes {dimension_semantics = [#tpu.dimension_semantics<parallel>, #tpu.dimension_semantics<parallel>, #tpu.dimension_semantics<arbitrary>], iteration_bounds = array<i64: 1, 1, 1>, scalar_prefetch = 0 : i64, scratch_operands = 0 : i64, tpu.core_type = #tpu.core_type<tc>, window_params = [{transform_indices = @transform_0, window_bounds = array<i64: 864, 25>}, {transform_indices = @transform_1, window_bounds = array<i64: 25, 64>}, {transform_indices = @transform_2, window_bounds = array<i64: 1, 64>}, {transform_indices = @transform_3, window_bounds = array<i64: 864, 64>}]} {
    %c0 = arith.constant 0 : index
    %c0_0 = arith.constant 0 : index
    %0 = vector.load %arg3[%c0, %c0_0] : memref<864x25xbf16, #tpu.memory_space<vmem>>, vector<864x25xbf16>
    %c0_1 = arith.constant 0 : index
    %c0_2 = arith.constant 0 : index
    %1 = vector.load %arg4[%c0_1, %c0_2] : memref<25x64xbf16, #tpu.memory_space<vmem>>, vector<25x64xbf16>
    %cst = arith.constant dense<0.000000e+00> : vector<864x64xf32>
    %2 = tpu.matmul %0, %1, %cst {dimension_numbers = #tpu.dot_dimension_numbers<[1], [0], [0], [1], [0, 0, 1, 1], [], []>} : vector<864x25xbf16>, vector<25x64xbf16>, vector<864x64xf32> -> vector<864x64xf32>
    %c0_3 = arith.constant 0 : index
    %c0_4 = arith.constant 0 : index
    %3 = vector.load %arg5[%c0_3, %c0_4] : memref<1x64xf32, #tpu.memory_space<vmem>>, vector<1x64xf32>
    %4 = vector.broadcast %3 : vector<1x64xf32> to vector<864x64xf32>
    %5 = arith.addf %2, %4 : vector<864x64xf32>
    %cst_5 = arith.constant 0.000000e+00 : f32
    %6 = vector.broadcast %cst_5 : f32 to vector<864x64xf32>
    %7 = arith.cmpf oge, %5, %6 : vector<864x64xf32>
    %cst_6 = arith.constant 0.00999999977 : f32
    %8 = vector.broadcast %cst_6 : f32 to vector<864x64xf32>
    %9 = arith.mulf %8, %5 : vector<864x64xf32>
    %10 = arith.select %7, %5, %9 : vector<864x64xi1>, vector<864x64xf32>
    %11 = arith.truncf %10 : vector<864x64xf32> to vector<864x64xbf16>
    %c0_7 = arith.constant 0 : index
    %c0_8 = arith.constant 0 : index
    %12 = vector.load %arg6[%c0_7, %c0_8] : memref<864x64xbf16, #tpu.memory_space<vmem>>, vector<864x64xbf16>
    tpu.vector_store %arg6[%c0_7, %c0_8], %11 {strides = array<i32>} : memref<864x64xbf16, #tpu.memory_space<vmem>>, vector<864x64xbf16>,
    return
  }
  func.func @transform_0(%arg0: i32, %arg1: i32, %arg2: i32) -> (i32, i32) {
    %c0_i32 = arith.constant 0 : i32
    return %arg0, %arg2 : i32, i32
  }
  func.func @transform_1(%arg0: i32, %arg1: i32, %arg2: i32) -> (i32, i32) {
    %c0_i32 = arith.constant 0 : i32
    return %arg2, %arg1 : i32, i32
  }
  func.func @transform_2(%arg0: i32, %arg1: i32, %arg2: i32) -> (i32, i32) {
    %c0_i32 = arith.constant 0 : i32
    %c0_i32_0 = arith.constant 0 : i32
    return %c0_i32, %arg1 : i32, i32
  }
  func.func @transform_3(%arg0: i32, %arg1: i32, %arg2: i32) -> (i32, i32) {
    %c0_i32 = arith.constant 0 : i32
    return %arg0, %arg1 : i32, i32
  }
}

module attributes {stable_mosaic.version = 11 : i64} {
  func.func @_mm_fused_kernel(%arg0: i32, %arg1: i32, %arg2: i32, %arg3: memref<144x1600xbf16, #tpu.memory_space<vmem>>, %arg4: memref<1600x128xbf16, #tpu.memory_space<vmem>>, %arg5: memref<1x128xf32, #tpu.memory_space<vmem>>, %arg6: memref<144x128xbf16, #tpu.memory_space<vmem>>) attributes {dimension_semantics = [#tpu.dimension_semantics<parallel>, #tpu.dimension_semantics<parallel>, #tpu.dimension_semantics<arbitrary>], iteration_bounds = array<i64: 1, 1, 1>, scalar_prefetch = 0 : i64, scratch_operands = 0 : i64, tpu.core_type = #tpu.core_type<tc>, window_params = [{transform_indices = @transform_0, window_bounds = array<i64: 144, 1600>}, {transform_indices = @transform_1, window_bounds = array<i64: 1600, 128>}, {transform_indices = @transform_2, window_bounds = array<i64: 1, 128>}, {transform_indices = @transform_3, window_bounds = array<i64: 144, 128>}]} {
    %c0 = arith.constant 0 : index
    %c0_0 = arith.constant 0 : index
    %0 = vector.load %arg3[%c0, %c0_0] : memref<144x1600xbf16, #tpu.memory_space<vmem>>, vector<144x1600xbf16>
    %c0_1 = arith.constant 0 : index
    %c0_2 = arith.constant 0 : index
    %1 = vector.load %arg4[%c0_1, %c0_2] : memref<1600x128xbf16, #tpu.memory_space<vmem>>, vector<1600x128xbf16>
    %cst = arith.constant dense<0.000000e+00> : vector<144x128xf32>
    %2 = tpu.matmul %0, %1, %cst {dimension_numbers = #tpu.dot_dimension_numbers<[1], [0], [0], [1], [0, 0, 1, 1], [], []>} : vector<144x1600xbf16>, vector<1600x128xbf16>, vector<144x128xf32> -> vector<144x128xf32>
    %c0_3 = arith.constant 0 : index
    %c0_4 = arith.constant 0 : index
    %3 = vector.load %arg5[%c0_3, %c0_4] : memref<1x128xf32, #tpu.memory_space<vmem>>, vector<1x128xf32>
    %4 = vector.broadcast %3 : vector<1x128xf32> to vector<144x128xf32>
    %5 = arith.addf %2, %4 : vector<144x128xf32>
    %cst_5 = arith.constant 0.000000e+00 : f32
    %6 = vector.broadcast %cst_5 : f32 to vector<144x128xf32>
    %7 = arith.cmpf oge, %5, %6 : vector<144x128xf32>
    %cst_6 = arith.constant 0.00999999977 : f32
    %8 = vector.broadcast %cst_6 : f32 to vector<144x128xf32>
    %9 = arith.mulf %8, %5 : vector<144x128xf32>
    %10 = arith.select %7, %5, %9 : vector<144x128xi1>, vector<144x128xf32>
    %11 = arith.truncf %10 : vector<144x128xf32> to vector<144x128xbf16>
    %c0_7 = arith.constant 0 : index
    %c0_8 = arith.constant 0 : index
    %12 = vector.load %arg6[%c0_7, %c0_8] : memref<144x128xbf16, #tpu.memory_space<vmem>>, vector<144x128xbf16>
    tpu.vector_store %arg6[%c0_7, %c0_8], %11 {strides = array<i32>} : memref<144x128xbf16, #tpu.memory_space<vmem>>, vector<144x128xbf16>,
    return
  }
  func.func @transform_0(%arg0: i32, %arg1: i32, %arg2: i32) -> (i32, i32) {
    %c0_i32 = arith.constant 0 : i32
    return %arg0, %arg2 : i32, i32
  }
  func.func @transform_1(%arg0: i32, %arg1: i32, %arg2: i32) -> (i32, i32) {
    %c0_i32 = arith.constant 0 : i32
    return %arg2, %arg1 : i32, i32
  }
  func.func @transform_2(%arg0: i32, %arg1: i32, %arg2: i32) -> (i32, i32) {
    %c0_i32 = arith.constant 0 : i32
    %c0_i32_0 = arith.constant 0 : i32
    return %c0_i32, %arg1 : i32, i32
  }
  func.func @transform_3(%arg0: i32, %arg1: i32, %arg2: i32) -> (i32, i32) {
    %c0_i32 = arith.constant 0 : i32
    return %arg0, %arg1 : i32, i32
  }
}

module attributes {stable_mosaic.version = 11 : i64} {
  func.func @_mm_acc_kernel(%arg0: i32, %arg1: i32, %arg2: i32, %arg3: memref<8x1792xbf16, #tpu.memory_space<vmem>>, %arg4: memref<1792x512xbf16, #tpu.memory_space<vmem>>, %arg5: memref<1x512xf32, #tpu.memory_space<vmem>>, %arg6: memref<8x512xbf16, #tpu.memory_space<vmem>>, %arg7: memref<8x512xf32, #tpu.memory_space<vmem>>) attributes {dimension_semantics = [#tpu.dimension_semantics<parallel>, #tpu.dimension_semantics<parallel>, #tpu.dimension_semantics<arbitrary>], iteration_bounds = array<i64: 1, 2, 5>, scalar_prefetch = 0 : i64, scratch_operands = 1 : i64, tpu.core_type = #tpu.core_type<tc>, window_params = [{transform_indices = @transform_0, window_bounds = array<i64: 8, 1792>}, {transform_indices = @transform_1, window_bounds = array<i64: 1792, 512>}, {transform_indices = @transform_2, window_bounds = array<i64: 1, 512>}, {transform_indices = @transform_3, window_bounds = array<i64: 8, 512>}]} {
    %c0_i32 = arith.constant 0 : i32
    %0 = arith.cmpi eq, %arg2, %c0_i32 : i32
    %1 = arith.extui %0 : i1 to i32
    %c0_i32_0 = arith.constant 0 : i32
    %2 = arith.cmpi ne, %1, %c0_i32_0 : i32
    scf.if %2 {
      %cst_9 = arith.constant 0.000000e+00 : f32
      %12 = vector.broadcast %cst_9 : f32 to vector<8x512xf32>
      %c0_10 = arith.constant 0 : index
      %c0_11 = arith.constant 0 : index
      %13 = vector.load %arg7[%c0_10, %c0_11] : memref<8x512xf32, #tpu.memory_space<vmem>>, vector<8x512xf32>
      tpu.vector_store %arg7[%c0_10, %c0_11], %12 {strides = array<i32>} : memref<8x512xf32, #tpu.memory_space<vmem>>, vector<8x512xf32>,
    } else {
    }
    %c0 = arith.constant 0 : index
    %c0_1 = arith.constant 0 : index
    %3 = vector.load %arg7[%c0, %c0_1] : memref<8x512xf32, #tpu.memory_space<vmem>>, vector<8x512xf32>
    %c0_2 = arith.constant 0 : index
    %c0_3 = arith.constant 0 : index
    %4 = vector.load %arg3[%c0_2, %c0_3] : memref<8x1792xbf16, #tpu.memory_space<vmem>>, vector<8x1792xbf16>
    %c0_4 = arith.constant 0 : index
    %c0_5 = arith.constant 0 : index
    %5 = vector.load %arg4[%c0_4, %c0_5] : memref<1792x512xbf16, #tpu.memory_space<vmem>>, vector<1792x512xbf16>
    %cst = arith.constant dense<0.000000e+00> : vector<8x512xf32>
    %6 = tpu.matmul %4, %5, %cst {dimension_numbers = #tpu.dot_dimension_numbers<[1], [0], [0], [1], [0, 0, 1, 1], [], []>} : vector<8x1792xbf16>, vector<1792x512xbf16>, vector<8x512xf32> -> vector<8x512xf32>
    %7 = arith.addf %3, %6 : vector<8x512xf32>
    %c0_6 = arith.constant 0 : index
    %c0_7 = arith.constant 0 : index
    %8 = vector.load %arg7[%c0_6, %c0_7] : memref<8x512xf32, #tpu.memory_space<vmem>>, vector<8x512xf32>
    tpu.vector_store %arg7[%c0_6, %c0_7], %7 {strides = array<i32>} : memref<8x512xf32, #tpu.memory_space<vmem>>, vector<8x512xf32>,
    %c4_i32 = arith.constant 4 : i32
    %9 = arith.cmpi eq, %arg2, %c4_i32 : i32
    %10 = arith.extui %9 : i1 to i32
    %c0_i32_8 = arith.constant 0 : i32
    %11 = arith.cmpi ne, %10, %c0_i32_8 : i32
    scf.if %11 {
      %c0_9 = arith.constant 0 : index
      %c0_10 = arith.constant 0 : index
      %12 = vector.load %arg7[%c0_9, %c0_10] : memref<8x512xf32, #tpu.memory_space<vmem>>, vector<8x512xf32>
      %c0_11 = arith.constant 0 : index
      %c0_12 = arith.constant 0 : index
      %13 = vector.load %arg5[%c0_11, %c0_12] : memref<1x512xf32, #tpu.memory_space<vmem>>, vector<1x512xf32>
      %14 = vector.broadcast %13 : vector<1x512xf32> to vector<8x512xf32>
      %15 = arith.addf %12, %14 : vector<8x512xf32>
      %16 = arith.truncf %15 : vector<8x512xf32> to vector<8x512xbf16>
      %c0_13 = arith.constant 0 : index
      %c0_14 = arith.constant 0 : index
      %17 = vector.load %arg6[%c0_13, %c0_14] : memref<8x512xbf16, #tpu.memory_space<vmem>>, vector<8x512xbf16>
      tpu.vector_store %arg6[%c0_13, %c0_14], %16 {strides = array<i32>} : memref<8x512xbf16, #tpu.memory_space<vmem>>, vector<8x512xbf16>,
    } else {
    }
    return
  }
  func.func @transform_0(%arg0: i32, %arg1: i32, %arg2: i32) -> (i32, i32) {
    %c0_i32 = arith.constant 0 : i32
    return %arg0, %arg2 : i32, i32
  }
  func.func @transform_1(%arg0: i32, %arg1: i32, %arg2: i32) -> (i32, i32) {
    %c0_i32 = arith.constant 0 : i32
    return %arg2, %arg1 : i32, i32
  }
  func.func @transform_2(%arg0: i32, %arg1: i32, %arg2: i32) -> (i32, i32) {
    %c0_i32 = arith.constant 0 : i32
    %c0_i32_0 = arith.constant 0 : i32
    return %c0_i32, %arg1 : i32, i32
  }
  func.func @transform_3(%arg0: i32, %arg1: i32, %arg2: i32) -> (i32, i32) {
    %c0_i32 = arith.constant 0 : i32
    return %arg0, %arg1 : i32, i32
  }
}

module attributes {stable_mosaic.version = 11 : i64} {
  func.func @_mm_fused_kernel(%arg0: i32, %arg1: i32, %arg2: i32, %arg3: memref<8x1024xbf16, #tpu.memory_space<vmem>>, %arg4: memref<1024x128xbf16, #tpu.memory_space<vmem>>, %arg5: memref<1x128xf32, #tpu.memory_space<vmem>>, %arg6: memref<8x128xf32, #tpu.memory_space<vmem>>) attributes {dimension_semantics = [#tpu.dimension_semantics<parallel>, #tpu.dimension_semantics<parallel>, #tpu.dimension_semantics<arbitrary>], iteration_bounds = array<i64: 1, 1, 1>, scalar_prefetch = 0 : i64, scratch_operands = 0 : i64, tpu.core_type = #tpu.core_type<tc>, window_params = [{transform_indices = @transform_0, window_bounds = array<i64: 8, 1024>}, {transform_indices = @transform_1, window_bounds = array<i64: 1024, 128>}, {transform_indices = @transform_2, window_bounds = array<i64: 1, 128>}, {transform_indices = @transform_3, window_bounds = array<i64: 8, 128>}]} {
    %c0 = arith.constant 0 : index
    %c0_0 = arith.constant 0 : index
    %0 = vector.load %arg3[%c0, %c0_0] : memref<8x1024xbf16, #tpu.memory_space<vmem>>, vector<8x1024xbf16>
    %c0_1 = arith.constant 0 : index
    %c0_2 = arith.constant 0 : index
    %1 = vector.load %arg4[%c0_1, %c0_2] : memref<1024x128xbf16, #tpu.memory_space<vmem>>, vector<1024x128xbf16>
    %cst = arith.constant dense<0.000000e+00> : vector<8x128xf32>
    %2 = tpu.matmul %0, %1, %cst {dimension_numbers = #tpu.dot_dimension_numbers<[1], [0], [0], [1], [0, 0, 1, 1], [], []>} : vector<8x1024xbf16>, vector<1024x128xbf16>, vector<8x128xf32> -> vector<8x128xf32>
    %c0_3 = arith.constant 0 : index
    %c0_4 = arith.constant 0 : index
    %3 = vector.load %arg5[%c0_3, %c0_4] : memref<1x128xf32, #tpu.memory_space<vmem>>, vector<1x128xf32>
    %4 = vector.broadcast %3 : vector<1x128xf32> to vector<8x128xf32>
    %5 = arith.addf %2, %4 : vector<8x128xf32>
    %cst_5 = arith.constant 0.000000e+00 : f32
    %6 = vector.broadcast %cst_5 : f32 to vector<8x128xf32>
    %7 = arith.cmpf oge, %5, %6 : vector<8x128xf32>
    %cst_6 = arith.constant 0.00999999977 : f32
    %8 = vector.broadcast %cst_6 : f32 to vector<8x128xf32>
    %9 = arith.mulf %8, %5 : vector<8x128xf32>
    %10 = arith.select %7, %5, %9 : vector<8x128xi1>, vector<8x128xf32>
    %c0_7 = arith.constant 0 : index
    %c0_8 = arith.constant 0 : index
    %11 = vector.load %arg6[%c0_7, %c0_8] : memref<8x128xf32, #tpu.memory_space<vmem>>, vector<8x128xf32>
    tpu.vector_store %arg6[%c0_7, %c0_8], %10 {strides = array<i32>} : memref<8x128xf32, #tpu.memory_space<vmem>>, vector<8x128xf32>,
    return
  }
  func.func @transform_0(%arg0: i32, %arg1: i32, %arg2: i32) -> (i32, i32) {
    %c0_i32 = arith.constant 0 : i32
    return %arg0, %arg2 : i32, i32
  }
  func.func @transform_1(%arg0: i32, %arg1: i32, %arg2: i32) -> (i32, i32) {
    %c0_i32 = arith.constant 0 : i32
    return %arg2, %arg1 : i32, i32
  }
  func.func @transform_2(%arg0: i32, %arg1: i32, %arg2: i32) -> (i32, i32) {
    %c0_i32 = arith.constant 0 : i32
    %c0_i32_0 = arith.constant 0 : i32
    return %c0_i32, %arg1 : i32, i32
  }
  func.func @transform_3(%arg0: i32, %arg1: i32, %arg2: i32) -> (i32, i32) {
    %c0_i32 = arith.constant 0 : i32
    return %arg0, %arg1 : i32, i32
  }
}

</mosaic_0001>

<bundles_post_ra>
// kernel: net_forward.4
= control target key start
LH: loop header
LB: loop body
LE: loop exit
PB: predicated region body
PF: predicated region fallthrough
CT: control target
= control target key end

     0   :  { %8 = vsyncpa [#allocation3], 0  ;;  %s3522_s0 = inlined_call_operand.vmem [shape: bf16[864,25], index: 0, kind: input, shape index: {}]   ;;  %s3523_s1 = inlined_call_operand.hbm [shape: bf16[25,64], index: 1, kind: input, shape index: {}]   ;;  %s3524_s2 = inlined_call_operand.hbm [shape: f32[1,64], index: 2, kind: input, shape index: {}]   ;;  %s3525_s3 = inlined_call_operand.vmem [shape: bf16[864,64], index: 3, kind: output, shape index: {}]  }
   0x1   :  { %9 = vsyncpa [#allocation5], 0  ;;  %s2552_s12 = smov [#allocation2]  }
   0x2   :  { %s17_s13 = sshll.u32 %s2552_s12, 4  ;;  %s18_s13 = int_to_ptr.vmem [resolvable:$true] %s17_s13 }
   0x3   :  { %s2516_s14 = scalar_lea.vmem %s18_s13, 256  ;;  %p2521_p1 = scmp.lt.s32.totalorder %s18_s13, %s18_s13 }
   0x4   :  { %p2517_p0 = scmp.ne.s32.totalorder %s18_s13, %s2516_s14  ;;  %p2522_p2 = scmp.lt.s32.totalorder %s2516_s14, %s2516_s14 }
   0x6   :  { %p2523_p3 = por %p2522_p2, %p2521_p1 }
   0x8   :  { %p2524_p4 = pnand %p2523_p3, %p2517_p0 }
   0xa   :  { %2527 = shalt.err (!%p2524_p4)
}
   0xb   :  { %s2553_s15 = smov 64   ;;  %s2554_s16 = smov 4  }
   0xc   :  { %23 = dma.hbm_to_vmem [thread:$0]  %s3523_s1, 256, %s18_s13, [#allocation3], %s2553_s15, %s2553_s15, %s2554_s16  }
   0xd   :  { %s2555_s19 = smov [#allocation4]  }
   0xe   :  { %s30_s20 = sshll.u32 %s2555_s19, 4  ;;  %s31_s20 = int_to_ptr.vmem [resolvable:$true] %s30_s20 }
   0xf   :  { %s2536_s21 = scalar_lea.vmem %s31_s20, 16  ;;  %s2540_s22 = scalar_lea.vmem %s31_s20, 32 }
  0x10   :  { %p2537_p5 = scmp.ne.s32.totalorder %s31_s20, %s2536_s21  ;;  %p2541_p6 = scmp.lt.s32.totalorder %s31_s20, %s31_s20 }
  0x11   :  { %p2542_p7 = scmp.lt.s32.totalorder %s2540_s22, %s2536_s21 }
  0x13   :  { %p2543_p8 = por %p2542_p7, %p2541_p6 }
  0x15   :  { %p2544_p9 = pnand %p2543_p8, %p2537_p5 }
  0x17   :  { %2547 = shalt.err (!%p2544_p9)
}
  0x18   :  { %33 = dma.hbm_to_vmem [thread:$0]  %s3524_s2, 16, %s31_s20, [#allocation5]  }
  0x19   :  { %2548 = dma.done.wait [#allocation3], 256  }
  0x1a   :  { %2549 = vsyncadd [#allocation3], 4294967040 }
  0x1b   :  { %2550 = dma.done.wait [#allocation5], 16  }
  0x1c   :  { %2551 = vsyncadd [#allocation5], 4294967280  ;;  %vm604_vm0 = vcmask 1043456   ;;  %vm605_vm1 = vcmask 1044480   ;;  %v2556_v0 = vmov 65535   ;;  %v2452_v4 = vld [vmem:[#allocation2] sm:$0xff]  }
  0x1d   :  { %v606_v1 = vsel %vm604_vm0, 4294967295, %v2556_v0  ;;  %v2451_v3 = vld [vmem:[#allocation2 + $0x8] sm:$0x1f]   ;;  %v2453_v6 = vld [vmem:[%s3522_s0] sm:$0xff]   ;;  %vm441_vm2 = vcmask 203776   ;;  %v2457_v10 = vld [vmem:[%s3522_s0 + $0x10] sm:$0xff]  }
  0x1e   :  { %v607_v2 = vsel %vm605_vm1, %v606_v1, 0  ;;  %v2454_v7 = vld [vmem:[%s3522_s0 + $0xe0] sm:$0xff]   ;;  %v2455_v8 = vld [vmem:[%s3522_s0 + $0x8] sm:$0xff]   ;;  %2334 = vmatprep.mubr.msk.bf16.mxu0 %vm441_vm2, %v2453_v6  ;;  %v2458_v11 = vld [vmem:[%s3522_s0 + $0xf0] sm:$0xff]   ;;  %vm1832_vm5 = vcmask 519168  }
  0x1f   :  { %v609_v5 = vand.u32 %v2451_v3, %v607_v2  ;;  %2390 = vmatprep.mubr.msk.bf16.mxu1 %vm441_vm2, %v2454_v7  ;;  %v2456_v9 = vld [vmem:[%s3522_s0 + $0xe8] sm:$0xff]   ;;  %v2459_v12 = vld [vmem:[%s3522_s0 + $0x18] sm:$0xff]   ;;  %v2461_v14 = vld [vmem:[%s3522_s0 + $0x20] sm:$0xff]  }
  0x20   :  { %v2460_v13 = vld [vmem:[%s3522_s0 + $0xf8] sm:$0xff]   ;;  %v2462_v15 = vld [vmem:[%s3522_s0 + $0x100] sm:$0xff]   ;;  %v2463_v16 = vld [vmem:[%s3522_s0 + $0x28] sm:$0xff]  }
  0x21   :  { %2330 = vmatprep.subr.bf16.mxu0 %v609_v5  ;;  %2442 = vmatprep.subr.bf16.mxu1 %v609_v5  ;;  %v2464_v17 = vld [vmem:[%s3522_s0 + $0x108] sm:$0xff]   ;;  %v2465_v18 = vld [vmem:[%s3522_s0 + $0x30] sm:$0xff]   ;;  %v2467_v20 = vld [vmem:[%s3522_s0 + $0x38] sm:$0xff]  }
  0x22   :  { %2331 = vmatpush3.bf16.msra.mxu0 %v609_v5  ;;  %2444 = vmatpush3.bf16.msra.mxu1 %v609_v5  ;;  %v2466_v19 = vld [vmem:[%s3522_s0 + $0x110] sm:$0xff]   ;;  %v2468_v21 = vld [vmem:[%s3522_s0 + $0x118] sm:$0xff]   ;;  %v2469_v22 = vld [vmem:[%s3522_s0 + $0x40] sm:$0xff]  }
  0x23   :  { %2332 = vmatprep.subr.bf16.mxu0 %v2452_v4  ;;  %2443 = vmatprep.subr.bf16.mxu1 %v2452_v4  ;;  %v2470_v23 = vld [vmem:[%s3522_s0 + $0x120] sm:$0xff]   ;;  %v2471_v24 = vld [vmem:[%s3522_s0 + $0x48] sm:$0xff]   ;;  %v2473_v26 = vld [vmem:[%s3522_s0 + $0x50] sm:$0xff]  }
  0x24   :  { %v2472_v25 = vld [vmem:[%s3522_s0 + $0x128] sm:$0xff]   ;;  %v2474_v27 = vld [vmem:[%s3522_s0 + $0x130] sm:$0xff]   ;;  %v2475_v28 = vld [vmem:[%s3522_s0 + $0x58] sm:$0xff]  }
  0x25   :  { %v2476_v29 = vld [vmem:[%s3522_s0 + $0x138] sm:$0xff]   ;;  %v2477_v30 = vld [vmem:[%s3522_s0 + $0x60] sm:$0xff]   ;;  %v2479_v32 = vld [vmem:[%s3522_s0 + $0x68] sm:$0xff]  }
  0x26   :  { %2333 = vmatpush3.bf16.msra.mxu0 %v2452_v4  ;;  %2445 = vmatpush3.bf16.msra.mxu1 %v2452_v4  ;;  %v2478_v31 = vld [vmem:[%s3522_s0 + $0x140] sm:$0xff]   ;;  %v2480_v33 = vld [vmem:[%s3522_s0 + $0x148] sm:$0xff]   ;;  %v2481_v34 = vld [vmem:[%s3522_s0 + $0x70] sm:$0xff]  }
  0x27   :  { %v2482_v35 = vld [vmem:[%s3522_s0 + $0x150] sm:$0xff]   ;;  %v2483_v36 = vld [vmem:[%s3522_s0 + $0x78] sm:$0xff]   ;;  %v2485_v38 = vld [vmem:[%s3522_s0 + $0x80] sm:$0xff]  }
  0x28   :  { %v2484_v37 = vld [vmem:[%s3522_s0 + $0x158] sm:$0xff]   ;;  %v2486_v39 = vld [vmem:[%s3522_s0 + $0x160] sm:$0xff]   ;;  %v2487_v40 = vld [vmem:[%s3522_s0 + $0x88] sm:$0xff]  }
  0x29   :  { %2335 = vmatmul.mubr.msk.bf16.vlgmr.msra.gmra.mxu0 %vm441_vm2, %v2455_v8  ;;  %2391 = vmatmul.mubr.msk.bf16.vlgmr.msra.gmra.mxu1 %vm441_vm2, %v2456_v9  ;;  %v2488_v41 = vld [vmem:[%s3522_s0 + $0x168] sm:$0xff]   ;;  %v2489_v42 = vld [vmem:[%s3522_s0 + $0x90] sm:$0xff]   ;;  %v2491_v44 = vld [vmem:[%s3522_s0 + $0x98] sm:$0xff]  }
  0x2a   :  { %2338 = vmatprep.mubr.msk.bf16.mxu0 %vm441_vm2, %v2457_v10  ;;  %2394 = vmatprep.mubr.msk.bf16.mxu1 %vm441_vm2, %v2458_v11  ;;  %v2490_v43 = vld [vmem:[%s3522_s0 + $0x170] sm:$0xff]   ;;  %v2492_v45 = vld [vmem:[%s3522_s0 + $0x178] sm:$0xff]   ;;  %v2493_v46 = vld [vmem:[%s3522_s0 + $0xa0] sm:$0xff]  }
  0x2b   :  { %v2494_v47 = vld [vmem:[%s3522_s0 + $0x180] sm:$0xff]   ;;  %v2495_v48 = vld [vmem:[%s3522_s0 + $0xa8] sm:$0xff]   ;;  %v2497_v50 = vld [vmem:[%s3522_s0 + $0xb0] sm:$0xff]  }
  0x2c   :  { %v2496_v49 = vld [vmem:[%s3522_s0 + $0x188] sm:$0xff]   ;;  %v2498_v51 = vld [vmem:[%s3522_s0 + $0x190] sm:$0xff]   ;;  %v2499_v52 = vld [vmem:[%s3522_s0 + $0xb8] sm:$0xff]  }
  0x2d   :  { %v2500_v53 = vld [vmem:[%s3522_s0 + $0x198] sm:$0xff]   ;;  %v2501_v54 = vld [vmem:[%s3522_s0 + $0xc0] sm:$0xff]   ;;  %v2503_v56 = vld [vmem:[%s3522_s0 + $0xc8] sm:$0xff]  }
  0x2e   :  { %v2502_v55 = vld [vmem:[%s3522_s0 + $0x1a0] sm:$0xff]   ;;  %v2504_v57 = vld [vmem:[%s3522_s0 + $0x1a8] sm:$0xff]   ;;  %v2505_v58 = vld [vmem:[%s3522_s0 + $0xd0] sm:$0xff]  }
  0x2f   :  { %v2506_v59 = vld [vmem:[%s3522_s0 + $0xd8] sm:$0xff]   ;;  %v2799_v60 = vld [vmem:[#allocation4] ss:$0 sm:$0xff] }
  0x31   :  { %2339 = vmatmul.mubr.msk.bf16.gmra.mxu0 %vm441_vm2, %v2459_v12  ;;  %2395 = vmatmul.mubr.msk.bf16.gmra.mxu1 %vm441_vm2, %v2460_v13 }
  0x32   :  { %2342 = vmatprep.mubr.msk.bf16.mxu0 %vm441_vm2, %v2461_v14  ;;  %2398 = vmatprep.mubr.msk.bf16.mxu1 %vm441_vm2, %v2462_v15 }
  0x39   :  { %2343 = vmatmul.mubr.msk.bf16.gmra.mxu0 %vm441_vm2, %v2463_v16  ;;  %2399 = vmatmul.mubr.msk.bf16.gmra.mxu1 %vm441_vm2, %v2464_v17 }
  0x3a   :  { %2346 = vmatprep.mubr.msk.bf16.mxu0 %vm441_vm2, %v2465_v18  ;;  %2402 = vmatprep.mubr.msk.bf16.mxu1 %vm441_vm2, %v2466_v19 }
  0x41   :  { %2347 = vmatmul.mubr.msk.bf16.gmra.mxu0 %vm441_vm2, %v2467_v20  ;;  %2403 = vmatmul.mubr.msk.bf16.gmra.mxu1 %vm441_vm2, %v2468_v21 }
  0x42   :  { %2350 = vmatprep.mubr.msk.bf16.mxu0 %vm441_vm2, %v2469_v22  ;;  %2406 = vmatprep.mubr.msk.bf16.mxu1 %vm441_vm2, %v2470_v23 }
  0x49   :  { %2351 = vmatmul.mubr.msk.bf16.gmra.mxu0 %vm441_vm2, %v2471_v24  ;;  %2407 = vmatmul.mubr.msk.bf16.gmra.mxu1 %vm441_vm2, %v2472_v25 }
  0x4a   :  { %2354 = vmatprep.mubr.msk.bf16.mxu0 %vm441_vm2, %v2473_v26  ;;  %2410 = vmatprep.mubr.msk.bf16.mxu1 %vm441_vm2, %v2474_v27 }
  0x51   :  { %2355 = vmatmul.mubr.msk.bf16.gmra.mxu0 %vm441_vm2, %v2475_v28  ;;  %2411 = vmatmul.mubr.msk.bf16.gmra.mxu1 %vm441_vm2, %v2476_v29 }
  0x52   :  { %2358 = vmatprep.mubr.msk.bf16.mxu0 %vm441_vm2, %v2477_v30  ;;  %2414 = vmatprep.mubr.msk.bf16.mxu1 %vm441_vm2, %v2478_v31 }
  0x59   :  { %2359 = vmatmul.mubr.msk.bf16.gmra.mxu0 %vm441_vm2, %v2479_v32  ;;  %2415 = vmatmul.mubr.msk.bf16.gmra.mxu1 %vm441_vm2, %v2480_v33 }
  0x5a   :  { %2362 = vmatprep.mubr.msk.bf16.mxu0 %vm441_vm2, %v2481_v34  ;;  %2418 = vmatprep.mubr.msk.bf16.mxu1 %vm441_vm2, %v2482_v35 }
  0x61   :  { %2363 = vmatmul.mubr.msk.bf16.gmra.mxu0 %vm441_vm2, %v2483_v36  ;;  %2419 = vmatmul.mubr.msk.bf16.gmra.mxu1 %vm441_vm2, %v2484_v37 }
  0x62   :  { %2366 = vmatprep.mubr.msk.bf16.mxu0 %vm441_vm2, %v2485_v38  ;;  %2422 = vmatprep.mubr.msk.bf16.mxu1 %vm441_vm2, %v2486_v39 }
  0x69   :  { %2367 = vmatmul.mubr.msk.bf16.gmra.mxu0 %vm441_vm2, %v2487_v40  ;;  %2423 = vmatmul.mubr.msk.bf16.gmra.mxu1 %vm441_vm2, %v2488_v41 }
  0x6a   :  { %2370 = vmatprep.mubr.msk.bf16.mxu0 %vm441_vm2, %v2489_v42  ;;  %2426 = vmatprep.mubr.msk.bf16.mxu1 %vm441_vm2, %v2490_v43 }
  0x71   :  { %2371 = vmatmul.mubr.msk.bf16.gmra.mxu0 %vm441_vm2, %v2491_v44  ;;  %2427 = vmatmul.mubr.msk.bf16.gmra.mxu1 %vm441_vm2, %v2492_v45 }
  0x72   :  { %2374 = vmatprep.mubr.msk.bf16.mxu0 %vm441_vm2, %v2493_v46  ;;  %2430 = vmatprep.mubr.msk.bf16.mxu1 %vm441_vm2, %v2494_v47 }
  0x79   :  { %2375 = vmatmul.mubr.msk.bf16.gmra.mxu0 %vm441_vm2, %v2495_v48  ;;  %2431 = vmatmul.mubr.msk.bf16.gmra.mxu1 %vm441_vm2, %v2496_v49 }
  0x7a   :  { %2378 = vmatprep.mubr.msk.bf16.mxu0 %vm441_vm2, %v2497_v50  ;;  %2434 = vmatprep.mubr.msk.bf16.mxu1 %vm441_vm2, %v2498_v51 }
  0x81   :  { %2379 = vmatmul.mubr.msk.bf16.gmra.mxu0 %vm441_vm2, %v2499_v52  ;;  %2435 = vmatmul.mubr.msk.bf16.gmra.mxu1 %vm441_vm2, %v2500_v53 }
  0x82   :  { %2382 = vmatprep.mubr.msk.bf16.mxu0 %vm441_vm2, %v2501_v54  ;;  %2438 = vmatprep.mubr.msk.bf16.mxu1 %vm441_vm2, %v2502_v55 }
  0x89   :  { %2383 = vmatmul.mubr.msk.bf16.gmra.mxu0 %vm441_vm2, %v2503_v56  ;;  %2439 = vmatmul.mubr.msk.bf16.gmra.mxu1 %vm441_vm2, %v2504_v57 }
  0x8a   :  { %2386 = vmatprep.mubr.msk.bf16.mxu0 %vm441_vm2, %v2505_v58 }
  0x91   :  { %2387 = vmatmul.mubr.msk.bf16.gmra.mxu0 %vm441_vm2, %v2506_v59 }
  0xe9   :  { %v2336_v61 = vpop.f32.mrf.mxu0  ;;  %v2392_v62 = vpop.f32.mrf.mxu1 }
  0xea   :  { %v654_v63 = vadd.f32 %v2336_v61, %v2799_v60  ;;  %v878_v0 = vadd.f32 %v2392_v62, %v2799_v60 }
  0xeb   :  { %v645_v1 = vpop.f32.mrf.mxu0  ;;  %v869_v2 = vpop.f32.mrf.mxu1 }
  0xec   :  { %vm1078_vm3 = vcmp.ge.f32.partialorder %v654_v63, 0.0  ;;  %v1186_v3 = vmul.f32 0.01, %v654_v63  ;;  %vm1134_vm4 = vcmp.ge.f32.partialorder %v878_v0, 0.0  ;;  %v1242_v4 = vmul.f32 0.01, %v878_v0 }
  0xed   :  { %v646_v5 = vadd.f32 %v2799_v60, %v645_v1  ;;  %v870_v6 = vadd.f32 %v2799_v60, %v869_v2  ;;  %v2337_v7 = vpop.f32.mrf.mxu0  ;;  %v2393_v8 = vpop.f32.mrf.mxu1 }
  0xee   :  { %v1294_v9 = vsel %vm1078_vm3, %v654_v63, %v1186_v3  ;;  %v1350_v10 = vsel %vm1134_vm4, %v878_v0, %v1242_v4  ;;  %v657_v11 = vadd.f32 %v2337_v7, %v2799_v60  ;;  %v881_v12 = vadd.f32 %v2393_v8, %v2799_v60 }
  0xef   :  { %v2168_v13 = vpack.c.bf16 %v1294_v9, %v1294_v9  ;;  %v2224_v14 = vpack.c.bf16 %v1350_v10, %v1350_v10  ;;  %vm1076_vm6 = vcmp.ge.f32.partialorder %v646_v5, 0.0  ;;  %v1184_v15 = vmul.f32 0.01, %v646_v5  ;;  %v648_v16 = vpop.f32.mrf.mxu0  ;;  %v872_v17 = vpop.f32.mrf.mxu1 }
  0xf0   :  { %vm1132_vm7 = vcmp.ge.f32.partialorder %v870_v6, 0.0  ;;  %v1240_v18 = vmul.f32 0.01, %v870_v6  ;;  %vm1079_vm8 = vcmp.ge.f32.partialorder %v657_v11, 0.0  ;;  %v1187_v19 = vmul.f32 0.01, %v657_v11 }
  0xf1   :  { %1835 = vst.msk [vmem:[%s3525_s3 + $0x8] sm:$0xf] %vm1832_vm5, %v2168_v13  ;;  %1891 = vst.msk [vmem:[%s3525_s3 + $0xe8] sm:$0xf] %vm1832_vm5, %v2224_v14  ;;  %v1292_v20 = vsel %vm1076_vm6, %v646_v5, %v1184_v15  ;;  %vm1135_vm9 = vcmp.ge.f32.partialorder %v881_v12, 0.0  ;;  %v649_v22 = vadd.f32 %v2799_v60, %v648_v16  ;;  %v2340_v23 = vpop.f32.mrf.mxu0  ;;  %v2396_v24 = vpop.f32.mrf.mxu1  ;;  %v873_v28 = vadd.f32 %v2799_v60, %v872_v17 }
  0xf2   :  { %v1243_v21 = vmul.f32 0.01, %v881_v12  ;;  %v2166_v25 = vpack.c.bf16 %v1292_v20, %v1292_v20  ;;  %v1348_v26 = vsel %vm1132_vm7, %v870_v6, %v1240_v18  ;;  %v1295_v27 = vsel %vm1079_vm8, %v657_v11, %v1187_v19 }
  0xf3   :  { %v2222_v29 = vpack.c.bf16 %v1348_v26, %v1348_v26  ;;  %v2169_v30 = vpack.c.bf16 %v1295_v27, %v1295_v27  ;;  %vm1077_vm10 = vcmp.ge.f32.partialorder %v649_v22, 0.0  ;;  %v661_v32 = vpop.f32.mrf.mxu0  ;;  %v885_v33 = vpop.f32.mrf.mxu1  ;;  %v1185_v35 = vmul.f32 0.01, %v649_v22 }
  0xf4   :  { %v1351_v31 = vsel %vm1135_vm9, %v881_v12, %v1243_v21  ;;  %1833 = vst.msk [vmem:[%s3525_s3] sm:$0xf] %vm1832_vm5, %v2166_v25  ;;  %vm1133_vm11 = vcmp.ge.f32.partialorder %v873_v28, 0.0  ;;  %v1241_v36 = vmul.f32 0.01, %v873_v28  ;;  %v670_v37 = vadd.f32 %v2340_v23, %v2799_v60 }
  0xf5   :  { %v2225_v34 = vpack.c.bf16 %v1351_v31, %v1351_v31  ;;  %1889 = vst.msk [vmem:[%s3525_s3 + $0xe0] sm:$0xf] %vm1832_vm5, %v2222_v29  ;;  %1836 = vst.msk [vmem:[%s3525_s3 + $0xc] sm:$0xf] %vm1832_vm5, %v2169_v30  ;;  %v894_v38 = vadd.f32 %v2396_v24, %v2799_v60  ;;  %v662_v39 = vadd.f32 %v2799_v60, %v661_v32  ;;  %v2341_v41 = vpop.f32.mrf.mxu0  ;;  %v2397_v42 = vpop.f32.mrf.mxu1 }
  0xf6   :  { %v886_v40 = vadd.f32 %v2799_v60, %v885_v33  ;;  %v1293_v43 = vsel %vm1077_vm10, %v649_v22, %v1185_v35  ;;  %v1349_v44 = vsel %vm1133_vm11, %v873_v28, %v1241_v36  ;;  %v673_v45 = vadd.f32 %v2341_v41, %v2799_v60 }
  0xf7   :  { %1892 = vst.msk [vmem:[%s3525_s3 + $0xec] sm:$0xf] %vm1832_vm5, %v2225_v34  ;;  %v897_v46 = vadd.f32 %v2397_v42, %v2799_v60  ;;  %v2167_v47 = vpack.c.bf16 %v1293_v43, %v1293_v43  ;;  %v2223_v48 = vpack.c.bf16 %v1349_v44, %v1349_v44  ;;  %vm1082_vm12 = vcmp.ge.f32.partialorder %v670_v37, 0.0  ;;  %v664_v50 = vpop.f32.mrf.mxu0  ;;  %v888_v51 = vpop.f32.mrf.mxu1 }
  0xf8   :  { %v1190_v49 = vmul.f32 0.01, %v670_v37  ;;  %vm1138_vm13 = vcmp.ge.f32.partialorder %v894_v38, 0.0  ;;  %v1246_v52 = vmul.f32 0.01, %v894_v38  ;;  %vm1080_vm14 = vcmp.ge.f32.partialorder %v662_v39, 0.0 }
  0xf9   :  { %v1188_v53 = vmul.f32 0.01, %v662_v39  ;;  %1834 = vst.msk [vmem:[%s3525_s3 + $0x4] sm:$0xf] %vm1832_vm5, %v2167_v47  ;;  %1890 = vst.msk [vmem:[%s3525_s3 + $0xe4] sm:$0xf] %vm1832_vm5, %v2223_v48  ;;  %v2344_v56 = vpop.f32.mrf.mxu0  ;;  %v2400_v57 = vpop.f32.mrf.mxu1  ;;  %v665_v7 = vadd.f32 %v2799_v60, %v664_v50  ;;  %v889_v9 = vadd.f32 %v2799_v60, %v888_v51 }
  0xfa   :  { %v1298_v54 = vsel %vm1082_vm12, %v670_v37, %v1190_v49  ;;  %vm1136_vm15 = vcmp.ge.f32.partialorder %v886_v40, 0.0  ;;  %v1244_v55 = vmul.f32 0.01, %v886_v40  ;;  %vm1083_vm0 = vcmp.ge.f32.partialorder %v673_v45, 0.0 }
  0xfb   :  { %v2172_v58 = vpack.c.bf16 %v1298_v54, %v1298_v54  ;;  %v1354_v59 = vsel %vm1138_vm13, %v894_v38, %v1246_v52  ;;  %v1296_v61 = vsel %vm1080_vm14, %v662_v39, %v1188_v53  ;;  %v1191_v62 = vmul.f32 0.01, %v673_v45  ;;  %v677_v2 = vpop.f32.mrf.mxu0  ;;  %v901_v3 = vpop.f32.mrf.mxu1 }
  0xfc   :  { %v2228_v63 = vpack.c.bf16 %v1354_v59, %v1354_v59  ;;  %v2170_v0 = vpack.c.bf16 %v1296_v61, %v1296_v61  ;;  %v1352_v1 = vsel %vm1136_vm15, %v886_v40, %v1244_v55  ;;  %vm1139_vm1 = vcmp.ge.f32.partialorder %v897_v46, 0.0 }
  0xfd   :  { %1839 = vst.msk [vmem:[%s3525_s3 + $0x18] sm:$0xf] %vm1832_vm5, %v2172_v58  ;;  %v2226_v4 = vpack.c.bf16 %v1352_v1, %v1352_v1  ;;  %v1299_v5 = vsel %vm1083_vm0, %v673_v45, %v1191_v62  ;;  %v1247_v6 = vmul.f32 0.01, %v897_v46  ;;  %v686_v10 = vadd.f32 %v2344_v56, %v2799_v60  ;;  %v2345_v12 = vpop.f32.mrf.mxu0  ;;  %v2401_v13 = vpop.f32.mrf.mxu1 }
  0xfe   :  { %1895 = vst.msk [vmem:[%s3525_s3 + $0xf8] sm:$0xf] %vm1832_vm5, %v2228_v63  ;;  %1837 = vst.msk [vmem:[%s3525_s3 + $0x10] sm:$0xf] %vm1832_vm5, %v2170_v0  ;;  %v2173_v8 = vpack.c.bf16 %v1299_v5, %v1299_v5  ;;  %v910_v11 = vadd.f32 %v2400_v57, %v2799_v60  ;;  %vm1081_vm2 = vcmp.ge.f32.partialorder %v665_v7, 0.0  ;;  %v678_v16 = vadd.f32 %v2799_v60, %v677_v2 }
  0xff   :  { %1893 = vst.msk [vmem:[%s3525_s3 + $0xf0] sm:$0xf] %vm1832_vm5, %v2226_v4  ;;  %v1355_v14 = vsel %vm1139_vm1, %v897_v46, %v1247_v6  ;;  %v1189_v15 = vmul.f32 0.01, %v665_v7  ;;  %vm1137_vm3 = vcmp.ge.f32.partialorder %v889_v9, 0.0  ;;  %vm1086_vm4 = vcmp.ge.f32.partialorder %v686_v10, 0.0  ;;  %v680_v19 = vpop.f32.mrf.mxu0  ;;  %v904_v20 = vpop.f32.mrf.mxu1 }
 0x100   :  { %1840 = vst.msk [vmem:[%s3525_s3 + $0x1c] sm:$0xf] %vm1832_vm5, %v2173_v8  ;;  %v2229_v17 = vpack.c.bf16 %v1355_v14, %v1355_v14  ;;  %v1245_v18 = vmul.f32 0.01, %v889_v9  ;;  %v1194_v22 = vmul.f32 0.01, %v686_v10  ;;  %v902_v32 = vadd.f32 %v2799_v60, %v901_v3 }
 0x101   :  { %v1297_v21 = vsel %vm1081_vm2, %v665_v7, %v1189_v15  ;;  %vm1142_vm6 = vcmp.ge.f32.partialorder %v910_v11, 0.0  ;;  %v1250_v23 = vmul.f32 0.01, %v910_v11  ;;  %vm1084_vm7 = vcmp.ge.f32.partialorder %v678_v16, 0.0  ;;  %v2348_v27 = vpop.f32.mrf.mxu0  ;;  %v2404_v28 = vpop.f32.mrf.mxu1 }
 0x102   :  { %1896 = vst.msk [vmem:[%s3525_s3 + $0xfc] sm:$0xf] %vm1832_vm5, %v2229_v17  ;;  %v2171_v24 = vpack.c.bf16 %v1297_v21, %v1297_v21  ;;  %v1353_v25 = vsel %vm1137_vm3, %v889_v9, %v1245_v18  ;;  %v1192_v26 = vmul.f32 0.01, %v678_v16  ;;  %v1302_v30 = vsel %vm1086_vm4, %v686_v10, %v1194_v22 }
 0x103   :  { %v2227_v29 = vpack.c.bf16 %v1353_v25, %v1353_v25  ;;  %v1358_v31 = vsel %vm1142_vm6, %v910_v11, %v1250_v23  ;;  %v2176_v33 = vpack.c.bf16 %v1302_v30, %v1302_v30  ;;  %v689_v36 = vadd.f32 %v2345_v12, %v2799_v60  ;;  %v693_v37 = vpop.f32.mrf.mxu0  ;;  %v917_v38 = vpop.f32.mrf.mxu1 }
 0x104   :  { %1838 = vst.msk [vmem:[%s3525_s3 + $0x14] sm:$0xf] %vm1832_vm5, %v2171_v24  ;;  %v2232_v34 = vpack.c.bf16 %v1358_v31, %v1358_v31  ;;  %v1300_v35 = vsel %vm1084_vm7, %v678_v16, %v1192_v26  ;;  %vm1140_vm8 = vcmp.ge.f32.partialorder %v902_v32, 0.0  ;;  %v1248_v40 = vmul.f32 0.01, %v902_v32 }
 0x105   :  { %1894 = vst.msk [vmem:[%s3525_s3 + $0xf4] sm:$0xf] %vm1832_vm5, %v2227_v29  ;;  %v2174_v39 = vpack.c.bf16 %v1300_v35, %v1300_v35  ;;  %v913_v41 = vadd.f32 %v2401_v13, %v2799_v60  ;;  %1843 = vst.msk [vmem:[%s3525_s3 + $0x28] sm:$0xf] %vm1832_vm5, %v2176_v33  ;;  %vm1087_vm9 = vcmp.ge.f32.partialorder %v689_v36, 0.0  ;;  %v681_v43 = vadd.f32 %v2799_v60, %v680_v19  ;;  %v2349_v45 = vpop.f32.mrf.mxu0  ;;  %v2405_v46 = vpop.f32.mrf.mxu1 }
 0x106   :  { %1899 = vst.msk [vmem:[%s3525_s3 + $0x108] sm:$0xf] %vm1832_vm5, %v2232_v34  ;;  %v1195_v42 = vmul.f32 0.01, %v689_v36  ;;  %v905_v44 = vadd.f32 %v2799_v60, %v904_v20  ;;  %v1356_v47 = vsel %vm1140_vm8, %v902_v32, %v1248_v40  ;;  %v702_v49 = vadd.f32 %v2348_v27, %v2799_v60 }
 0x107   :  { %1841 = vst.msk [vmem:[%s3525_s3 + $0x20] sm:$0xf] %vm1832_vm5, %v2174_v39  ;;  %vm1143_vm10 = vcmp.ge.f32.partialorder %v913_v41, 0.0  ;;  %v1251_v48 = vmul.f32 0.01, %v913_v41  ;;  %v2230_v50 = vpack.c.bf16 %v1356_v47, %v1356_v47  ;;  %vm1085_vm11 = vcmp.ge.f32.partialorder %v681_v43, 0.0  ;;  %v696_v53 = vpop.f32.mrf.mxu0  ;;  %v920_v54 = vpop.f32.mrf.mxu1 }
 0x108   :  { %v1303_v51 = vsel %vm1087_vm9, %v689_v36, %v1195_v42  ;;  %v1193_v52 = vmul.f32 0.01, %v681_v43  ;;  %vm1141_vm12 = vcmp.ge.f32.partialorder %v905_v44, 0.0  ;;  %v1249_v57 = vmul.f32 0.01, %v905_v44 }
 0x109   :  { %v2177_v55 = vpack.c.bf16 %v1303_v51, %v1303_v51  ;;  %v1359_v56 = vsel %vm1143_vm10, %v913_v41, %v1251_v48  ;;  %1897 = vst.msk [vmem:[%s3525_s3 + $0x100] sm:$0xf] %vm1832_vm5, %v2230_v50  ;;  %vm1090_vm13 = vcmp.ge.f32.partialorder %v702_v49, 0.0  ;;  %v1198_v61 = vmul.f32 0.01, %v702_v49  ;;  %v2352_v62 = vpop.f32.mrf.mxu0  ;;  %v2408_v63 = vpop.f32.mrf.mxu1 }
 0x10a   :  { %v2233_v58 = vpack.c.bf16 %v1359_v56, %v1359_v56  ;;  %v1301_v59 = vsel %vm1085_vm11, %v681_v43, %v1193_v52  ;;  %v1357_v1 = vsel %vm1141_vm12, %v905_v44, %v1249_v57  ;;  %v926_v2 = vadd.f32 %v2404_v28, %v2799_v60 }
 0x10b   :  { %1844 = vst.msk [vmem:[%s3525_s3 + $0x2c] sm:$0xf] %vm1832_vm5, %v2177_v55  ;;  %v2175_v0 = vpack.c.bf16 %v1301_v59, %v1301_v59  ;;  %v694_v3 = vadd.f32 %v2799_v60, %v693_v37  ;;  %v2231_v4 = vpack.c.bf16 %v1357_v1, %v1357_v1  ;;  %v1306_v5 = vsel %vm1090_vm13, %v702_v49, %v1198_v61  ;;  %v709_v8 = vpop.f32.mrf.mxu0  ;;  %v933_v9 = vpop.f32.mrf.mxu1 }
 0x10c   :  { %1900 = vst.msk [vmem:[%s3525_s3 + $0x10c] sm:$0xf] %vm1832_vm5, %v2233_v58  ;;  %v918_v6 = vadd.f32 %v2799_v60, %v917_v38  ;;  %v705_v7 = vadd.f32 %v2349_v45, %v2799_v60  ;;  %v2180_v10 = vpack.c.bf16 %v1306_v5, %v1306_v5  ;;  %vm1146_vm14 = vcmp.ge.f32.partialorder %v926_v2, 0.0 }
 0x10d   :  { %1842 = vst.msk [vmem:[%s3525_s3 + $0x24] sm:$0xf] %vm1832_vm5, %v2175_v0  ;;  %v1254_v11 = vmul.f32 0.01, %v926_v2  ;;  %vm1088_vm15 = vcmp.ge.f32.partialorder %v694_v3, 0.0  ;;  %v2353_v14 = vpop.f32.mrf.mxu0  ;;  %v2409_v15 = vpop.f32.mrf.mxu1  ;;  %v929_v18 = vadd.f32 %v2405_v46, %v2799_v60  ;;  %v697_v19 = vadd.f32 %v2799_v60, %v696_v53 }
 0x10e   :  { %1898 = vst.msk [vmem:[%s3525_s3 + $0x104] sm:$0xf] %vm1832_vm5, %v2231_v4  ;;  %v1196_v12 = vmul.f32 0.01, %v694_v3  ;;  %vm1144_vm0 = vcmp.ge.f32.partialorder %v918_v6, 0.0  ;;  %vm1091_vm1 = vcmp.ge.f32.partialorder %v705_v7, 0.0  ;;  %v921_v23 = vadd.f32 %v2799_v60, %v920_v54 }
 0x10f   :  { %v1252_v13 = vmul.f32 0.01, %v918_v6  ;;  %1847 = vst.msk [vmem:[%s3525_s3 + $0x38] sm:$0xf] %vm1832_vm5, %v2180_v10  ;;  %v1362_v16 = vsel %vm1146_vm14, %v926_v2, %v1254_v11  ;;  %v1199_v17 = vmul.f32 0.01, %v705_v7  ;;  %v2935_v24 = vpop.f32.mrf.mxu0  ;;  %v2937_v25 = vpop.f32.mrf.mxu1  ;;  %v718_v35 = vadd.f32 %v2352_v62, %v2799_v60 }
 0x110   :  { %v2236_v20 = vpack.c.bf16 %v1362_v16, %v1362_v16  ;;  %v1304_v21 = vsel %vm1088_vm15, %v694_v3, %v1196_v12  ;;  %vm1147_vm2 = vcmp.ge.f32.partialorder %v929_v18, 0.0  ;;  %v1255_v30 = vmul.f32 0.01, %v929_v18 }
 0x111   :  { %v1360_v22 = vsel %vm1144_vm0, %v918_v6, %v1252_v13  ;;  %v2178_v26 = vpack.c.bf16 %v1304_v21, %v1304_v21  ;;  %v1307_v28 = vsel %vm1091_vm1, %v705_v7, %v1199_v17  ;;  %vm1089_vm3 = vcmp.ge.f32.partialorder %v697_v19, 0.0  ;;  %v2356_v32 = vpop.f32.mrf.mxu0  ;;  %v2412_v33 = vpop.f32.mrf.mxu1 }
 0x112   :  { %v2234_v27 = vpack.c.bf16 %v1360_v22, %v1360_v22  ;;  %1903 = vst.msk [vmem:[%s3525_s3 + $0x118] sm:$0xf] %vm1832_vm5, %v2236_v20  ;;  %v2181_v29 = vpack.c.bf16 %v1307_v28, %v1307_v28  ;;  %v1197_v31 = vmul.f32 0.01, %v697_v19  ;;  %vm1145_vm4 = vcmp.ge.f32.partialorder %v921_v23, 0.0 }
 0x113   :  { %1845 = vst.msk [vmem:[%s3525_s3 + $0x30] sm:$0xf] %vm1832_vm5, %v2178_v26  ;;  %v1253_v34 = vmul.f32 0.01, %v921_v23  ;;  %v942_v36 = vadd.f32 %v2408_v63, %v2799_v60  ;;  %v1363_v37 = vsel %vm1147_vm2, %v929_v18, %v1255_v30  ;;  %v710_v39 = vadd.f32 %v2799_v60, %v709_v8  ;;  %v725_v41 = vpop.f32.mrf.mxu0  ;;  %v2960_v42 = vpop.f32.mrf.mxu1 }
 0x114   :  { %1901 = vst.msk [vmem:[%s3525_s3 + $0x110] sm:$0xf] %vm1832_vm5, %v2234_v27  ;;  %1848 = vst.msk [vmem:[%s3525_s3 + $0x3c] sm:$0xf] %vm1832_vm5, %v2181_v29  ;;  %v1305_v38 = vsel %vm1089_vm3, %v697_v19, %v1197_v31  ;;  %v934_v40 = vadd.f32 %v2799_v60, %v933_v9  ;;  %v2237_v43 = vpack.c.bf16 %v1363_v37, %v1363_v37  ;;  %vm1094_vm6 = vcmp.ge.f32.partialorder %v718_v35, 0.0 }
 0x115   :  { %v2179_v44 = vpack.c.bf16 %v1305_v38, %v1305_v38  ;;  %v1361_v45 = vsel %vm1145_vm4, %v921_v23, %v1253_v34  ;;  %v1202_v47 = vmul.f32 0.01, %v718_v35  ;;  %vm1150_vm7 = vcmp.ge.f32.partialorder %v942_v36, 0.0  ;;  %v2962_v49 = vpop.f32.mrf.mxu0  ;;  %v2964_v50 = vpop.f32.mrf.mxu1 }
 0x116   :  { %v2235_v46 = vpack.c.bf16 %v1361_v45, %v1361_v45  ;;  %v1258_v48 = vmul.f32 0.01, %v942_v36  ;;  %1904 = vst.msk [vmem:[%s3525_s3 + $0x11c] sm:$0xf] %vm1832_vm5, %v2237_v43  ;;  %vm1092_vm8 = vcmp.ge.f32.partialorder %v710_v39, 0.0  ;;  %vm1148_vm9 = vcmp.ge.f32.partialorder %v934_v40, 0.0 }
 0x117   :  { %1846 = vst.msk [vmem:[%s3525_s3 + $0x34] sm:$0xf] %vm1832_vm5, %v2179_v44  ;;  %v1200_v51 = vmul.f32 0.01, %v710_v39  ;;  %v1256_v52 = vmul.f32 0.01, %v934_v40  ;;  %v1310_v53 = vsel %vm1094_vm6, %v718_v35, %v1202_v47  ;;  %v721_v55 = vadd.f32 %v2353_v14, %v2799_v60  ;;  %v2980_v57 = vpop.f32.mrf.mxu0  ;;  %v2982_v58 = vpop.f32.mrf.mxu1 }
 0x118   :  { %1902 = vst.msk [vmem:[%s3525_s3 + $0x114] sm:$0xf] %vm1832_vm5, %v2235_v46  ;;  %v1366_v54 = vsel %vm1150_vm7, %v942_v36, %v1258_v48  ;;  %v945_v56 = vadd.f32 %v2409_v15, %v2799_v60  ;;  %v2184_v59 = vpack.c.bf16 %v1310_v53, %v1310_v53  ;;  %v713_v6 = vadd.f32 %v2799_v60, %v2935_v24 }
 0x119   :  { %v2240_v61 = vpack.c.bf16 %v1366_v54, %v1366_v54  ;;  %v1308_v62 = vsel %vm1092_vm8, %v710_v39, %v1200_v51  ;;  %v1364_v63 = vsel %vm1148_vm9, %v934_v40, %v1256_v52  ;;  %vm1095_vm10 = vcmp.ge.f32.partialorder %v721_v55, 0.0  ;;  %v2984_v3 = vpop.f32.mrf.mxu0  ;;  %v2986_v4 = vpop.f32.mrf.mxu1 }
 0x11a   :  { %v2182_v0 = vpack.c.bf16 %v1308_v62, %v1308_v62  ;;  %v2238_v1 = vpack.c.bf16 %v1364_v63, %v1364_v63  ;;  %v1203_v2 = vmul.f32 0.01, %v721_v55  ;;  %1851 = vst.msk [vmem:[%s3525_s3 + $0x48] sm:$0xf] %vm1832_vm5, %v2184_v59  ;;  %vm1151_vm11 = vcmp.ge.f32.partialorder %v945_v56, 0.0 }
 0x11b   :  { %1907 = vst.msk [vmem:[%s3525_s3 + $0x128] sm:$0xf] %vm1832_vm5, %v2240_v61  ;;  %v1259_v5 = vmul.f32 0.01, %v945_v56  ;;  %v937_v7 = vadd.f32 %v2799_v60, %v2937_v25  ;;  %v734_v9 = vadd.f32 %v2356_v32, %v2799_v60  ;;  %v958_v10 = vadd.f32 %v2412_v33, %v2799_v60  ;;  %v3011_v12 = vpop.f32.mrf.mxu0  ;;  %v3013_v13 = vpop.f32.mrf.mxu1 }
 0x11c   :  { %1849 = vst.msk [vmem:[%s3525_s3 + $0x40] sm:$0xf] %vm1832_vm5, %v2182_v0  ;;  %1905 = vst.msk [vmem:[%s3525_s3 + $0x120] sm:$0xf] %vm1832_vm5, %v2238_v1  ;;  %v1311_v8 = vsel %vm1095_vm10, %v721_v55, %v1203_v2  ;;  %v726_v11 = vadd.f32 %v2799_v60, %v725_v41  ;;  %vm1093_vm12 = vcmp.ge.f32.partialorder %v713_v6, 0.0  ;;  %v950_v32 = vadd.f32 %v2799_v60, %v2960_v42 }
 0x11d   :  { %v2185_v14 = vpack.c.bf16 %v1311_v8, %v1311_v8  ;;  %v1367_v15 = vsel %vm1151_vm11, %v945_v56, %v1259_v5  ;;  %v1201_v16 = vmul.f32 0.01, %v713_v6  ;;  %vm1149_vm13 = vcmp.ge.f32.partialorder %v937_v7, 0.0  ;;  %v3015_v19 = vpop.f32.mrf.mxu0  ;;  %v3017_v20 = vpop.f32.mrf.mxu1 }
 0x11e   :  { %v2241_v17 = vpack.c.bf16 %v1367_v15, %v1367_v15  ;;  %v1257_v18 = vmul.f32 0.01, %v937_v7  ;;  %vm1098_vm14 = vcmp.ge.f32.partialorder %v734_v9, 0.0  ;;  %v1206_v22 = vmul.f32 0.01, %v734_v9 }
 0x11f   :  { %1852 = vst.msk [vmem:[%s3525_s3 + $0x4c] sm:$0xf] %vm1832_vm5, %v2185_v14  ;;  %v1309_v21 = vsel %vm1093_vm12, %v713_v6, %v1201_v16  ;;  %vm1154_vm15 = vcmp.ge.f32.partialorder %v958_v10, 0.0  ;;  %v1262_v23 = vmul.f32 0.01, %v958_v10  ;;  %vm1096_vm0 = vcmp.ge.f32.partialorder %v726_v11, 0.0  ;;  %v3027_v27 = vpop.f32.mrf.mxu0  ;;  %v3029_v28 = vpop.f32.mrf.mxu1 }
 0x120   :  { %1908 = vst.msk [vmem:[%s3525_s3 + $0x12c] sm:$0xf] %vm1832_vm5, %v2241_v17  ;;  %v2183_v24 = vpack.c.bf16 %v1309_v21, %v1309_v21  ;;  %v1365_v25 = vsel %vm1149_vm13, %v937_v7, %v1257_v18  ;;  %v1204_v26 = vmul.f32 0.01, %v726_v11  ;;  %v1314_v30 = vsel %vm1098_vm14, %v734_v9, %v1206_v22 }
 0x121   :  { %v2239_v29 = vpack.c.bf16 %v1365_v25, %v1365_v25  ;;  %v1370_v31 = vsel %vm1154_vm15, %v958_v10, %v1262_v23  ;;  %v2188_v33 = vpack.c.bf16 %v1314_v30, %v1314_v30  ;;  %v737_v36 = vadd.f32 %v2962_v49, %v2799_v60  ;;  %v3040_v37 = vpop.f32.mrf.mxu0  ;;  %v3042_v38 = vpop.f32.mrf.mxu1 }
 0x122   :  { %1850 = vst.msk [vmem:[%s3525_s3 + $0x44] sm:$0xf] %vm1832_vm5, %v2183_v24  ;;  %v2244_v34 = vpack.c.bf16 %v1370_v31, %v1370_v31  ;;  %v1312_v35 = vsel %vm1096_vm0, %v726_v11, %v1204_v26  ;;  %vm1152_vm1 = vcmp.ge.f32.partialorder %v950_v32, 0.0  ;;  %v1260_v40 = vmul.f32 0.01, %v950_v32 }
 0x123   :  { %1906 = vst.msk [vmem:[%s3525_s3 + $0x124] sm:$0xf] %vm1832_vm5, %v2239_v29  ;;  %v2186_v39 = vpack.c.bf16 %v1312_v35, %v1312_v35  ;;  %v961_v41 = vadd.f32 %v2964_v50, %v2799_v60  ;;  %1855 = vst.msk [vmem:[%s3525_s3 + $0x58] sm:$0xf] %vm1832_vm5, %v2188_v33  ;;  %vm1099_vm2 = vcmp.ge.f32.partialorder %v737_v36, 0.0  ;;  %v729_v43 = vadd.f32 %v2799_v60, %v2980_v57  ;;  %v3062_v45 = vpop.f32.mrf.mxu0  ;;  %v3064_v46 = vpop.f32.mrf.mxu1 }
 0x124   :  { %1911 = vst.msk [vmem:[%s3525_s3 + $0x138] sm:$0xf] %vm1832_vm5, %v2244_v34  ;;  %v1207_v42 = vmul.f32 0.01, %v737_v36  ;;  %v953_v44 = vadd.f32 %v2799_v60, %v2982_v58  ;;  %v1368_v47 = vsel %vm1152_vm1, %v950_v32, %v1260_v40  ;;  %v750_v49 = vadd.f32 %v2984_v3, %v2799_v60 }
 0x125   :  { %1853 = vst.msk [vmem:[%s3525_s3 + $0x50] sm:$0xf] %vm1832_vm5, %v2186_v39  ;;  %vm1155_vm3 = vcmp.ge.f32.partialorder %v961_v41, 0.0  ;;  %v1263_v48 = vmul.f32 0.01, %v961_v41  ;;  %v2242_v50 = vpack.c.bf16 %v1368_v47, %v1368_v47  ;;  %vm1097_vm4 = vcmp.ge.f32.partialorder %v729_v43, 0.0  ;;  %v3072_v53 = vpop.f32.mrf.mxu0  ;;  %v3074_v54 = vpop.f32.mrf.mxu1 }
 0x126   :  { %v1315_v51 = vsel %vm1099_vm2, %v737_v36, %v1207_v42  ;;  %v1205_v52 = vmul.f32 0.01, %v729_v43  ;;  %vm1153_vm6 = vcmp.ge.f32.partialorder %v953_v44, 0.0  ;;  %v1261_v57 = vmul.f32 0.01, %v953_v44 }
 0x127   :  { %v2189_v55 = vpack.c.bf16 %v1315_v51, %v1315_v51  ;;  %v1371_v56 = vsel %vm1155_vm3, %v961_v41, %v1263_v48  ;;  %1909 = vst.msk [vmem:[%s3525_s3 + $0x130] sm:$0xf] %vm1832_vm5, %v2242_v50  ;;  %vm1102_vm7 = vcmp.ge.f32.partialorder %v750_v49, 0.0  ;;  %v1210_v61 = vmul.f32 0.01, %v750_v49  ;;  %v3080_v62 = vpop.f32.mrf.mxu0  ;;  %v3082_v63 = vpop.f32.mrf.mxu1 }
 0x128   :  { %v2245_v58 = vpack.c.bf16 %v1371_v56, %v1371_v56  ;;  %v1313_v59 = vsel %vm1097_vm4, %v729_v43, %v1205_v52  ;;  %v1369_v1 = vsel %vm1153_vm6, %v953_v44, %v1261_v57  ;;  %v974_v2 = vadd.f32 %v2986_v4, %v2799_v60 }
 0x129   :  { %1856 = vst.msk [vmem:[%s3525_s3 + $0x5c] sm:$0xf] %vm1832_vm5, %v2189_v55  ;;  %v2187_v0 = vpack.c.bf16 %v1313_v59, %v1313_v59  ;;  %v742_v3 = vadd.f32 %v2799_v60, %v3011_v12  ;;  %v2243_v5 = vpack.c.bf16 %v1369_v1, %v1369_v1  ;;  %v1318_v6 = vsel %vm1102_vm7, %v750_v49, %v1210_v61  ;;  %v3100_v9 = vpop.f32.mrf.mxu0  ;;  %v3102_v10 = vpop.f32.mrf.mxu1 }
 0x12a   :  { %1912 = vst.msk [vmem:[%s3525_s3 + $0x13c] sm:$0xf] %vm1832_vm5, %v2245_v58  ;;  %v966_v7 = vadd.f32 %v2799_v60, %v3013_v13  ;;  %v753_v8 = vadd.f32 %v3015_v19, %v2799_v60  ;;  %v2192_v4 = vpack.c.bf16 %v1318_v6, %v1318_v6  ;;  %vm1158_vm8 = vcmp.ge.f32.partialorder %v974_v2, 0.0 }
 0x12b   :  { %1854 = vst.msk [vmem:[%s3525_s3 + $0x54] sm:$0xf] %vm1832_vm5, %v2187_v0  ;;  %v1266_v11 = vmul.f32 0.01, %v974_v2  ;;  %vm1100_vm9 = vcmp.ge.f32.partialorder %v742_v3, 0.0  ;;  %v3112_v14 = vpop.f32.mrf.mxu0  ;;  %v3114_v15 = vpop.f32.mrf.mxu1  ;;  %v977_v18 = vadd.f32 %v3017_v20, %v2799_v60  ;;  %v745_v19 = vadd.f32 %v2799_v60, %v3027_v27 }
 0x12c   :  { %1910 = vst.msk [vmem:[%s3525_s3 + $0x134] sm:$0xf] %vm1832_vm5, %v2243_v5  ;;  %v1208_v12 = vmul.f32 0.01, %v742_v3  ;;  %vm1156_vm10 = vcmp.ge.f32.partialorder %v966_v7, 0.0  ;;  %vm1103_vm11 = vcmp.ge.f32.partialorder %v753_v8, 0.0  ;;  %v969_v24 = vadd.f32 %v2799_v60, %v3029_v28 }
 0x12d   :  { %v1264_v13 = vmul.f32 0.01, %v966_v7  ;;  %1859 = vst.msk [vmem:[%s3525_s3 + $0x68] sm:$0xf] %vm1832_vm5, %v2192_v4  ;;  %v1374_v16 = vsel %vm1158_vm8, %v974_v2, %v1266_v11  ;;  %v1211_v17 = vmul.f32 0.01, %v753_v8  ;;  %v3126_v25 = vpop.f32.mrf.mxu0  ;;  %v3128_v26 = vpop.f32.mrf.mxu1  ;;  %v766_v35 = vadd.f32 %v3040_v37, %v2799_v60 }
 0x12e   :  { %v2248_v21 = vpack.c.bf16 %v1374_v16, %v1374_v16  ;;  %v1316_v22 = vsel %vm1100_vm9, %v742_v3, %v1208_v12  ;;  %vm1159_vm12 = vcmp.ge.f32.partialorder %v977_v18, 0.0  ;;  %v1267_v27 = vmul.f32 0.01, %v977_v18 }
 0x12f   :  { %v1372_v23 = vsel %vm1156_vm10, %v966_v7, %v1264_v13  ;;  %v2190_v29 = vpack.c.bf16 %v1316_v22, %v1316_v22  ;;  %v1319_v31 = vsel %vm1103_vm11, %v753_v8, %v1211_v17  ;;  %vm1101_vm13 = vcmp.ge.f32.partialorder %v745_v19, 0.0  ;;  %v3135_v33 = vpop.f32.mrf.mxu0  ;;  %v3137_v28 = vpop.f32.mrf.mxu1 }
 0x130   :  { %v2246_v30 = vpack.c.bf16 %v1372_v23, %v1372_v23  ;;  %1915 = vst.msk [vmem:[%s3525_s3 + $0x148] sm:$0xf] %vm1832_vm5, %v2248_v21  ;;  %v2193_v20 = vpack.c.bf16 %v1319_v31, %v1319_v31  ;;  %v1209_v32 = vmul.f32 0.01, %v745_v19  ;;  %vm1157_vm14 = vcmp.ge.f32.partialorder %v969_v24, 0.0 }
 0x131   :  { %1857 = vst.msk [vmem:[%s3525_s3 + $0x60] sm:$0xf] %vm1832_vm5, %v2190_v29  ;;  %v1265_v34 = vmul.f32 0.01, %v969_v24  ;;  %v990_v36 = vadd.f32 %v3042_v38, %v2799_v60  ;;  %v1375_v39 = vsel %vm1159_vm12, %v977_v18, %v1267_v27  ;;  %v758_v41 = vadd.f32 %v2799_v60, %v3062_v45  ;;  %v3159_v43 = vpop.f32.mrf.mxu0  ;;  %v3161_v44 = vpop.f32.mrf.mxu1 }
 0x132   :  { %1913 = vst.msk [vmem:[%s3525_s3 + $0x140] sm:$0xf] %vm1832_vm5, %v2246_v30  ;;  %1860 = vst.msk [vmem:[%s3525_s3 + $0x6c] sm:$0xf] %vm1832_vm5, %v2193_v20  ;;  %v1317_v40 = vsel %vm1101_vm13, %v745_v19, %v1209_v32  ;;  %v982_v42 = vadd.f32 %v2799_v60, %v3064_v46  ;;  %v2249_v37 = vpack.c.bf16 %v1375_v39, %v1375_v39  ;;  %vm1106_vm15 = vcmp.ge.f32.partialorder %v766_v35, 0.0 }
 0x133   :  { %v2191_v47 = vpack.c.bf16 %v1317_v40, %v1317_v40  ;;  %v1373_v38 = vsel %vm1157_vm14, %v969_v24, %v1265_v34  ;;  %v1214_v49 = vmul.f32 0.01, %v766_v35  ;;  %vm1162_vm0 = vcmp.ge.f32.partialorder %v990_v36, 0.0  ;;  %v3163_v51 = vpop.f32.mrf.mxu0  ;;  %v3165_v52 = vpop.f32.mrf.mxu1 }
 0x134   :  { %v2247_v48 = vpack.c.bf16 %v1373_v38, %v1373_v38  ;;  %v1270_v50 = vmul.f32 0.01, %v990_v36  ;;  %1916 = vst.msk [vmem:[%s3525_s3 + $0x14c] sm:$0xf] %vm1832_vm5, %v2249_v37  ;;  %vm1104_vm1 = vcmp.ge.f32.partialorder %v758_v41, 0.0  ;;  %vm1160_vm2 = vcmp.ge.f32.partialorder %v982_v42, 0.0 }
 0x135   :  { %1858 = vst.msk [vmem:[%s3525_s3 + $0x64] sm:$0xf] %vm1832_vm5, %v2191_v47  ;;  %v1212_v45 = vmul.f32 0.01, %v758_v41  ;;  %v1268_v46 = vmul.f32 0.01, %v982_v42  ;;  %v1322_v55 = vsel %vm1106_vm15, %v766_v35, %v1214_v49  ;;  %v769_v57 = vadd.f32 %v3072_v53, %v2799_v60  ;;  %v3183_v59 = vpop.f32.mrf.mxu0  ;;  %v3185_v61 = vpop.f32.mrf.mxu1 }
 0x136   :  { %1914 = vst.msk [vmem:[%s3525_s3 + $0x144] sm:$0xf] %vm1832_vm5, %v2247_v48  ;;  %v1378_v56 = vsel %vm1162_vm0, %v990_v36, %v1270_v50  ;;  %v993_v58 = vadd.f32 %v3074_v54, %v2799_v60  ;;  %v2196_v0 = vpack.c.bf16 %v1322_v55, %v1322_v55  ;;  %v761_v54 = vadd.f32 %v2799_v60, %v3080_v62 }
 0x137   :  { %v2252_v1 = vpack.c.bf16 %v1378_v56, %v1378_v56  ;;  %v1320_v2 = vsel %vm1104_vm1, %v758_v41, %v1212_v45  ;;  %v1376_v3 = vsel %vm1160_vm2, %v982_v42, %v1268_v46  ;;  %vm1107_vm3 = vcmp.ge.f32.partialorder %v769_v57, 0.0  ;;  %v3187_v8 = vpop.f32.mrf.mxu0  ;;  %v3189_v4 = vpop.f32.mrf.mxu1 }
 0x138   :  { %v2194_v5 = vpack.c.bf16 %v1320_v2, %v1320_v2  ;;  %v2250_v6 = vpack.c.bf16 %v1376_v3, %v1376_v3  ;;  %v1215_v7 = vmul.f32 0.01, %v769_v57  ;;  %1863 = vst.msk [vmem:[%s3525_s3 + $0x78] sm:$0xf] %vm1832_vm5, %v2196_v0  ;;  %vm1163_vm4 = vcmp.ge.f32.partialorder %v993_v58, 0.0 }
 0x139   :  { %1919 = vst.msk [vmem:[%s3525_s3 + $0x158] sm:$0xf] %vm1832_vm5, %v2252_v1  ;;  %v1271_v53 = vmul.f32 0.01, %v993_v58  ;;  %v985_v11 = vadd.f32 %v2799_v60, %v3082_v63  ;;  %v782_v13 = vadd.f32 %v3100_v9, %v2799_v60  ;;  %v1006_v62 = vadd.f32 %v3102_v10, %v2799_v60  ;;  %v3217_v16 = vpop.f32.mrf.mxu0  ;;  %v3219_v21 = vpop.f32.mrf.mxu1 }
 0x13a   :  { %1861 = vst.msk [vmem:[%s3525_s3 + $0x70] sm:$0xf] %vm1832_vm5, %v2194_v5  ;;  %1917 = vst.msk [vmem:[%s3525_s3 + $0x150] sm:$0xf] %vm1832_vm5, %v2250_v6  ;;  %v1323_v12 = vsel %vm1107_vm3, %v769_v57, %v1215_v7  ;;  %v774_v63 = vadd.f32 %v2799_v60, %v3112_v14  ;;  %vm1105_vm6 = vcmp.ge.f32.partialorder %v761_v54, 0.0  ;;  %v998_v35 = vadd.f32 %v2799_v60, %v3114_v15 }
 0x13b   :  { %v2197_v17 = vpack.c.bf16 %v1323_v12, %v1323_v12  ;;  %v1379_v18 = vsel %vm1163_vm4, %v993_v58, %v1271_v53  ;;  %v1213_v19 = vmul.f32 0.01, %v761_v54  ;;  %vm1161_vm7 = vcmp.ge.f32.partialorder %v985_v11, 0.0  ;;  %v3221_v24 = vpop.f32.mrf.mxu0  ;;  %v3235_v36 = vpop.f32.mrf.mxu1  ;;  %v3283_v6 = vld [vmem:[#allocation4] ss:$0 sm:$0xff] }
 0x13c   :  { %v2253_v22 = vpack.c.bf16 %v1379_v18, %v1379_v18  ;;  %v1269_v23 = vmul.f32 0.01, %v985_v11  ;;  %vm1110_vm8 = vcmp.ge.f32.partialorder %v782_v13, 0.0  ;;  %v1218_v10 = vmul.f32 0.01, %v782_v13 }
 0x13d   :  { %1864 = vst.msk [vmem:[%s3525_s3 + $0x7c] sm:$0xf] %vm1832_vm5, %v2197_v17  ;;  %v1321_v9 = vsel %vm1105_vm6, %v761_v54, %v1213_v19  ;;  %vm1166_vm9 = vcmp.ge.f32.partialorder %v1006_v62, 0.0  ;;  %v1274_v14 = vmul.f32 0.01, %v1006_v62  ;;  %vm1108_vm10 = vcmp.ge.f32.partialorder %v774_v63, 0.0  ;;  %v3231_v20 = vpop.f32.mrf.mxu0  ;;  %v3271_v55 = vpop.f32.mrf.mxu1 }
 0x13e   :  { %1920 = vst.msk [vmem:[%s3525_s3 + $0x15c] sm:$0xf] %vm1832_vm5, %v2253_v22  ;;  %v2195_v29 = vpack.c.bf16 %v1321_v9, %v1321_v9  ;;  %v1377_v30 = vsel %vm1161_vm7, %v985_v11, %v1269_v23  ;;  %v1216_v31 = vmul.f32 0.01, %v774_v63  ;;  %v1326_v32 = vsel %vm1110_vm8, %v782_v13, %v1218_v10 }
 0x13f   :  { %v2251_v27 = vpack.c.bf16 %v1377_v30, %v1377_v30  ;;  %v1382_v34 = vsel %vm1166_vm9, %v1006_v62, %v1274_v14  ;;  %v2200_v39 = vpack.c.bf16 %v1326_v32, %v1326_v32  ;;  %v785_v42 = vadd.f32 %v3126_v25, %v2799_v60  ;;  %v3243_v37 = vpop.f32.mrf.mxu0  ;;  %v3289_v54 = vpop.f32.mrf.mxu1 }
 0x140   :  { %1862 = vst.msk [vmem:[%s3525_s3 + $0x74] sm:$0xf] %vm1832_vm5, %v2195_v29  ;;  %v2256_v40 = vpack.c.bf16 %v1382_v34, %v1382_v34  ;;  %v1324_v41 = vsel %vm1108_vm10, %v774_v63, %v1216_v31  ;;  %vm1164_vm11 = vcmp.ge.f32.partialorder %v998_v35, 0.0  ;;  %v1272_v47 = vmul.f32 0.01, %v998_v35 }
 0x141   :  { %1918 = vst.msk [vmem:[%s3525_s3 + $0x154] sm:$0xf] %vm1832_vm5, %v2251_v27  ;;  %v2198_v15 = vpack.c.bf16 %v1324_v41, %v1324_v41  ;;  %v1009_v38 = vadd.f32 %v3128_v26, %v2799_v60  ;;  %1867 = vst.msk [vmem:[%s3525_s3 + $0x88] sm:$0xf] %vm1832_vm5, %v2200_v39  ;;  %vm1111_vm12 = vcmp.ge.f32.partialorder %v785_v42, 0.0  ;;  %v777_v48 = vadd.f32 %v2799_v60, %v3135_v33  ;;  %v3263_v50 = vpop.f32.mrf.mxu0  ;;  %v3317_v23 = vpop.f32.mrf.mxu1 }
 0x142   :  { %1923 = vst.msk [vmem:[%s3525_s3 + $0x168] sm:$0xf] %vm1832_vm5, %v2256_v40  ;;  %v1219_v25 = vmul.f32 0.01, %v785_v42  ;;  %v1001_v49 = vadd.f32 %v2799_v60, %v3137_v28  ;;  %v1380_v26 = vsel %vm1164_vm11, %v998_v35, %v1272_v47  ;;  %v798_v46 = vadd.f32 %v3159_v43, %v2799_v60 }
 0x143   :  { %1865 = vst.msk [vmem:[%s3525_s3 + $0x80] sm:$0xf] %vm1832_vm5, %v2198_v15  ;;  %vm1167_vm13 = vcmp.ge.f32.partialorder %v1009_v38, 0.0  ;;  %v1275_v45 = vmul.f32 0.01, %v1009_v38  ;;  %v2254_v56 = vpack.c.bf16 %v1380_v26, %v1380_v26  ;;  %vm1109_vm14 = vcmp.ge.f32.partialorder %v777_v48, 0.0  ;;  %v3273_v28 = vpop.f32.mrf.mxu0  ;;  %v3339_v40 = vpop.f32.mrf.mxu1 }
 0x144   :  { %v1327_v33 = vsel %vm1111_vm12, %v785_v42, %v1219_v25  ;;  %v1217_v57 = vmul.f32 0.01, %v777_v48  ;;  %vm1165_vm15 = vcmp.ge.f32.partialorder %v1001_v49, 0.0  ;;  %v1273_v1 = vmul.f32 0.01, %v1001_v49 }
 0x145   :  { %v2201_v58 = vpack.c.bf16 %v1327_v33, %v1327_v33  ;;  %v1383_v0 = vsel %vm1167_vm13, %v1009_v38, %v1275_v45  ;;  %1921 = vst.msk [vmem:[%s3525_s3 + $0x160] sm:$0xf] %vm1832_vm5, %v2254_v56  ;;  %vm1114_vm0 = vcmp.ge.f32.partialorder %v798_v46, 0.0  ;;  %v1222_v60 = vmul.f32 0.01, %v798_v46  ;;  %v3291_v11 = vpop.f32.mrf.mxu0  ;;  %v2437_v45 = vpop.f32.mrf.mxu1 }
 0x146   :  { %v2257_v2 = vpack.c.bf16 %v1383_v0, %v1383_v0  ;;  %v1325_v3 = vsel %vm1109_vm14, %v777_v48, %v1217_v57  ;;  %v1381_v5 = vsel %vm1165_vm15, %v1001_v49, %v1273_v1  ;;  %v1022_v7 = vadd.f32 %v3283_v6, %v3161_v44 }
 0x147   :  { %1868 = vst.msk [vmem:[%s3525_s3 + $0x8c] sm:$0xf] %vm1832_vm5, %v2201_v58  ;;  %v2199_v43 = vpack.c.bf16 %v1325_v3, %v1325_v3  ;;  %v790_v53 = vadd.f32 %v3283_v6, %v3163_v51  ;;  %v2255_v12 = vpack.c.bf16 %v1381_v5, %v1381_v5  ;;  %v1330_v13 = vsel %vm1114_vm0, %v798_v46, %v1222_v60  ;;  %v3319_v9 = vpop.f32.mrf.mxu0 }
 0x148   :  { %1924 = vst.msk [vmem:[%s3525_s3 + $0x16c] sm:$0xf] %vm1832_vm5, %v2257_v2  ;;  %v1014_v62 = vadd.f32 %v3283_v6, %v3165_v52  ;;  %v801_v44 = vadd.f32 %v3283_v6, %v3183_v59  ;;  %v2204_v51 = vpack.c.bf16 %v1330_v13, %v1330_v13  ;;  %vm1170_vm1 = vcmp.ge.f32.partialorder %v1022_v7, 0.0 }
 0x149   :  { %1866 = vst.msk [vmem:[%s3525_s3 + $0x84] sm:$0xf] %vm1832_vm5, %v2199_v43  ;;  %v1278_v63 = vmul.f32 0.01, %v1022_v7  ;;  %vm1112_vm2 = vcmp.ge.f32.partialorder %v790_v53, 0.0  ;;  %v1025_v19 = vadd.f32 %v3283_v6, %v3185_v61  ;;  %v793_v22 = vadd.f32 %v3283_v6, %v3187_v8  ;;  %v3341_v41 = vpop.f32.mrf.mxu0 }
 0x14a   :  { %1922 = vst.msk [vmem:[%s3525_s3 + $0x164] sm:$0xf] %vm1832_vm5, %v2255_v12  ;;  %v1220_v17 = vmul.f32 0.01, %v790_v53  ;;  %vm1168_vm3 = vcmp.ge.f32.partialorder %v1014_v62, 0.0  ;;  %vm1115_vm4 = vcmp.ge.f32.partialorder %v801_v44, 0.0  ;;  %v1017_v30 = vadd.f32 %v3283_v6, %v3189_v4 }
 0x14b   :  { %v1276_v52 = vmul.f32 0.01, %v1014_v62  ;;  %1871 = vst.msk [vmem:[%s3525_s3 + $0x98] sm:$0xf] %vm1832_vm5, %v2204_v51  ;;  %v1386_v59 = vsel %vm1170_vm1, %v1022_v7, %v1278_v63  ;;  %v1223_v18 = vmul.f32 0.01, %v801_v44  ;;  %v814_v35 = vadd.f32 %v3283_v6, %v3217_v16  ;;  %v3359_v46 = vpop.f32.mrf.mxu0 }
 0x14c   :  { %v2260_v10 = vpack.c.bf16 %v1386_v59, %v1386_v59  ;;  %v1328_v14 = vsel %vm1112_vm2, %v790_v53, %v1220_v17  ;;  %vm1171_vm6 = vcmp.ge.f32.partialorder %v1025_v19, 0.0  ;;  %v1279_v8 = vmul.f32 0.01, %v1025_v19  ;;  %v1048_v53 = vpop.f32.mrf.mxu1 }
 0x14d   :  { %v1384_v29 = vsel %vm1168_vm3, %v1014_v62, %v1276_v52  ;;  %v2202_v31 = vpack.c.bf16 %v1328_v14, %v1328_v14  ;;  %v1331_v32 = vsel %vm1115_vm4, %v801_v44, %v1223_v18  ;;  %vm1113_vm7 = vcmp.ge.f32.partialorder %v793_v22, 0.0  ;;  %v3381_v12 = vpop.f32.mrf.mxu0 }
 0x14e   :  { %v2258_v27 = vpack.c.bf16 %v1384_v29, %v1384_v29  ;;  %1927 = vst.msk [vmem:[%s3525_s3 + $0x178] sm:$0xf] %vm1832_vm5, %v2260_v10  ;;  %v2205_v61 = vpack.c.bf16 %v1331_v32, %v1331_v32  ;;  %v1221_v34 = vmul.f32 0.01, %v793_v22  ;;  %vm1169_vm8 = vcmp.ge.f32.partialorder %v1017_v30, 0.0 }
 0x14f   :  { %1869 = vst.msk [vmem:[%s3525_s3 + $0x90] sm:$0xf] %vm1832_vm5, %v2202_v31  ;;  %v1277_v4 = vmul.f32 0.01, %v1017_v30  ;;  %v1038_v39 = vadd.f32 %v3283_v6, %v3219_v21  ;;  %v1387_v42 = vsel %vm1171_vm6, %v1025_v19, %v1279_v8  ;;  %v806_v47 = vadd.f32 %v3283_v6, %v3221_v24  ;;  %v2440_v19 = vpop.f32.mrf.mxu1 }
 0x150   :  { %1925 = vst.msk [vmem:[%s3525_s3 + $0x170] sm:$0xf] %vm1832_vm5, %v2258_v27  ;;  %1872 = vst.msk [vmem:[%s3525_s3 + $0x9c] sm:$0xf] %vm1832_vm5, %v2205_v61  ;;  %v1329_v15 = vsel %vm1113_vm7, %v793_v22, %v1221_v34  ;;  %v1030_v16 = vadd.f32 %v3283_v6, %v3235_v36  ;;  %v2261_v38 = vpack.c.bf16 %v1387_v42, %v1387_v42  ;;  %vm1118_vm9 = vcmp.ge.f32.partialorder %v814_v35, 0.0  ;;  %v3401_v22 = vpop.f32.mrf.mxu0 }
 0x151   :  { %v2203_v25 = vpack.c.bf16 %v1329_v15, %v1329_v15  ;;  %v1385_v21 = vsel %vm1169_vm8, %v1017_v30, %v1277_v4  ;;  %v1226_v49 = vmul.f32 0.01, %v814_v35  ;;  %vm1174_vm10 = vcmp.ge.f32.partialorder %v1038_v39, 0.0 }
 0x152   :  { %v2259_v48 = vpack.c.bf16 %v1385_v21, %v1385_v21  ;;  %v1282_v26 = vmul.f32 0.01, %v1038_v39  ;;  %1928 = vst.msk [vmem:[%s3525_s3 + $0x17c] sm:$0xf] %vm1832_vm5, %v2261_v38  ;;  %vm1116_vm11 = vcmp.ge.f32.partialorder %v806_v47, 0.0  ;;  %vm1172_vm12 = vcmp.ge.f32.partialorder %v1030_v16, 0.0 }
 0x153   :  { %1870 = vst.msk [vmem:[%s3525_s3 + $0x94] sm:$0xf] %vm1832_vm5, %v2203_v25  ;;  %v1224_v24 = vmul.f32 0.01, %v806_v47  ;;  %v1280_v36 = vmul.f32 0.01, %v1030_v16  ;;  %v1334_v56 = vsel %vm1118_vm9, %v814_v35, %v1226_v49  ;;  %v817_v57 = vadd.f32 %v3283_v6, %v3231_v20 }
 0x154   :  { %1926 = vst.msk [vmem:[%s3525_s3 + $0x174] sm:$0xf] %vm1832_vm5, %v2259_v48  ;;  %v1390_v33 = vsel %vm1174_vm10, %v1038_v39, %v1282_v26  ;;  %v1041_v58 = vadd.f32 %v3283_v6, %v3271_v55  ;;  %v2208_v0 = vpack.c.bf16 %v1334_v56, %v1334_v56  ;;  %v809_v55 = vadd.f32 %v3283_v6, %v3243_v37  ;;  %v1061_v39 = vpop.f32.mrf.mxu1 }
 0x155   :  { %v2264_v1 = vpack.c.bf16 %v1390_v33, %v1390_v33  ;;  %v1332_v2 = vsel %vm1116_vm11, %v806_v47, %v1224_v24  ;;  %v1388_v3 = vsel %vm1172_vm12, %v1030_v16, %v1280_v36  ;;  %vm1119_vm13 = vcmp.ge.f32.partialorder %v817_v57, 0.0 }
 0x156   :  { %v2206_v60 = vpack.c.bf16 %v1332_v2, %v1332_v2  ;;  %v2262_v43 = vpack.c.bf16 %v1388_v3, %v1388_v3  ;;  %v1227_v5 = vmul.f32 0.01, %v817_v57  ;;  %1875 = vst.msk [vmem:[%s3525_s3 + $0xa8] sm:$0xf] %vm1832_vm5, %v2208_v0  ;;  %vm1175_vm14 = vcmp.ge.f32.partialorder %v1041_v58, 0.0  ;;  %v2441_v24 = vpop.f32.mrf.mxu1 }
 0x157   :  { %1931 = vst.msk [vmem:[%s3525_s3 + $0x188] sm:$0xf] %vm1832_vm5, %v2264_v1  ;;  %v1283_v20 = vmul.f32 0.01, %v1041_v58  ;;  %v1033_v7 = vadd.f32 %v3283_v6, %v3289_v54  ;;  %v830_v37 = vadd.f32 %v3283_v6, %v3263_v50  ;;  %v1054_v54 = vadd.f32 %v3283_v6, %v3317_v23 }
 0x158   :  { %1873 = vst.msk [vmem:[%s3525_s3 + $0xa0] sm:$0xf] %vm1832_vm5, %v2206_v60  ;;  %1929 = vst.msk [vmem:[%s3525_s3 + $0x180] sm:$0xf] %vm1832_vm5, %v2262_v43  ;;  %v1335_v13 = vsel %vm1119_vm13, %v817_v57, %v1227_v5  ;;  %v822_v62 = vadd.f32 %v3283_v6, %v3273_v28  ;;  %vm1117_vm15 = vcmp.ge.f32.partialorder %v809_v55, 0.0  ;;  %v1046_v31 = vadd.f32 %v3283_v6, %v3339_v40  ;;  %v3420_v40 = vpop.f32.mrf.mxu0  ;;  %v1064_v5 = vpop.f32.mrf.mxu1 }
 0x159   :  { %v2209_v44 = vpack.c.bf16 %v1335_v13, %v1335_v13  ;;  %v1391_v51 = vsel %vm1175_vm14, %v1041_v58, %v1283_v20  ;;  %v1225_v63 = vmul.f32 0.01, %v809_v55  ;;  %vm1173_vm0 = vcmp.ge.f32.partialorder %v1033_v7, 0.0 }
 0x15a   :  { %v2265_v17 = vpack.c.bf16 %v1391_v51, %v1391_v51  ;;  %v1281_v52 = vmul.f32 0.01, %v1033_v7  ;;  %vm1122_vm1 = vcmp.ge.f32.partialorder %v830_v37, 0.0  ;;  %v1230_v59 = vmul.f32 0.01, %v830_v37  ;;  %v853_v36 = vpop.f32.mrf.mxu0 }
 0x15b   :  { %1876 = vst.msk [vmem:[%s3525_s3 + $0xac] sm:$0xf] %vm1832_vm5, %v2209_v44  ;;  %v1333_v50 = vsel %vm1117_vm15, %v809_v55, %v1225_v63  ;;  %vm1178_vm2 = vcmp.ge.f32.partialorder %v1054_v54, 0.0  ;;  %v1286_v18 = vmul.f32 0.01, %v1054_v54  ;;  %vm1120_vm3 = vcmp.ge.f32.partialorder %v822_v62, 0.0 }
 0x15c   :  { %1932 = vst.msk [vmem:[%s3525_s3 + $0x18c] sm:$0xf] %vm1832_vm5, %v2265_v17  ;;  %v2207_v28 = vpack.c.bf16 %v1333_v50, %v1333_v50  ;;  %v1389_v23 = vsel %vm1173_vm0, %v1033_v7, %v1281_v52  ;;  %v1228_v10 = vmul.f32 0.01, %v822_v62  ;;  %v1338_v29 = vsel %vm1122_vm1, %v830_v37, %v1230_v59  ;;  %v2389_v20 = vpop.f32.mrf.mxu0 }
 0x15d   :  { %v2263_v14 = vpack.c.bf16 %v1389_v23, %v1389_v23  ;;  %v1394_v30 = vsel %vm1178_vm2, %v1054_v54, %v1286_v18  ;;  %v2212_v27 = vpack.c.bf16 %v1338_v29, %v1338_v29  ;;  %v833_v8 = vadd.f32 %v3283_v6, %v3291_v11 }
 0x15e   :  { %1874 = vst.msk [vmem:[%s3525_s3 + $0xa4] sm:$0xf] %vm1832_vm5, %v2207_v28  ;;  %v2268_v32 = vpack.c.bf16 %v1394_v30, %v1394_v30  ;;  %v1336_v61 = vsel %vm1120_vm3, %v822_v62, %v1228_v10  ;;  %vm1176_vm4 = vcmp.ge.f32.partialorder %v1046_v31, 0.0  ;;  %v1284_v4 = vmul.f32 0.01, %v1046_v31  ;;  %v856_v50 = vpop.f32.mrf.mxu0 }
 0x15f   :  { %1930 = vst.msk [vmem:[%s3525_s3 + $0x184] sm:$0xf] %vm1832_vm5, %v2263_v14  ;;  %v2210_v34 = vpack.c.bf16 %v1336_v61, %v1336_v61  ;;  %v1057_v35 = vadd.f32 %v3283_v6, %v2437_v45  ;;  %1879 = vst.msk [vmem:[%s3525_s3 + $0xb8] sm:$0xf] %vm1832_vm5, %v2212_v27  ;;  %vm1123_vm6 = vcmp.ge.f32.partialorder %v833_v8, 0.0  ;;  %v825_v42 = vadd.f32 %v3283_v6, %v3319_v9 }
 0x160   :  { %1935 = vst.msk [vmem:[%s3525_s3 + $0x198] sm:$0xf] %vm1832_vm5, %v2268_v32  ;;  %v1231_v11 = vmul.f32 0.01, %v833_v8  ;;  %v1049_v15 = vadd.f32 %v3283_v6, %v1048_v53  ;;  %v1392_v47 = vsel %vm1176_vm4, %v1046_v31, %v1284_v4  ;;  %v846_v38 = vadd.f32 %v3283_v6, %v3341_v41 }
 0x161   :  { %1877 = vst.msk [vmem:[%s3525_s3 + $0xb0] sm:$0xf] %vm1832_vm5, %v2210_v34  ;;  %vm1179_vm7 = vcmp.ge.f32.partialorder %v1057_v35, 0.0  ;;  %v1287_v16 = vmul.f32 0.01, %v1057_v35  ;;  %v2266_v25 = vpack.c.bf16 %v1392_v47, %v1392_v47  ;;  %vm1121_vm8 = vcmp.ge.f32.partialorder %v825_v42, 0.0 }
 0x162   :  { %v1339_v21 = vsel %vm1123_vm6, %v833_v8, %v1231_v11  ;;  %v1229_v48 = vmul.f32 0.01, %v825_v42  ;;  %vm1177_vm9 = vcmp.ge.f32.partialorder %v1049_v15, 0.0  ;;  %v1285_v9 = vmul.f32 0.01, %v1049_v15 }
 0x163   :  { %v2213_v49 = vpack.c.bf16 %v1339_v21, %v1339_v21  ;;  %v1395_v26 = vsel %vm1179_vm7, %v1057_v35, %v1287_v16  ;;  %1933 = vst.msk [vmem:[%s3525_s3 + $0x190] sm:$0xf] %vm1832_vm5, %v2266_v25  ;;  %vm1126_vm10 = vcmp.ge.f32.partialorder %v846_v38, 0.0  ;;  %v1234_v33 = vmul.f32 0.01, %v846_v38 }
 0x164   :  { %v2269_v45 = vpack.c.bf16 %v1395_v26, %v1395_v26  ;;  %v1337_v56 = vsel %vm1121_vm8, %v825_v42, %v1229_v48  ;;  %v1393_v57 = vsel %vm1177_vm9, %v1049_v15, %v1285_v9  ;;  %v1070_v58 = vadd.f32 %v3283_v6, %v2440_v19 }
 0x165   :  { %1880 = vst.msk [vmem:[%s3525_s3 + $0xbc] sm:$0xf] %vm1832_vm5, %v2213_v49  ;;  %v2211_v41 = vpack.c.bf16 %v1337_v56, %v1337_v56  ;;  %v838_v0 = vadd.f32 %v3283_v6, %v3359_v46  ;;  %v2267_v1 = vpack.c.bf16 %v1393_v57, %v1393_v57  ;;  %v1342_v2 = vsel %vm1126_vm10, %v846_v38, %v1234_v33 }
 0x166   :  { %1936 = vst.msk [vmem:[%s3525_s3 + $0x19c] sm:$0xf] %vm1832_vm5, %v2269_v45  ;;  %v1062_v3 = vadd.f32 %v3283_v6, %v1061_v39  ;;  %v849_v60 = vadd.f32 %v3283_v6, %v3381_v12  ;;  %v2216_v43 = vpack.c.bf16 %v1342_v2, %v1342_v2  ;;  %vm1182_vm11 = vcmp.ge.f32.partialorder %v1070_v58, 0.0 }
 0x167   :  { %1878 = vst.msk [vmem:[%s3525_s3 + $0xb4] sm:$0xf] %vm1832_vm5, %v2211_v41  ;;  %v1290_v46 = vmul.f32 0.01, %v1070_v58  ;;  %vm1124_vm12 = vcmp.ge.f32.partialorder %v838_v0, 0.0  ;;  %v1073_v13 = vadd.f32 %v3283_v6, %v2441_v24  ;;  %v841_v37 = vadd.f32 %v3283_v6, %v3401_v22 }
 0x168   :  { %1934 = vst.msk [vmem:[%s3525_s3 + $0x194] sm:$0xf] %vm1832_vm5, %v2267_v1  ;;  %v1232_v55 = vmul.f32 0.01, %v838_v0  ;;  %vm1180_vm13 = vcmp.ge.f32.partialorder %v1062_v3, 0.0  ;;  %vm1127_vm14 = vcmp.ge.f32.partialorder %v849_v60, 0.0  ;;  %v1065_v51 = vadd.f32 %v3283_v6, %v1064_v5 }
 0x169   :  { %v1288_v7 = vmul.f32 0.01, %v1062_v3  ;;  %1883 = vst.msk [vmem:[%s3525_s3 + $0xc8] sm:$0xf] %vm1832_vm5, %v2216_v43  ;;  %v1398_v53 = vsel %vm1182_vm11, %v1070_v58, %v1290_v46  ;;  %v1235_v12 = vmul.f32 0.01, %v849_v60  ;;  %v862_v28 = vadd.f32 %v3283_v6, %v3420_v40 }
 0x16a   :  { %v2272_v54 = vpack.c.bf16 %v1398_v53, %v1398_v53  ;;  %v1340_v62 = vsel %vm1124_vm12, %v838_v0, %v1232_v55  ;;  %vm1183_vm15 = vcmp.ge.f32.partialorder %v1073_v13, 0.0  ;;  %v1291_v18 = vmul.f32 0.01, %v1073_v13 }
 0x16b   :  { %v1396_v44 = vsel %vm1180_vm13, %v1062_v3, %v1288_v7  ;;  %v2214_v63 = vpack.c.bf16 %v1340_v62, %v1340_v62  ;;  %v1343_v52 = vsel %vm1127_vm14, %v849_v60, %v1235_v12  ;;  %vm1125_vm0 = vcmp.ge.f32.partialorder %v841_v37, 0.0 }
 0x16c   :  { %v2270_v17 = vpack.c.bf16 %v1396_v44, %v1396_v44  ;;  %1939 = vst.msk [vmem:[%s3525_s3 + $0x1a8] sm:$0xf] %vm1832_vm5, %v2272_v54  ;;  %v2217_v59 = vpack.c.bf16 %v1343_v52, %v1343_v52  ;;  %v1233_v19 = vmul.f32 0.01, %v841_v37  ;;  %vm1181_vm1 = vcmp.ge.f32.partialorder %v1065_v51, 0.0 }
 0x16d   :  { %1881 = vst.msk [vmem:[%s3525_s3 + $0xc0] sm:$0xf] %vm1832_vm5, %v2214_v63  ;;  %v1289_v22 = vmul.f32 0.01, %v1065_v51  ;;  %v854_v23 = vadd.f32 %v3283_v6, %v853_v36  ;;  %v1399_v10 = vsel %vm1183_vm15, %v1073_v13, %v1291_v18  ;;  %v865_v29 = vadd.f32 %v3283_v6, %v2389_v20 }
 0x16e   :  { %1937 = vst.msk [vmem:[%s3525_s3 + $0x1a0] sm:$0xf] %vm1832_vm5, %v2270_v17  ;;  %1884 = vst.msk [vmem:[%s3525_s3 + $0xcc] sm:$0xf] %vm1832_vm5, %v2217_v59  ;;  %v1341_v14 = vsel %vm1125_vm0, %v841_v37, %v1233_v19  ;;  %v857_v30 = vadd.f32 %v3283_v6, %v856_v50  ;;  %v2273_v31 = vpack.c.bf16 %v1399_v10, %v1399_v10  ;;  %vm1130_vm2 = vcmp.ge.f32.partialorder %v862_v28, 0.0 }
 0x16f   :  { %v2215_v27 = vpack.c.bf16 %v1341_v14, %v1341_v14  ;;  %v1397_v32 = vsel %vm1181_vm1, %v1065_v51, %v1289_v22  ;;  %v1238_v8 = vmul.f32 0.01, %v862_v28  ;;  %vm1128_vm3 = vcmp.ge.f32.partialorder %v854_v23, 0.0 }
 0x170   :  { %v2271_v61 = vpack.c.bf16 %v1397_v32, %v1397_v32  ;;  %v1236_v34 = vmul.f32 0.01, %v854_v23  ;;  %1940 = vst.msk [vmem:[%s3525_s3 + $0x1ac] sm:$0xf] %vm1832_vm5, %v2273_v31  ;;  %vm1131_vm4 = vcmp.ge.f32.partialorder %v865_v29, 0.0  ;;  %vm1129_vm6 = vcmp.ge.f32.partialorder %v857_v30, 0.0 }
 0x171   :  { %1882 = vst.msk [vmem:[%s3525_s3 + $0xc4] sm:$0xf] %vm1832_vm5, %v2215_v27  ;;  %v1239_v6 = vmul.f32 0.01, %v865_v29  ;;  %v1237_v4 = vmul.f32 0.01, %v857_v30  ;;  %v1346_v35 = vsel %vm1130_vm2, %v862_v28, %v1238_v8 }
 0x172   :  { %1938 = vst.msk [vmem:[%s3525_s3 + $0x1a4] sm:$0xf] %vm1832_vm5, %v2271_v61  ;;  %v1344_v39 = vsel %vm1128_vm3, %v854_v23, %v1236_v34  ;;  %v2220_v40 = vpack.c.bf16 %v1346_v35, %v1346_v35 }
 0x173   :  { %v2218_v11 = vpack.c.bf16 %v1344_v39, %v1344_v39  ;;  %v1347_v42 = vsel %vm1131_vm4, %v865_v29, %v1239_v6  ;;  %v1345_v15 = vsel %vm1129_vm6, %v857_v30, %v1237_v4 }
 0x174   :  { %v2221_v47 = vpack.c.bf16 %v1347_v42, %v1347_v42  ;;  %v2219_v16 = vpack.c.bf16 %v1345_v15, %v1345_v15  ;;  %1887 = vst.msk [vmem:[%s3525_s3 + $0xd8] sm:$0xf] %vm1832_vm5, %v2220_v40 }
 0x175   :  { %1885 = vst.msk [vmem:[%s3525_s3 + $0xd0] sm:$0xf] %vm1832_vm5, %v2218_v11 }
 0x176   :  { %1888 = vst.msk [vmem:[%s3525_s3 + $0xdc] sm:$0xf] %vm1832_vm5, %v2221_v47  ;;  %1886 = vst.msk [vmem:[%s3525_s3 + $0xd4] sm:$0xf] %vm1832_vm5, %v2219_v16 }
 0x177   :  { %1945 = vsyncpa [#allocation3], 1 }
 0x178   :  { %1946 = vsyncpa [#allocation5], 1 }

// kernel: net_forward.5
= control target key start
LH: loop header
LB: loop body
LE: loop exit
PB: predicated region body
PF: predicated region fallthrough
CT: control target
= control target key end

     0   :  { %8 = vsyncpa [#allocation3], 0  ;;  %s4225_s0 = inlined_call_operand.vmem [shape: bf16[144,1600], index: 0, kind: input, shape index: {}]   ;;  %s4226_s1 = inlined_call_operand.hbm [shape: bf16[1600,128], index: 1, kind: input, shape index: {}]   ;;  %s4227_s2 = inlined_call_operand.hbm [shape: f32[1,128], index: 2, kind: input, shape index: {}]   ;;  %s4228_s3 = inlined_call_operand.vmem [shape: bf16[144,128], index: 3, kind: output, shape index: {}]  }
   0x1   :  { %9 = vsyncpa [#allocation5], 0  ;;  %s3602_s12 = smov [#allocation2]  }
   0x2   :  { %s17_s13 = sshll.u32 %s3602_s12, 4  ;;  %s18_s13 = int_to_ptr.vmem [resolvable:$true] %s17_s13 }
   0x3   :  { %s3566_s14 = scalar_lea.vmem %s18_s13, 12800  ;;  %p3571_p1 = scmp.lt.s32.totalorder %s18_s13, %s18_s13 }
   0x4   :  { %p3567_p0 = scmp.ne.s32.totalorder %s18_s13, %s3566_s14  ;;  %p3572_p2 = scmp.lt.s32.totalorder %s3566_s14, %s3566_s14 }
   0x6   :  { %p3573_p3 = por %p3572_p2, %p3571_p1 }
   0x8   :  { %p3574_p4 = pnand %p3573_p3, %p3567_p0 }
   0xa   :  { %3577 = shalt.err (!%p3574_p4)
}
   0xb   :  { %s3603_s15 = smov 64   ;;  %s3604_s16 = smov 4  }
   0xc   :  { %23 = dma.hbm_to_vmem [thread:$0]  %s4226_s1, 12800, %s18_s13, [#allocation3], %s3603_s15, %s3603_s15, %s3604_s16  }
   0xd   :  { %s3605_s19 = smov [#allocation4]  }
   0xe   :  { %s30_s20 = sshll.u32 %s3605_s19, 4  ;;  %s31_s20 = int_to_ptr.vmem [resolvable:$true] %s30_s20 }
   0xf   :  { %s3586_s21 = scalar_lea.vmem %s31_s20, 16  ;;  %s3590_s22 = scalar_lea.vmem %s31_s20, 32 }
  0x10   :  { %p3587_p5 = scmp.ne.s32.totalorder %s31_s20, %s3586_s21  ;;  %p3591_p6 = scmp.lt.s32.totalorder %s31_s20, %s31_s20 }
  0x11   :  { %p3592_p7 = scmp.lt.s32.totalorder %s3590_s22, %s3586_s21 }
  0x13   :  { %p3593_p8 = por %p3592_p7, %p3591_p6 }
  0x15   :  { %p3594_p9 = pnand %p3593_p8, %p3587_p5 }
  0x17   :  { %3597 = shalt.err (!%p3594_p9)
}
  0x18   :  { %33 = dma.hbm_to_vmem [thread:$0]  %s4227_s2, 16, %s31_s20, [#allocation5]  }
  0x19   :  { %3598 = dma.done.wait [#allocation3], 12800  }
  0x1a   :  { %3599 = vsyncadd [#allocation3], 4294954496 }
  0x1b   :  { %3600 = dma.done.wait [#allocation5], 16  }
  0x1c   :  { %3601 = vsyncadd [#allocation5], 4294967280  ;;  %v3287_v0 = vld [vmem:[#allocation2 + $0x78] sm:$0xff]   ;;  %v3289_v2 = vld [vmem:[#allocation2 + $0x70] sm:$0xff]   ;;  %vm3607_vm0 = vmmov 0   ;;  %vm1559_vm1 = vcmask 523264  }
  0x1d   :  { %v3288_v1 = vld [vmem:[#allocation2 + $0x38] sm:$0xff]   ;;  %3265 = vmatprep.subr.bf16.mxu1 %v3287_v0  ;;  %2788 = vmatprep.subr.bf16.mxu0 %v3287_v0  ;;  %v3290_v3 = vld [vmem:[#allocation2 + $0x30] sm:$0xff]   ;;  %v3291_v4 = vld [vmem:[#allocation2 + $0x68] sm:$0xff]  }
  0x1e   :  { %3273 = vmatpush3.bf16.msra.mxu1 %v3288_v1  ;;  %2789 = vmatpush3.bf16.msra.mxu0 %v3288_v1  ;;  %v3292_v5 = vld [vmem:[#allocation2 + $0x28] sm:$0xff]   ;;  %v3293_v6 = vld [vmem:[#allocation2 + $0x60] sm:$0xff]   ;;  %v3295_v8 = vld [vmem:[#allocation2 + $0x58] sm:$0xff]  }
  0x1f   :  { %3266 = vmatprep.subr.bf16.mxu1 %v3289_v2  ;;  %2790 = vmatprep.subr.bf16.mxu0 %v3289_v2  ;;  %v3294_v7 = vld [vmem:[#allocation2 + $0x20] sm:$0xff]   ;;  %v3296_v9 = vld [vmem:[#allocation2 + $0x18] sm:$0xff]   ;;  %v3297_v10 = vld [vmem:[#allocation2 + $0x50] sm:$0xff]  }
  0x20   :  { %v3305_v11 = vld [vmem:[%s4225_s0 + $0x1a4] ss:$52 sps:$4 sm:$0xff]   ;;  %v3298_v12 = vld [vmem:[#allocation2 + $0x10] sm:$0xff]   ;;  %v3299_v13 = vld [vmem:[#allocation2 + $0x48] sm:$0xff]  }
  0x21   :  { %1651 = vmatprep.mubr.bf16.mxu1 %v3305_v11  ;;  %v3300_v14 = vld [vmem:[#allocation2 + $0x8] sm:$0xff]   ;;  %v3314_v15 = vld [vmem:[%s4225_s0 + $0x4] ss:$52 sps:$4 sm:$0xff]   ;;  %v3303_v19 = vld [vmem:[%s4225_s0 + $0x1a0] ss:$52 sps:$4 sm:$0xff]  }
  0x22   :  { %3274 = vmatpush3.bf16.msra.mxu1 %v3290_v3  ;;  %2791 = vmatpush3.bf16.msra.mxu0 %v3290_v3  ;;  %v3301_v16 = vld [vmem:[#allocation2 + $0x40] sm:$0xff]   ;;  %v3306_v18 = vld [vmem:[#allocation2 + $0xf8] sm:$0xff]   ;;  %v3308_v23 = vld [vmem:[#allocation2 + $0xf0] sm:$0xff]  }
  0x23   :  { %3267 = vmatprep.subr.bf16.mxu1 %v3291_v4  ;;  %2792 = vmatprep.subr.bf16.mxu0 %v3291_v4  ;;  %v3302_v17 = vld [vmem:[#allocation2] sm:$0xff]   ;;  %v3316_v20 = vld [vmem:[#allocation2 + $0x178] sm:$0xff]   ;;  %v3320_v26 = vld [vmem:[#allocation2 + $0x170] sm:$0xff]  }
  0x24   :  { %1619 = vmatprep.mubr.bf16.mxu0 %v3314_v15  ;;  %v3307_v21 = vld [vmem:[#allocation2 + $0xb8] sm:$0xff]   ;;  %v3310_v22 = vld [vmem:[%s4225_s0 + $0x20c] ss:$52 sps:$4 sm:$0xff]   ;;  %v3309_v28 = vld [vmem:[#allocation2 + $0xb0] sm:$0xff]  }
  0x25   :  { %v3312_v24 = vld [vmem:[%s4225_s0] ss:$52 sps:$4 sm:$0xff]   ;;  %v3318_v25 = vld [vmem:[#allocation2 + $0x138] sm:$0xff]   ;;  %v3317_v29 = vld [vmem:[#allocation2 + $0xe8] sm:$0xff]  }
  0x26   :  { %3275 = vmatpush3.bf16.msra.mxu1 %v3292_v5  ;;  %2793 = vmatpush3.bf16.msra.mxu0 %v3292_v5  ;;  %v3325_v27 = vld [vmem:[%s4225_s0 + $0x6c] ss:$52 sps:$4 sm:$0xff]   ;;  %v3315_v30 = vld [vmem:[%s4225_s0 + $0x208] ss:$52 sps:$4 sm:$0xff]   ;;  %v3321_v31 = vld [vmem:[#allocation2 + $0x130] sm:$0xff]  }
  0x27   :  { %3268 = vmatprep.subr.bf16.mxu1 %v3293_v6  ;;  %2794 = vmatprep.subr.bf16.mxu0 %v3293_v6  ;;  %v3319_v32 = vld [vmem:[#allocation2 + $0xa8] sm:$0xff]   ;;  %v3324_v36 = vld [vmem:[#allocation2 + $0xe0] sm:$0xff]   ;;  %v3332_v41 = vld [vmem:[#allocation2 + $0xd8] sm:$0xff]  }
  0x28   :  { %v3322_v33 = vld [vmem:[%s4225_s0 + $0x274] ss:$52 sps:$4 sm:$0xff]   ;;  %v3334_v38 = vld [vmem:[#allocation2 + $0x160] sm:$0xff]   ;;  %v3333_v44 = vld [vmem:[#allocation2 + $0x98] sm:$0xff]  }
  0x29   :  { %v3330_v34 = vld [vmem:[#allocation2 + $0x168] sm:$0xff]   ;;  %v3328_v39 = vld [vmem:[#allocation2 + $0xa0] sm:$0xff]   ;;  %v3336_v45 = vld [vmem:[%s4225_s0 + $0x2dc] ss:$52 sps:$4 sm:$0xff]  }
  0x2a   :  { %3276 = vmatpush3.bf16.msra.mxu1 %v3294_v7  ;;  %2795 = vmatpush3.bf16.msra.mxu0 %v3294_v7  ;;  %v3329_v35 = vld [vmem:[%s4225_s0 + $0x68] ss:$52 sps:$4 sm:$0xff]   ;;  %v3327_v42 = vld [vmem:[%s4225_s0 + $0x270] ss:$52 sps:$4 sm:$0xff]   ;;  %v3340_v53 = vld [vmem:[%s4225_s0 + $0x2d8] ss:$52 sps:$4 sm:$0xff]  }
  0x2b   :  { %3269 = vmatprep.subr.bf16.mxu1 %v3295_v8  ;;  %2796 = vmatprep.subr.bf16.mxu0 %v3295_v8  ;;  %v3331_v37 = vld [vmem:[#allocation2 + $0x128] sm:$0xff]   ;;  %v3335_v43 = vld [vmem:[#allocation2 + $0x120] sm:$0xff]   ;;  %v3343_v46 = vld [vmem:[#allocation2 + $0x158] sm:$0xff]  }
  0x2c   :  { %v3338_v40 = vld [vmem:[%s4225_s0 + $0xd4] ss:$52 sps:$4 sm:$0xff]   ;;  %v3341_v47 = vld [vmem:[%s4225_s0 + $0xd0] ss:$52 sps:$4 sm:$0xff]   ;;  %v3345_v49 = vld [vmem:[#allocation2 + $0x118] sm:$0xff]  }
  0x2d   :  { %v3342_v48 = vld [vmem:[#allocation2 + $0xd0] sm:$0xff]   ;;  %v3347_v52 = vld [vmem:[#allocation2 + $0xc8] sm:$0xff]   ;;  %v3349_v55 = vld [vmem:[%s4225_s0 + $0x344] ss:$52 sps:$4 sm:$0xff]  }
  0x2e   :  { %3277 = vmatpush3.bf16.msra.mxu1 %v3296_v9  ;;  %2797 = vmatpush3.bf16.msra.mxu0 %v3296_v9  ;;  %v3346_v50 = vld [vmem:[#allocation2 + $0x150] sm:$0xff]   ;;  %v3351_v56 = vld [vmem:[#allocation2 + $0x88] sm:$0xff]   ;;  %v3358_v61 = vld [vmem:[#allocation2 + $0xc0] sm:$0xff]  }
  0x2f   :  { %3270 = vmatprep.subr.bf16.mxu1 %v3297_v10  ;;  %2798 = vmatprep.subr.bf16.mxu0 %v3297_v10  ;;  %v3344_v51 = vld [vmem:[#allocation2 + $0x90] sm:$0xff]   ;;  %v3355_v58 = vld [vmem:[%s4225_s0 + $0x138] ss:$52 sps:$4 sm:$0xff]   ;;  %v3360_v62 = vld [vmem:[#allocation2 + $0x140] sm:$0xff]  }
  0x30   :  { %v3348_v54 = vld [vmem:[#allocation2 + $0x110] sm:$0xff]   ;;  %v3356_v59 = vld [vmem:[#allocation2 + $0x148] sm:$0xff]   ;;  %v3359_v63 = vld [vmem:[#allocation2 + $0x80] sm:$0xff]  }
  0x31   :  { %v3352_v57 = vld [vmem:[%s4225_s0 + $0x13c] ss:$52 sps:$4 sm:$0xff]   ;;  %v3357_v60 = vld [vmem:[#allocation2 + $0x108] sm:$0xff]   ;;  %v3354_v0 = vld [vmem:[%s4225_s0 + $0x340] ss:$52 sps:$4 sm:$0xff]  }
  0x32   :  { %3278 = vmatpush3.bf16.msra.mxu1 %v3298_v12  ;;  %2799 = vmatpush3.bf16.msra.mxu0 %v3298_v12  ;;  %v3361_v1 = vld [vmem:[#allocation2 + $0x100] sm:$0xff]   ;;  %v3367_v4 = vld [vmem:[%s4225_s0 + $0x14] ss:$52 sps:$4 sm:$0xff]   ;;  %v3368_v5 = vld [vmem:[#allocation2 + $0x1f8] sm:$0xff]  }
  0x33   :  { %3271 = vmatprep.subr.bf16.mxu1 %v3299_v13  ;;  %2800 = vmatprep.subr.bf16.mxu0 %v3299_v13  ;;  %v3364_v2 = vld [vmem:[%s4225_s0 + $0xc] ss:$52 sps:$4 sm:$0xff]   ;;  %v3365_v3 = vld [vmem:[%s4225_s0 + $0x10] ss:$52 sps:$4 sm:$0xff]   ;;  %v3370_v6 = vld [vmem:[#allocation2 + $0x278] sm:$0xff]  }
  0x34   :  { %v3373_v7 = vld [vmem:[#allocation2 + $0x238] sm:$0xff]   ;;  %v3371_v11 = vld [vmem:[%s4225_s0 + $0x74] ss:$52 sps:$4 sm:$0xff]  }
  0x35   :  { %v3362_v8 = vld [vmem:[%s4225_s0 + $0x8] ss:$52 sps:$4 sm:$0xff]   ;;  %v3377_v12 = vld [vmem:[%s4225_s0 + $0x78] ss:$52 sps:$4 sm:$0xff]   ;;  %v3378_v13 = vld [vmem:[#allocation2 + $0x1f0] sm:$0xff]  }
  0x36   :  { %3279 = vmatpush3.bf16.msra.mxu1 %v3300_v14  ;;  %2801 = vmatpush3.bf16.msra.mxu0 %v3300_v14  ;;  %v3375_v9 = vld [vmem:[%s4225_s0 + $0x7c] ss:$52 sps:$4 sm:$0xff]   ;;  %v3384_v15 = vld [vmem:[%s4225_s0 + $0xe4] ss:$52 sps:$4 sm:$0xff]  }
  0x37   :  { %3272 = vmatprep.subr.bf16.mxu1 %v3301_v16  ;;  %2802 = vmatprep.subr.bf16.mxu0 %v3301_v16  ;;  %v3369_v10 = vld [vmem:[#allocation2 + $0x1b8] sm:$0xff]   ;;  %v3382_v14 = vld [vmem:[#allocation2 + $0x270] sm:$0xff]  }
  0x38   :  { %v3379_v16 = vld [vmem:[#allocation2 + $0x1b0] sm:$0xff]  }
  0x3a   :  { %3280 = vmatpush3.bf16.msra.mxu1 %v3302_v17  ;;  %2803 = vmatpush3.bf16.msra.mxu0 %v3302_v17  ;;  %v3386_v17 = vld [vmem:[#allocation2 + $0x230] sm:$0xff]  }
  0x3b   :  { %2858 = vmatprep.subr.bf16.mxu1 %v3306_v18  ;;  %2928 = vmatprep.subr.bf16.mxu0 %v3316_v20  ;;  %v3388_v18 = vld [vmem:[#allocation2 + $0x1e8] sm:$0xff]   ;;  %v3380_v20 = vld [vmem:[%s4225_s0 + $0xdc] ss:$52 sps:$4 sm:$0xff]  }
  0x3d   :  { %1652 = vmatmul.mubr.bf16.vlgmr.msra.gmra.mxu1 %v3303_v19  ;;  %1620 = vmatmul.mubr.bf16.vlgmr.msra.gmra.mxu0 %v3312_v24  ;;  %v3374_v19 = vld [vmem:[%s4225_s0 + $0x70] ss:$52 sps:$4 sm:$0xff]   ;;  %v3395_v24 = vld [vmem:[#allocation2 + $0x268] sm:$0xff]  }
  0x3e   :  { %2859 = vmatpush3.bf16.msra.mxu1 %v3307_v21  ;;  %1659 = vmatprep.mubr.bf16.mxu1 %v3310_v22  ;;  %v3389_v21 = vld [vmem:[#allocation2 + $0x1a8] sm:$0xff]   ;;  %v3387_v22 = vld [vmem:[%s4225_s0 + $0xe0] ss:$52 sps:$4 sm:$0xff]  }
  0x3f   :  { %2860 = vmatprep.subr.bf16.mxu1 %v3308_v23  ;;  %2929 = vmatpush3.bf16.msra.mxu0 %v3318_v25  ;;  %v3393_v23 = vld [vmem:[%s4225_s0 + $0x14c] ss:$52 sps:$4 sm:$0xff]  }
  0x40   :  { %2930 = vmatprep.subr.bf16.mxu0 %v3320_v26  ;;  %1627 = vmatprep.mubr.bf16.mxu0 %v3325_v27  ;;  %v3397_v25 = vld [vmem:[#allocation2 + $0x228] sm:$0xff]   ;;  %v3398_v26 = vld [vmem:[#allocation2 + $0x1e0] sm:$0xff]  }
  0x41   :  { %v3399_v27 = vld [vmem:[#allocation2 + $0x1a0] sm:$0xff]  }
  0x42   :  { %2861 = vmatpush3.bf16.msra.mxu1 %v3309_v28  ;;  %v3383_v28 = vld [vmem:[%s4225_s0 + $0xd8] ss:$52 sps:$4 sm:$0xff]  }
  0x43   :  { %2862 = vmatprep.subr.bf16.mxu1 %v3317_v29  ;;  %2931 = vmatpush3.bf16.msra.mxu0 %v3321_v31  ;;  %v3390_v29 = vld [vmem:[%s4225_s0 + $0x144] ss:$52 sps:$4 sm:$0xff]   ;;  %v3403_v31 = vld [vmem:[%s4225_s0 + $0x1b4] ss:$52 sps:$4 sm:$0xff]  }
  0x44   :  { %2932 = vmatprep.subr.bf16.mxu0 %v3330_v34  ;;  %v3408_v34 = vld [vmem:[#allocation2 + $0x1d8] sm:$0xff]  }
  0x45   :  { %1660 = vmatmul.mubr.bf16.gmra.mxu1 %v3315_v30  ;;  %1628 = vmatmul.mubr.bf16.gmra.mxu0 %v3329_v35  ;;  %v3396_v30 = vld [vmem:[%s4225_s0 + $0x148] ss:$52 sps:$4 sm:$0xff]  }
  0x46   :  { %2863 = vmatpush3.bf16.msra.mxu1 %v3319_v32  ;;  %1667 = vmatprep.mubr.bf16.mxu1 %v3322_v33  ;;  %v3406_v32 = vld [vmem:[#allocation2 + $0x260] sm:$0xff]   ;;  %v3409_v35 = vld [vmem:[#allocation2 + $0x198] sm:$0xff]  }
  0x47   :  { %2864 = vmatprep.subr.bf16.mxu1 %v3324_v36  ;;  %2933 = vmatpush3.bf16.msra.mxu0 %v3331_v37  ;;  %v3407_v33 = vld [vmem:[#allocation2 + $0x220] sm:$0xff]  }
  0x48   :  { %2934 = vmatprep.subr.bf16.mxu0 %v3334_v38  ;;  %1635 = vmatprep.mubr.bf16.mxu0 %v3338_v40  ;;  %v3392_v36 = vld [vmem:[%s4225_s0 + $0x140] ss:$52 sps:$4 sm:$0xff]   ;;  %v3405_v38 = vld [vmem:[%s4225_s0 + $0x1b0] ss:$52 sps:$4 sm:$0xff]  }
  0x49   :  { %v3400_v37 = vld [vmem:[%s4225_s0 + $0x1ac] ss:$52 sps:$4 sm:$0xff]   ;;  %v3413_v40 = vld [vmem:[%s4225_s0 + $0x21c] ss:$52 sps:$4 sm:$0xff]  }
  0x4a   :  { %2865 = vmatpush3.bf16.msra.mxu1 %v3328_v39  ;;  %v3416_v39 = vld [vmem:[#allocation2 + $0x258] sm:$0xff]  }
  0x4b   :  { %2866 = vmatprep.subr.bf16.mxu1 %v3332_v41  ;;  %2935 = vmatpush3.bf16.msra.mxu0 %v3335_v43  ;;  %v3417_v41 = vld [vmem:[#allocation2 + $0x218] sm:$0xff]   ;;  %v3419_v43 = vld [vmem:[#allocation2 + $0x190] sm:$0xff]  }
  0x4c   :  { %2936 = vmatprep.subr.bf16.mxu0 %v3343_v46  ;;  %v3426_v46 = vld [vmem:[#allocation2 + $0x250] sm:$0xff]  }
  0x4d   :  { %1668 = vmatmul.mubr.bf16.gmra.mxu1 %v3327_v42  ;;  %1636 = vmatmul.mubr.bf16.gmra.mxu0 %v3341_v47  ;;  %v3418_v42 = vld [vmem:[#allocation2 + $0x1d0] sm:$0xff]  }
  0x4e   :  { %2867 = vmatpush3.bf16.msra.mxu1 %v3333_v44  ;;  %1675 = vmatprep.mubr.bf16.mxu1 %v3336_v45  ;;  %v3402_v44 = vld [vmem:[%s4225_s0 + $0x1a8] ss:$52 sps:$4 sm:$0xff]   ;;  %v3427_v47 = vld [vmem:[#allocation2 + $0x210] sm:$0xff]  }
  0x4f   :  { %2868 = vmatprep.subr.bf16.mxu1 %v3342_v48  ;;  %2937 = vmatpush3.bf16.msra.mxu0 %v3345_v49  ;;  %v3410_v45 = vld [vmem:[%s4225_s0 + $0x214] ss:$52 sps:$4 sm:$0xff]   ;;  %v3415_v49 = vld [vmem:[%s4225_s0 + $0x218] ss:$52 sps:$4 sm:$0xff]  }
  0x50   :  { %2938 = vmatprep.subr.bf16.mxu0 %v3346_v50  ;;  %1643 = vmatprep.mubr.bf16.mxu0 %v3352_v57  ;;  %v3428_v48 = vld [vmem:[#allocation2 + $0x1c8] sm:$0xff]   ;;  %v3423_v50 = vld [vmem:[%s4225_s0 + $0x284] ss:$52 sps:$4 sm:$0xff]   ;;  %v3425_v57 = vld [vmem:[%s4225_s0 + $0x280] ss:$52 sps:$4 sm:$0xff]  }
  0x52   :  { %2869 = vmatpush3.bf16.msra.mxu1 %v3344_v51  ;;  %v3431_v51 = vld [vmem:[#allocation2 + $0x188] sm:$0xff]  }
  0x53   :  { %2870 = vmatprep.subr.bf16.mxu1 %v3347_v52  ;;  %2939 = vmatpush3.bf16.msra.mxu0 %v3348_v54  ;;  %v3436_v52 = vld [vmem:[#allocation2 + $0x248] sm:$0xff]   ;;  %v3412_v54 = vld [vmem:[%s4225_s0 + $0x210] ss:$52 sps:$4 sm:$0xff]  }
  0x54   :  { %2940 = vmatprep.subr.bf16.mxu0 %v3356_v59  ;;  %v3444_v59 = vld [vmem:[#allocation2 + $0x180] sm:$0xff]  }
  0x55   :  { %1676 = vmatmul.mubr.bf16.gmra.mxu1 %v3340_v53  ;;  %1644 = vmatmul.mubr.bf16.gmra.mxu0 %v3355_v58  ;;  %v3437_v53 = vld [vmem:[#allocation2 + $0x208] sm:$0xff]  }
  0x56   :  { %1683 = vmatprep.mubr.bf16.mxu1 %v3349_v55  ;;  %2871 = vmatpush3.bf16.msra.mxu1 %v3351_v56  ;;  %v3420_v55 = vld [vmem:[%s4225_s0 + $0x27c] ss:$52 sps:$4 sm:$0xff]   ;;  %v3440_v56 = vld [vmem:[#allocation2 + $0x1c0] sm:$0xff]  }
  0x57   :  { %2941 = vmatpush3.bf16.msra.mxu0 %v3357_v60  ;;  %2872 = vmatprep.subr.bf16.mxu1 %v3358_v61  ;;  %v3433_v58 = vld [vmem:[%s4225_s0 + $0x2ec] ss:$52 sps:$4 sm:$0xff]  }
  0x58   :  { %2942 = vmatprep.subr.bf16.mxu0 %v3360_v62  ;;  %1829 = vmatprep.mubr.bf16.mxu0 %v3367_v4  ;;  %v3446_v60 = vld [vmem:[#allocation2 + $0x240] sm:$0xff]   ;;  %v3422_v62 = vld [vmem:[%s4225_s0 + $0x278] ss:$52 sps:$4 sm:$0xff]  }
  0x59   :  { %v3447_v61 = vld [vmem:[#allocation2 + $0x200] sm:$0xff]  }
  0x5a   :  { %2873 = vmatpush3.bf16.msra.mxu1 %v3359_v63  ;;  %v3429_v63 = vld [vmem:[%s4225_s0 + $0x2e4] ss:$52 sps:$4 sm:$0xff]   ;;  %v3432_v4 = vld [vmem:[%s4225_s0 + $0x2e0] ss:$52 sps:$4 sm:$0xff]  }
  0x5b   :  { %2943 = vmatpush3.bf16.msra.mxu0 %v3361_v1  ;;  %2998 = vmatprep.subr.bf16.mxu1 %v3368_v5  ;;  %v3454_v1 = vld [vmem:[#allocation2 + $0x2f8] sm:$0xff]   ;;  %v3438_v5 = vld [vmem:[%s4225_s0 + $0x34c] ss:$52 sps:$4 sm:$0xff]  }
  0x5c   :  { %3068 = vmatprep.subr.bf16.mxu0 %v3370_v6  ;;  %v3445_v6 = vld [vmem:[%s4225_s0 + $0x350] ss:$52 sps:$4 sm:$0xff]  }
  0x5d   :  { %1684 = vmatmul.mubr.bf16.gmra.mxu1 %v3354_v0  ;;  %v3606_v0 = vmov 0.0  }
  0x5e   :  { %1724 = vmatprep.mubr.bf16.mxu1 %v3364_v2  ;;  %1830 = vmatmul.mubr.bf16.vlgmr.msra.gmra.mxu0 %v3365_v3  ;;  %v3435_v2 = vld [vmem:[%s4225_s0 + $0x2e8] ss:$52 sps:$4 sm:$0xff]  }
  0x5f   :  { %3069 = vmatpush3.bf16.msra.mxu0 %v3373_v7  ;;  %1837 = vmatprep.mubr.bf16.mxu0 %v3375_v9  ;;  %v3442_v3 = vld [vmem:[%s4225_s0 + $0x354] ss:$52 sps:$4 sm:$0xff]   ;;  %v3453_v7 = vld [vmem:[%s4225_s0 + $0x24] ss:$52 sps:$4 sm:$0xff]   ;;  %v3450_v9 = vld [vmem:[%s4225_s0 + $0x1c] ss:$52 sps:$4 sm:$0xff]  }
  0x60   :  { %3070 = vmatprep.subr.bf16.mxu0 %v3382_v14  ;;  %v3479_v14 = vld [vmem:[#allocation2 + $0x310] sm:$0xff]  }
  0x63   :  { %3071 = vmatpush3.bf16.msra.mxu0 %v3386_v17  ;;  %v3462_v17 = vld [vmem:[%s4225_s0 + $0x88] ss:$52 sps:$4 sm:$0xff]  }
  0x64   :  { %3072 = vmatprep.subr.bf16.mxu0 %v3395_v24  ;;  %v3465_v24 = vld [vmem:[%s4225_s0 + $0xec] ss:$52 sps:$4 sm:$0xff]  }
  0x65   :  { %1725 = vmatmul.mubr.bf16.vlgmr.msra.gmra.mxu1 %v3362_v8  ;;  %v3441_v8 = vld [vmem:[%s4225_s0 + $0x348] ss:$52 sps:$4 sm:$0xff]  }
  0x66   :  { %2999 = vmatpush3.bf16.msra.mxu1 %v3369_v10  ;;  %1732 = vmatprep.mubr.bf16.mxu1 %v3371_v11  ;;  %v3451_v10 = vld [vmem:[%s4225_s0 + $0x20] ss:$52 sps:$4 sm:$0xff]   ;;  %v3458_v11 = vld [vmem:[#allocation2 + $0x318] sm:$0xff]  }
  0x67   :  { %1838 = vmatmul.mubr.bf16.gmra.mxu0 %v3377_v12  ;;  %3000 = vmatprep.subr.bf16.mxu1 %v3378_v13  ;;  %v3460_v12 = vld [vmem:[%s4225_s0 + $0x8c] ss:$52 sps:$4 sm:$0xff]  }
  0x68   :  { %1845 = vmatprep.mubr.bf16.mxu0 %v3384_v15  ;;  %3073 = vmatpush3.bf16.msra.mxu0 %v3397_v25  ;;  %v3448_v13 = vld [vmem:[%s4225_s0 + $0x18] ss:$52 sps:$4 sm:$0xff]  }
  0x69   :  { %3074 = vmatprep.subr.bf16.mxu0 %v3406_v32  ;;  %v3455_v15 = vld [vmem:[#allocation2 + $0x2b8] sm:$0xff]   ;;  %v3472_v25 = vld [vmem:[#allocation2 + $0x2a8] sm:$0xff]  }
  0x6a   :  { %3001 = vmatpush3.bf16.msra.mxu1 %v3379_v16  ;;  %v3456_v16 = vld [vmem:[%s4225_s0 + $0x84] ss:$52 sps:$4 sm:$0xff]   ;;  %v3467_v32 = vld [vmem:[%s4225_s0 + $0xe8] ss:$52 sps:$4 sm:$0xff]  }
  0x6b   :  { %3002 = vmatprep.subr.bf16.mxu1 %v3388_v18  ;;  %v3463_v18 = vld [vmem:[#allocation2 + $0x2f0] sm:$0xff]  }
  0x6c   :  { %3075 = vmatpush3.bf16.msra.mxu0 %v3407_v33  ;;  %v3473_v33 = vld [vmem:[%s4225_s0 + $0x154] ss:$52 sps:$4 sm:$0xff]  }
  0x6d   :  { %1733 = vmatmul.mubr.bf16.gmra.mxu1 %v3374_v19  ;;  %3076 = vmatprep.subr.bf16.mxu0 %v3416_v39  ;;  %v3468_v19 = vld [vmem:[%s4225_s0 + $0xf4] ss:$52 sps:$4 sm:$0xff]  }
  0x6e   :  { %1740 = vmatprep.mubr.bf16.mxu1 %v3380_v20  ;;  %3003 = vmatpush3.bf16.msra.mxu1 %v3389_v21  ;;  %v3496_v20 = vld [vmem:[#allocation2 + $0x308] sm:$0xff]   ;;  %v3464_v21 = vld [vmem:[#allocation2 + $0x2b0] sm:$0xff]  }
  0x6f   :  { %1846 = vmatmul.mubr.bf16.gmra.mxu0 %v3387_v22  ;;  %3004 = vmatprep.subr.bf16.mxu1 %v3398_v26  ;;  %v3471_v22 = vld [vmem:[#allocation2 + $0x2e8] sm:$0xff]   ;;  %v3470_v26 = vld [vmem:[%s4225_s0 + $0xf0] ss:$52 sps:$4 sm:$0xff]  }
  0x70   :  { %1853 = vmatprep.mubr.bf16.mxu0 %v3393_v23  ;;  %3077 = vmatpush3.bf16.msra.mxu0 %v3417_v41  ;;  %v3459_v23 = vld [vmem:[%s4225_s0 + $0x80] ss:$52 sps:$4 sm:$0xff]   ;;  %v3505_v39 = vld [vmem:[#allocation2 + $0x2c8] sm:$0xff]   ;;  %v3482_v41 = vld [vmem:[%s4225_s0 + $0x1bc] ss:$52 sps:$4 sm:$0xff]  }
  0x71   :  { %3078 = vmatprep.subr.bf16.mxu0 %v3426_v46  ;;  %v3520_v46 = vld [vmem:[#allocation2 + $0x280] sm:$0xff]  }
  0x72   :  { %3005 = vmatpush3.bf16.msra.mxu1 %v3399_v27  ;;  %v3480_v27 = vld [vmem:[#allocation2 + $0x2e0] sm:$0xff]  }
  0x73   :  { %3006 = vmatprep.subr.bf16.mxu1 %v3408_v34  ;;  %v3478_v34 = vld [vmem:[%s4225_s0 + $0x158] ss:$52 sps:$4 sm:$0xff]  }
  0x74   :  { %3079 = vmatpush3.bf16.msra.mxu0 %v3427_v47  ;;  %v3484_v47 = vld [vmem:[%s4225_s0 + $0x1b8] ss:$52 sps:$4 sm:$0xff]  }
  0x75   :  { %1741 = vmatmul.mubr.bf16.gmra.mxu1 %v3383_v28  ;;  %3080 = vmatprep.subr.bf16.mxu0 %v3436_v52  ;;  %v3476_v28 = vld [vmem:[%s4225_s0 + $0x15c] ss:$52 sps:$4 sm:$0xff]   ;;  %v3499_v52 = vld [vmem:[%s4225_s0 + $0x28c] ss:$52 sps:$4 sm:$0xff]  }
  0x76   :  { %1748 = vmatprep.mubr.bf16.mxu1 %v3390_v29  ;;  %3007 = vmatpush3.bf16.msra.mxu1 %v3409_v35  ;;  %v3481_v29 = vld [vmem:[#allocation2 + $0x2a0] sm:$0xff]   ;;  %v3489_v35 = vld [vmem:[#allocation2 + $0x298] sm:$0xff]  }
  0x77   :  { %1854 = vmatmul.mubr.bf16.gmra.mxu0 %v3396_v30  ;;  %3008 = vmatprep.subr.bf16.mxu1 %v3418_v42  ;;  %v3513_v30 = vld [vmem:[#allocation2 + $0x300] sm:$0xff]   ;;  %v3508_v42 = vld [vmem:[#allocation2 + $0x288] sm:$0xff]  }
  0x78   :  { %1861 = vmatprep.mubr.bf16.mxu0 %v3403_v31  ;;  %3081 = vmatpush3.bf16.msra.mxu0 %v3437_v53  ;;  %v3488_v31 = vld [vmem:[#allocation2 + $0x2d8] sm:$0xff]   ;;  %v3504_v53 = vld [vmem:[%s4225_s0 + $0x290] ss:$52 sps:$4 sm:$0xff]  }
  0x79   :  { %3082 = vmatprep.subr.bf16.mxu0 %v3446_v60  ;;  %v3514_v60 = vld [vmem:[%s4225_s0 + $0x35c] ss:$52 sps:$4 sm:$0xff]  }
  0x7a   :  { %3009 = vmatpush3.bf16.msra.mxu1 %v3419_v43  ;;  %v3487_v43 = vld [vmem:[%s4225_s0 + $0x1c0] ss:$52 sps:$4 sm:$0xff]  }
  0x7b   :  { %3010 = vmatprep.subr.bf16.mxu1 %v3428_v48  ;;  %v3490_v48 = vld [vmem:[%s4225_s0 + $0x224] ss:$52 sps:$4 sm:$0xff]  }
  0x7c   :  { %3083 = vmatpush3.bf16.msra.mxu0 %v3447_v61  ;;  %v3521_v61 = vld [vmem:[%s4225_s0 + $0x360] ss:$52 sps:$4 sm:$0xff]  }
  0x7d   :  { %1749 = vmatmul.mubr.bf16.gmra.mxu1 %v3392_v36  ;;  %3221 = vmatprep.subr.bf16.mxu0 %v3606_v0  ;;  %v3497_v36 = vld [vmem:[#allocation2 + $0x2d0] sm:$0xff]  }
  0x7e   :  { %1756 = vmatprep.mubr.bf16.mxu1 %v3400_v37  ;;  %3011 = vmatpush3.bf16.msra.mxu1 %v3431_v51  ;;  %v3485_v37 = vld [vmem:[%s4225_s0 + $0x1c4] ss:$52 sps:$4 sm:$0xff]   ;;  %v3492_v51 = vld [vmem:[%s4225_s0 + $0x220] ss:$52 sps:$4 sm:$0xff]  }
  0x7f   :  { %1862 = vmatmul.mubr.bf16.gmra.mxu0 %v3405_v38  ;;  %3012 = vmatprep.subr.bf16.mxu1 %v3440_v56  ;;  %v3498_v38 = vld [vmem:[#allocation2 + $0x290] sm:$0xff]  }
  0x80   :  { %1869 = vmatprep.mubr.bf16.mxu0 %v3413_v40  ;;  %v3475_v40 = vld [vmem:[%s4225_s0 + $0x150] ss:$52 sps:$4 sm:$0xff]   ;;  %v3506_v56 = vld [vmem:[%s4225_s0 + $0x2f4] ss:$52 sps:$4 sm:$0xff]  }
  0x82   :  { %3013 = vmatpush3.bf16.msra.mxu1 %v3444_v59  ;;  %v3509_v59 = vld [vmem:[%s4225_s0 + $0x2f0] ss:$52 sps:$4 sm:$0xff]  }
  0x83   :  { %3138 = vmatprep.subr.bf16.mxu1 %v3454_v1  ;;  %v3525_v1 = vld [vmem:[%s4225_s0 + $0x30] ss:$52 sps:$4 sm:$0xff]  }
  0x85   :  { %1757 = vmatmul.mubr.bf16.gmra.mxu1 %v3402_v44  ;;  %v3516_v44 = vld [vmem:[#allocation2 + $0x2c0] sm:$0xff]  }
  0x86   :  { %1764 = vmatprep.mubr.bf16.mxu1 %v3410_v45  ;;  %v3493_v45 = vld [vmem:[%s4225_s0 + $0x22c] ss:$52 sps:$4 sm:$0xff]  }
  0x87   :  { %1870 = vmatmul.mubr.bf16.gmra.mxu0 %v3415_v49  ;;  %v3495_v49 = vld [vmem:[%s4225_s0 + $0x228] ss:$52 sps:$4 sm:$0xff]  }
  0x88   :  { %1877 = vmatprep.mubr.bf16.mxu0 %v3423_v50  ;;  %v3502_v50 = vld [vmem:[%s4225_s0 + $0x294] ss:$52 sps:$4 sm:$0xff]  }
  0x8d   :  { %1765 = vmatmul.mubr.bf16.gmra.mxu1 %v3412_v54  ;;  %v3510_v54 = vld [vmem:[%s4225_s0 + $0x2fc] ss:$52 sps:$4 sm:$0xff]  }
  0x8e   :  { %1772 = vmatprep.mubr.bf16.mxu1 %v3420_v55  ;;  %v3501_v55 = vld [vmem:[%s4225_s0 + $0x288] ss:$52 sps:$4 sm:$0xff]  }
  0x8f   :  { %1878 = vmatmul.mubr.bf16.gmra.mxu0 %v3425_v57  ;;  %v3512_v57 = vld [vmem:[%s4225_s0 + $0x2f8] ss:$52 sps:$4 sm:$0xff]  }
  0x90   :  { %1885 = vmatprep.mubr.bf16.mxu0 %v3433_v58  ;;  %v3518_v58 = vld [vmem:[%s4225_s0 + $0x364] ss:$52 sps:$4 sm:$0xff]  }
  0x95   :  { %1773 = vmatmul.mubr.bf16.gmra.mxu1 %v3422_v62  ;;  %v3517_v62 = vld [vmem:[%s4225_s0 + $0x358] ss:$52 sps:$4 sm:$0xff]  }
  0x96   :  { %1780 = vmatprep.mubr.bf16.mxu1 %v3429_v63  ;;  %v3524_v63 = vld [vmem:[%s4225_s0 + $0x2c] ss:$52 sps:$4 sm:$0xff]  }
  0x97   :  { %1886 = vmatmul.mubr.bf16.gmra.mxu0 %v3435_v2  ;;  %v3522_v2 = vld [vmem:[%s4225_s0 + $0x28] ss:$52 sps:$4 sm:$0xff]  }
  0x98   :  { %1893 = vmatprep.mubr.bf16.mxu0 %v3442_v3  ;;  %v3526_v3 = vld [vmem:[%s4225_s0 + $0x94] ss:$52 sps:$4 sm:$0xff]  }
  0x9d   :  { %1781 = vmatmul.mubr.bf16.gmra.mxu1 %v3432_v4  ;;  %v3529_v4 = vld [vmem:[%s4225_s0 + $0x98] ss:$52 sps:$4 sm:$0xff]  }
  0x9e   :  { %1788 = vmatprep.mubr.bf16.mxu1 %v3438_v5  ;;  %v3528_v5 = vld [vmem:[%s4225_s0 + $0x90] ss:$52 sps:$4 sm:$0xff]  }
  0x9f   :  { %1894 = vmatmul.mubr.bf16.gmra.mxu0 %v3445_v6  ;;  %v3530_v6 = vld [vmem:[%s4225_s0 + $0xfc] ss:$52 sps:$4 sm:$0xff]  }
  0xa0   :  { %2039 = vmatprep.mubr.bf16.mxu0 %v3453_v7  ;;  %v3533_v7 = vld [vmem:[%s4225_s0 + $0x100] ss:$52 sps:$4 sm:$0xff]  }
  0xa5   :  { %1789 = vmatmul.mubr.bf16.gmra.mxu1 %v3441_v8 }
  0xa6   :  { %1934 = vmatprep.mubr.bf16.mxu1 %v3450_v9 }
  0xa7   :  { %2040 = vmatmul.mubr.bf16.vlgmr.msra.gmra.mxu0 %v3451_v10 }
  0xa8   :  { %3222 = vmatpush3.bf16.msra.mxu0 %v3458_v11  ;;  %2047 = vmatprep.mubr.bf16.mxu0 %v3460_v12 }
  0xa9   :  { %3223 = vmatprep.subr.bf16.mxu0 %v3606_v0 }
  0xac   :  { %3224 = vmatpush3.bf16.msra.mxu0 %v3479_v14 }
  0xad   :  { %1935 = vmatmul.mubr.bf16.vlgmr.msra.gmra.mxu1 %v3448_v13  ;;  %3225 = vmatprep.subr.bf16.mxu0 %v3606_v0 }
  0xae   :  { %3139 = vmatpush3.bf16.msra.mxu1 %v3455_v15  ;;  %1942 = vmatprep.mubr.bf16.mxu1 %v3456_v16  ;;  %v3532_v15 = vld [vmem:[%s4225_s0 + $0xf8] ss:$52 sps:$4 sm:$0xff]  }
  0xaf   :  { %2048 = vmatmul.mubr.bf16.gmra.mxu0 %v3462_v17  ;;  %3140 = vmatprep.subr.bf16.mxu1 %v3463_v18  ;;  %v3534_v17 = vld [vmem:[%s4225_s0 + $0x164] ss:$52 sps:$4 sm:$0xff]  }
  0xb0   :  { %2055 = vmatprep.mubr.bf16.mxu0 %v3468_v19  ;;  %3226 = vmatpush3.bf16.msra.mxu0 %v3496_v20  ;;  %v3537_v20 = vld [vmem:[%s4225_s0 + $0x168] ss:$52 sps:$4 sm:$0xff]  }
  0xb1   :  { %3227 = vmatprep.subr.bf16.mxu0 %v3606_v0 }
  0xb2   :  { %3141 = vmatpush3.bf16.msra.mxu1 %v3464_v21 }
  0xb3   :  { %3142 = vmatprep.subr.bf16.mxu1 %v3471_v22 }
  0xb4   :  { %3228 = vmatpush3.bf16.msra.mxu0 %v3513_v30  ;;  %v3536_v30 = vld [vmem:[%s4225_s0 + $0x160] ss:$52 sps:$4 sm:$0xff]  }
  0xb5   :  { %1943 = vmatmul.mubr.bf16.gmra.mxu1 %v3459_v23 }
  0xb6   :  { %1950 = vmatprep.mubr.bf16.mxu1 %v3465_v24  ;;  %3143 = vmatpush3.bf16.msra.mxu1 %v3472_v25 }
  0xb7   :  { %2056 = vmatmul.mubr.bf16.gmra.mxu0 %v3470_v26  ;;  %3144 = vmatprep.subr.bf16.mxu1 %v3480_v27 }
  0xb8   :  { %2063 = vmatprep.mubr.bf16.mxu0 %v3476_v28 }
  0xba   :  { %3145 = vmatpush3.bf16.msra.mxu1 %v3481_v29 }
  0xbb   :  { %3146 = vmatprep.subr.bf16.mxu1 %v3488_v31 }
  0xbd   :  { %1951 = vmatmul.mubr.bf16.gmra.mxu1 %v3467_v32  ;;  %v3538_v32 = vld [vmem:[%s4225_s0 + $0x1cc] ss:$52 sps:$4 sm:$0xff]  }
  0xbe   :  { %1958 = vmatprep.mubr.bf16.mxu1 %v3473_v33  ;;  %3147 = vmatpush3.bf16.msra.mxu1 %v3489_v35  ;;  %v3541_v35 = vld [vmem:[%s4225_s0 + $0x1d0] ss:$52 sps:$4 sm:$0xff]  }
  0xbf   :  { %2064 = vmatmul.mubr.bf16.gmra.mxu0 %v3478_v34  ;;  %3148 = vmatprep.subr.bf16.mxu1 %v3497_v36 }
  0xc0   :  { %2071 = vmatprep.mubr.bf16.mxu0 %v3485_v37 }
  0xc2   :  { %3149 = vmatpush3.bf16.msra.mxu1 %v3498_v38 }
  0xc3   :  { %3150 = vmatprep.subr.bf16.mxu1 %v3505_v39 }
  0xc5   :  { %1959 = vmatmul.mubr.bf16.gmra.mxu1 %v3475_v40 }
  0xc6   :  { %1966 = vmatprep.mubr.bf16.mxu1 %v3482_v41  ;;  %3151 = vmatpush3.bf16.msra.mxu1 %v3508_v42 }
  0xc7   :  { %2072 = vmatmul.mubr.bf16.gmra.mxu0 %v3487_v43  ;;  %3152 = vmatprep.subr.bf16.mxu1 %v3516_v44 }
  0xc8   :  { %2079 = vmatprep.mubr.bf16.mxu0 %v3493_v45  ;;  %v3540_v45 = vld [vmem:[%s4225_s0 + $0x1c8] ss:$52 sps:$4 sm:$0xff]  }
  0xca   :  { %3153 = vmatpush3.bf16.msra.mxu1 %v3520_v46 }
  0xcd   :  { %1967 = vmatmul.mubr.bf16.gmra.mxu1 %v3484_v47  ;;  %v3544_v47 = vld [vmem:[%s4225_s0 + $0x234] ss:$52 sps:$4 sm:$0xff]  }
  0xce   :  { %1974 = vmatprep.mubr.bf16.mxu1 %v3490_v48 }
  0xcf   :  { %2080 = vmatmul.mubr.bf16.gmra.mxu0 %v3495_v49 }
  0xd0   :  { %2087 = vmatprep.mubr.bf16.mxu0 %v3502_v50  ;;  %v3545_v50 = vld [vmem:[%s4225_s0 + $0x238] ss:$52 sps:$4 sm:$0xff]  }
  0xd5   :  { %1975 = vmatmul.mubr.bf16.gmra.mxu1 %v3492_v51 }
  0xd6   :  { %1982 = vmatprep.mubr.bf16.mxu1 %v3499_v52 }
  0xd7   :  { %2088 = vmatmul.mubr.bf16.gmra.mxu0 %v3504_v53 }
  0xd8   :  { %2095 = vmatprep.mubr.bf16.mxu0 %v3510_v54 }
  0xdd   :  { %1983 = vmatmul.mubr.bf16.gmra.mxu1 %v3501_v55 }
  0xde   :  { %1990 = vmatprep.mubr.bf16.mxu1 %v3506_v56 }
  0xdf   :  { %2096 = vmatmul.mubr.bf16.gmra.mxu0 %v3512_v57 }
  0xe0   :  { %2103 = vmatprep.mubr.bf16.mxu0 %v3518_v58 }
  0xe5   :  { %1991 = vmatmul.mubr.bf16.gmra.mxu1 %v3509_v59 }
  0xe6   :  { %1998 = vmatprep.mubr.bf16.mxu1 %v3514_v60  ;;  %v3542_v60 = vld [vmem:[%s4225_s0 + $0x230] ss:$52 sps:$4 sm:$0xff]  }
  0xe7   :  { %2104 = vmatmul.mubr.bf16.gmra.mxu0 %v3521_v61 }
  0xe8   :  { %3229 = vmatprep.mubr.msk.bf16.mxu0 %vm3607_vm0, %v3606_v0 }
  0xed   :  { %1999 = vmatmul.mubr.bf16.gmra.mxu1 %v3517_v62  ;;  %v3548_v62 = vld [vmem:[%s4225_s0 + $0x29c] ss:$52 sps:$4 sm:$0xff]  }
  0xee   :  { %2144 = vmatprep.mubr.bf16.mxu1 %v3524_v63 }
  0xef   :  { %3230 = vmatmul.mubr.msk.bf16.vlgmr.msra.gmra.mxu0 %vm1559_vm1, %v3525_v1 }
  0xf0   :  { %3233 = vmatprep.mubr.msk.bf16.mxu0 %vm3607_vm0, %v3606_v0 }
  0xf5   :  { %2145 = vmatmul.mubr.bf16.vlgmr.msra.gmra.mxu1 %v3522_v2  ;;  %v3549_v2 = vld [vmem:[%s4225_s0 + $0x2a0] ss:$52 sps:$4 sm:$0xff]  }
  0xf6   :  { %2152 = vmatprep.mubr.bf16.mxu1 %v3526_v3 }
  0xf7   :  { %3234 = vmatmul.mubr.msk.bf16.gmra.mxu0 %vm1559_vm1, %v3529_v4 }
  0xf8   :  { %3237 = vmatprep.mubr.msk.bf16.mxu0 %vm3607_vm0, %v3606_v0 }
  0xfd   :  { %v2828_v8 = vpop.f32.mrf.mxu1  ;;  %2153 = vmatmul.mubr.bf16.gmra.mxu1 %v3528_v5  ;;  %v2804_v9 = vpop.f32.mrf.mxu0 }
  0xfe   :  { %2160 = vmatprep.mubr.bf16.mxu1 %v3530_v6 }
  0xff   :  { %v2829_v10 = vpop.f32.mrf.mxu1  ;;  %3238 = vmatmul.mubr.msk.bf16.gmra.mxu0 %vm1559_vm1, %v3533_v7  ;;  %v2805_v11 = vpop.f32.mrf.mxu0 }
 0x100   :  { %v3941_v12 = vadd.f32 %v2829_v10, %v2828_v8  ;;  %v3943_v13 = vadd.f32 %v2805_v11, %v2804_v9  ;;  %3241 = vmatprep.mubr.msk.bf16.mxu0 %vm3607_vm0, %v3606_v0  ;;  %v4023_v10 = vld [vmem:[#allocation4] ss:$0 sm:$0xff] }
 0x101   :  { %v2831_v14 = vpop.f32.mrf.mxu1  ;;  %v2807_v16 = vpop.f32.mrf.mxu0 }
 0x103   :  { %v2832_v18 = vpop.f32.mrf.mxu1  ;;  %v2808_v19 = vpop.f32.mrf.mxu0 }
 0x104   :  { %v3956_v21 = vadd.f32 %v2832_v18, %v2831_v14  ;;  %v3958_v22 = vadd.f32 %v2808_v19, %v2807_v16  ;;  %v3546_v14 = vld [vmem:[%s4225_s0 + $0x298] ss:$52 sps:$4 sm:$0xff]  }
 0x105   :  { %v2834_v23 = vpop.f32.mrf.mxu1  ;;  %2161 = vmatmul.mubr.bf16.gmra.mxu1 %v3532_v15  ;;  %v2810_v24 = vpop.f32.mrf.mxu0  ;;  %v3552_v18 = vld [vmem:[%s4225_s0 + $0x304] ss:$52 sps:$4 sm:$0xff]  }
 0x106   :  { %2168 = vmatprep.mubr.bf16.mxu1 %v3534_v17 }
 0x107   :  { %v2835_v25 = vpop.f32.mrf.mxu1  ;;  %3242 = vmatmul.mubr.msk.bf16.gmra.mxu0 %vm1559_vm1, %v3537_v20  ;;  %v2811_v26 = vpop.f32.mrf.mxu0  ;;  %v3553_v20 = vld [vmem:[%s4225_s0 + $0x308] ss:$52 sps:$4 sm:$0xff]  }
 0x108   :  { %v3961_v27 = vadd.f32 %v2835_v25, %v2834_v23  ;;  %v3963_v28 = vadd.f32 %v2811_v26, %v2810_v24  ;;  %3245 = vmatprep.mubr.msk.bf16.mxu0 %vm3607_vm0, %v3606_v0 }
 0x109   :  { %v2837_v29 = vpop.f32.mrf.mxu1  ;;  %v2813_v31 = vpop.f32.mrf.mxu0 }
 0x10b   :  { %v2838_v33 = vpop.f32.mrf.mxu1  ;;  %v2814_v34 = vpop.f32.mrf.mxu0 }
 0x10c   :  { %v3976_v36 = vadd.f32 %v2838_v33, %v2837_v29  ;;  %v3978_v37 = vadd.f32 %v2814_v34, %v2813_v31 }
 0x10d   :  { %v2840_v38 = vpop.f32.mrf.mxu1  ;;  %2169 = vmatmul.mubr.bf16.gmra.mxu1 %v3536_v30  ;;  %v2816_v39 = vpop.f32.mrf.mxu0 }
 0x10e   :  { %2176 = vmatprep.mubr.bf16.mxu1 %v3538_v32  ;;  %v1622_v32 = vadd.f32 %v3943_v13, %v4023_v10  ;;  %v3557_v13 = vld [vmem:[%s4225_s0 + $0x370] ss:$52 sps:$4 sm:$0xff]  }
 0x10f   :  { %v2841_v40 = vpop.f32.mrf.mxu1  ;;  %3246 = vmatmul.mubr.msk.bf16.gmra.mxu0 %vm1559_vm1, %v3541_v35  ;;  %v2817_v41 = vpop.f32.mrf.mxu0  ;;  %v3550_v35 = vld [vmem:[%s4225_s0 + $0x300] ss:$52 sps:$4 sm:$0xff]  }
 0x110   :  { %v3981_v42 = vadd.f32 %v2841_v40, %v2840_v38  ;;  %v3983_v43 = vadd.f32 %v2817_v41, %v2816_v39  ;;  %3249 = vmatprep.mubr.msk.bf16.mxu0 %vm3607_vm0, %v3606_v0  ;;  %v3556_v41 = vld [vmem:[%s4225_s0 + $0x36c] ss:$52 sps:$4 sm:$0xff]  }
 0x111   :  { %v2843_v44 = vpop.f32.mrf.mxu1  ;;  %v2819_v46 = vpop.f32.mrf.mxu0 }
 0x113   :  { %v2844_v48 = vpop.f32.mrf.mxu1  ;;  %v2820_v49 = vpop.f32.mrf.mxu0 }
 0x114   :  { %v3996_v51 = vadd.f32 %v2844_v48, %v2843_v44  ;;  %v3998_v52 = vadd.f32 %v2820_v49, %v2819_v46 }
 0x115   :  { %v2846_v53 = vpop.f32.mrf.mxu1  ;;  %2177 = vmatmul.mubr.bf16.gmra.mxu1 %v3540_v45  ;;  %v2822_v54 = vpop.f32.mrf.mxu0 }
 0x116   :  { %2184 = vmatprep.mubr.bf16.mxu1 %v3544_v47 }
 0x117   :  { %v2847_v55 = vpop.f32.mrf.mxu1  ;;  %3250 = vmatmul.mubr.msk.bf16.gmra.mxu0 %vm1559_vm1, %v3545_v50  ;;  %v2823_v56 = vpop.f32.mrf.mxu0 }
 0x118   :  { %v4001_v57 = vadd.f32 %v2847_v55, %v2846_v53  ;;  %v4003_v58 = vadd.f32 %v2823_v56, %v2822_v54  ;;  %3253 = vmatprep.mubr.msk.bf16.mxu0 %vm3607_vm0, %v3606_v0  ;;  %v1630_v56 = vadd.f32 %v3963_v28, %v4023_v10 }
 0x119   :  { %v2849_v59 = vpop.f32.mrf.mxu1  ;;  %v2825_v61 = vpop.f32.mrf.mxu0 }
 0x11b   :  { %v2850_v63 = vpop.f32.mrf.mxu1  ;;  %v2826_v1 = vpop.f32.mrf.mxu0 }
 0x11c   :  { %v4016_v3 = vadd.f32 %v2850_v63, %v2849_v59  ;;  %v4018_v4 = vadd.f32 %v2826_v1, %v2825_v61  ;;  %v3554_v61 = vld [vmem:[%s4225_s0 + $0x368] ss:$52 sps:$4 sm:$0xff]  }
 0x11d   :  { %v2852_v5 = vpop.f32.mrf.mxu1  ;;  %2185 = vmatmul.mubr.bf16.gmra.mxu1 %v3542_v60 }
 0x11e   :  { %2192 = vmatprep.mubr.bf16.mxu1 %v3548_v62  ;;  %v2944_v6 = vpop.f32.mrf.mxu0 }
 0x11f   :  { %v2853_v7 = vpop.f32.mrf.mxu1  ;;  %3254 = vmatmul.mubr.msk.bf16.gmra.mxu0 %vm1559_vm1, %v3549_v2 }
 0x120   :  { %v2854_v8 = vadd.f32 %v2853_v7, %v2852_v5  ;;  %v2945_v9 = vpop.f32.mrf.mxu0  ;;  %3257 = vmatprep.mubr.msk.bf16.mxu0 %vm3607_vm0, %v3606_v0 }
 0x121   :  { %v2855_v11 = vpop.f32.mrf.mxu1  ;;  %v2946_v15 = vadd.f32 %v2945_v9, %v2944_v6  ;;  %v1633_v6 = vadd.f32 %v3978_v37, %v4023_v10 }
 0x122   :  { %v4029_v16 = vadd.f32 %v2854_v8, %v4023_v10  ;;  %v2947_v17 = vpop.f32.mrf.mxu0 }
 0x123   :  { %v2856_v19 = vpop.f32.mrf.mxu1 }
 0x124   :  { %v2857_v23 = vadd.f32 %v2856_v19, %v2855_v11  ;;  %v2948_v24 = vpop.f32.mrf.mxu0 }
 0x125   :  { %v2874_v25 = vpop.f32.mrf.mxu1  ;;  %2193 = vmatmul.mubr.bf16.gmra.mxu1 %v3546_v14  ;;  %v2949_v26 = vadd.f32 %v2948_v24, %v2947_v17 }
 0x126   :  { %v4038_v29 = vadd.f32 %v2857_v23, %v4023_v10  ;;  %2200 = vmatprep.mubr.bf16.mxu1 %v3552_v18  ;;  %v1638_v18 = vadd.f32 %v3983_v43, %v4023_v10 }
 0x127   :  { %v2875_v30 = vpop.f32.mrf.mxu1  ;;  %v2950_v31 = vpop.f32.mrf.mxu0  ;;  %3258 = vmatmul.mubr.msk.bf16.gmra.mxu0 %vm1559_vm1, %v3553_v20 }
 0x128   :  { %v2876_v33 = vadd.f32 %v2875_v30, %v2874_v25  ;;  %3261 = vmatprep.mubr.msk.bf16.mxu0 %vm3607_vm0, %v3606_v0  ;;  %v1625_v0 = vadd.f32 %v3958_v22, %v4023_v10 }
 0x129   :  { %v2877_v34 = vpop.f32.mrf.mxu1  ;;  %v2951_v38 = vpop.f32.mrf.mxu0 }
 0x12a   :  { %v1727_v39 = vadd.f32 %v2876_v33, %v1622_v32  ;;  %v2952_v40 = vadd.f32 %v2951_v38, %v2950_v31  ;;  %v1641_v31 = vadd.f32 %v3998_v52, %v4023_v10 }
 0x12b   :  { %v2878_v44 = vpop.f32.mrf.mxu1  ;;  %v2953_v45 = vpop.f32.mrf.mxu0 }
 0x12c   :  { %v4056_v46 = vadd.f32 %v2946_v15, %v1727_v39  ;;  %v2879_v47 = vadd.f32 %v2878_v44, %v2877_v34 }
 0x12d   :  { %v2880_v48 = vpop.f32.mrf.mxu1  ;;  %2201 = vmatmul.mubr.bf16.gmra.mxu1 %v3550_v35  ;;  %v2954_v49 = vpop.f32.mrf.mxu0 }
 0x12e   :  { %v1730_v50 = vadd.f32 %v2879_v47, %v1625_v0  ;;  %v2955_v53 = vadd.f32 %v2954_v49, %v2953_v45  ;;  %2208 = vmatprep.mubr.bf16.mxu1 %v3556_v41  ;;  %v1646_v41 = vadd.f32 %v4003_v58, %v4023_v10 }
 0x12f   :  { %v2881_v54 = vpop.f32.mrf.mxu1  ;;  %v2956_v55 = vpop.f32.mrf.mxu0  ;;  %3262 = vmatmul.mubr.msk.bf16.gmra.mxu0 %vm1559_vm1, %v3557_v13 }
 0x130   :  { %v4061_v59 = vadd.f32 %v2949_v26, %v1730_v50  ;;  %v2882_v60 = vadd.f32 %v2881_v54, %v2880_v48  ;;  %v1649_v50 = vadd.f32 %v4018_v4, %v4023_v10 }
 0x131   :  { %v2883_v22 = vpop.f32.mrf.mxu1  ;;  %v2957_v62 = vpop.f32.mrf.mxu0 }
 0x132   :  { %v1735_v63 = vadd.f32 %v2882_v60, %v1630_v56  ;;  %v2958_v1 = vadd.f32 %v2957_v62, %v2956_v55  ;;  %v1654_v62 = vadd.f32 %v3941_v12, %v4023_v10 }
 0x133   :  { %v2884_v2 = vpop.f32.mrf.mxu1  ;;  %v2959_v5 = vpop.f32.mrf.mxu0 }
 0x134   :  { %v4068_v7 = vadd.f32 %v2952_v40, %v1735_v63  ;;  %v2885_v8 = vadd.f32 %v2884_v2, %v2883_v22 }
 0x135   :  { %v2886_v28 = vpop.f32.mrf.mxu1  ;;  %2209 = vmatmul.mubr.bf16.gmra.mxu1 %v3554_v61  ;;  %v2960_v9 = vpop.f32.mrf.mxu0 }
 0x136   :  { %v1738_v11 = vadd.f32 %v2885_v8, %v1633_v6  ;;  %v2961_v14 = vadd.f32 %v2960_v9, %v2959_v5  ;;  %v1657_v9 = vadd.f32 %v3956_v21, %v4023_v10 }
 0x137   :  { %v2887_v15 = vpop.f32.mrf.mxu1  ;;  %v2962_v17 = vpop.f32.mrf.mxu0 }
 0x138   :  { %v4072_v19 = vadd.f32 %v2955_v53, %v1738_v11  ;;  %v2888_v20 = vadd.f32 %v2887_v15, %v2886_v28 }
 0x139   :  { %v2889_v23 = vpop.f32.mrf.mxu1  ;;  %v2963_v24 = vpop.f32.mrf.mxu0 }
 0x13a   :  { %v1743_v25 = vadd.f32 %v2888_v20, %v1638_v18  ;;  %v2964_v37 = vadd.f32 %v2963_v24, %v2962_v17  ;;  %v1662_v24 = vadd.f32 %v3961_v27, %v4023_v10 }
 0x13b   :  { %v2890_v26 = vpop.f32.mrf.mxu1  ;;  %v2965_v30 = vpop.f32.mrf.mxu0 }
 0x13c   :  { %v4076_v32 = vadd.f32 %v2958_v1, %v1743_v25  ;;  %v2891_v33 = vadd.f32 %v2890_v26, %v2889_v23 }
 0x13d   :  { %v2892_v34 = vpop.f32.mrf.mxu1  ;;  %v2966_v35 = vpop.f32.mrf.mxu0 }
 0x13e   :  { %v1746_v38 = vadd.f32 %v2891_v33, %v1641_v31  ;;  %v2967_v39 = vadd.f32 %v2966_v35, %v2965_v30  ;;  %v1665_v35 = vadd.f32 %v3976_v36, %v4023_v10 }
 0x13f   :  { %v2893_v43 = vpop.f32.mrf.mxu1  ;;  %v2968_v40 = vpop.f32.mrf.mxu0 }
 0x140   :  { %v4080_v44 = vadd.f32 %v2961_v14, %v1746_v38  ;;  %v2894_v45 = vadd.f32 %v2893_v43, %v2892_v34 }
 0x141   :  { %v2895_v13 = vpop.f32.mrf.mxu1  ;;  %v2969_v0 = vpop.f32.mrf.mxu0 }
 0x142   :  { %v1751_v47 = vadd.f32 %v2894_v45, %v1646_v41  ;;  %v2970_v48 = vadd.f32 %v2969_v0, %v2968_v40  ;;  %v1670_v0 = vadd.f32 %v3981_v42, %v4023_v10 }
 0x143   :  { %v2896_v52 = vpop.f32.mrf.mxu1  ;;  %v2971_v49 = vpop.f32.mrf.mxu0 }
 0x144   :  { %v4084_v53 = vadd.f32 %v2964_v37, %v1751_v47  ;;  %v2897_v54 = vadd.f32 %v2896_v52, %v2895_v13 }
 0x145   :  { %v2898_v55 = vpop.f32.mrf.mxu1  ;;  %v2972_v56 = vpop.f32.mrf.mxu0 }
 0x146   :  { %v1754_v60 = vadd.f32 %v2897_v54, %v1649_v50  ;;  %v2973_v22 = vadd.f32 %v2972_v56, %v2971_v49  ;;  %v1673_v56 = vadd.f32 %v3996_v51, %v4023_v10 }
 0x147   :  { %v2899_v58 = vpop.f32.mrf.mxu1  ;;  %v2974_v61 = vpop.f32.mrf.mxu0 }
 0x148   :  { %v4088_v63 = vadd.f32 %v2967_v39, %v1754_v60  ;;  %v2900_v1 = vadd.f32 %v2899_v58, %v2898_v55 }
 0x149   :  { %v2901_v2 = vpop.f32.mrf.mxu1  ;;  %v2975_v5 = vpop.f32.mrf.mxu0 }
 0x14a   :  { %v1759_v6 = vadd.f32 %v2900_v1, %v1654_v62  ;;  %v2976_v8 = vadd.f32 %v2975_v5, %v2974_v61  ;;  %v1678_v5 = vadd.f32 %v4001_v57, %v4023_v10 }
 0x14b   :  { %v2902_v4 = vpop.f32.mrf.mxu1  ;;  %v2977_v28 = vpop.f32.mrf.mxu0 }
 0x14c   :  { %v4092_v11 = vadd.f32 %v2970_v48, %v1759_v6  ;;  %v2903_v14 = vadd.f32 %v2902_v4, %v2901_v2 }
 0x14d   :  { %v2904_v15 = vpop.f32.mrf.mxu1  ;;  %v2978_v17 = vpop.f32.mrf.mxu0 }
 0x14e   :  { %v1762_v18 = vadd.f32 %v2903_v14, %v1657_v9  ;;  %v2979_v20 = vadd.f32 %v2978_v17, %v2977_v28  ;;  %v1681_v17 = vadd.f32 %v4016_v3, %v4023_v10 }
 0x14f   :  { %v2905_v12 = vpop.f32.mrf.mxu1  ;;  %v2980_v23 = vpop.f32.mrf.mxu0 }
 0x150   :  { %v4096_v25 = vadd.f32 %v2973_v22, %v1762_v18  ;;  %v2906_v37 = vadd.f32 %v2905_v12, %v2904_v15 }
 0x151   :  { %v2907_v26 = vpop.f32.mrf.mxu1  ;;  %v2981_v30 = vpop.f32.mrf.mxu0 }
 0x152   :  { %v1767_v31 = vadd.f32 %v2906_v37, %v1662_v24  ;;  %v2982_v33 = vadd.f32 %v2981_v30, %v2980_v23 }
 0x153   :  { %v2908_v21 = vpop.f32.mrf.mxu1  ;;  %v2983_v34 = vpop.f32.mrf.mxu0 }
 0x154   :  { %v4100_v38 = vadd.f32 %v2976_v8, %v1767_v31  ;;  %v2909_v39 = vadd.f32 %v2908_v21, %v2907_v26 }
 0x155   :  { %v2910_v43 = vpop.f32.mrf.mxu1  ;;  %v2984_v40 = vpop.f32.mrf.mxu0 }
 0x156   :  { %v1770_v41 = vadd.f32 %v2909_v39, %v1665_v35  ;;  %v2985_v45 = vadd.f32 %v2984_v40, %v2983_v34 }
 0x157   :  { %v2911_v27 = vpop.f32.mrf.mxu1  ;;  %v2986_v13 = vpop.f32.mrf.mxu0 }
 0x158   :  { %v4104_v47 = vadd.f32 %v2979_v20, %v1770_v41  ;;  %v2912_v48 = vadd.f32 %v2911_v27, %v2910_v43 }
 0x159   :  { %v2913_v52 = vpop.f32.mrf.mxu1  ;;  %v2987_v49 = vpop.f32.mrf.mxu0 }
 0x15a   :  { %v1775_v50 = vadd.f32 %v2912_v48, %v1670_v0  ;;  %v2988_v54 = vadd.f32 %v2987_v49, %v2986_v13 }
 0x15b   :  { %v2914_v36 = vpop.f32.mrf.mxu1  ;;  %v2989_v55 = vpop.f32.mrf.mxu0 }
 0x15c   :  { %v4108_v60 = vadd.f32 %v2982_v33, %v1775_v50  ;;  %v2915_v22 = vadd.f32 %v2914_v36, %v2913_v52 }
 0x15d   :  { %v2916_v58 = vpop.f32.mrf.mxu1  ;;  %v2990_v61 = vpop.f32.mrf.mxu0 }
 0x15e   :  { %v1778_v62 = vadd.f32 %v2915_v22, %v1673_v56  ;;  %v2991_v1 = vadd.f32 %v2990_v61, %v2989_v55 }
 0x15f   :  { %v2917_v42 = vpop.f32.mrf.mxu1  ;;  %v2992_v2 = vpop.f32.mrf.mxu0 }
 0x160   :  { %v4112_v6 = vadd.f32 %v2985_v45, %v1778_v62  ;;  %v2918_v8 = vadd.f32 %v2917_v42, %v2916_v58 }
 0x161   :  { %v2919_v4 = vpop.f32.mrf.mxu1  ;;  %v2993_v28 = vpop.f32.mrf.mxu0 }
 0x162   :  { %v1783_v9 = vadd.f32 %v2918_v8, %v1678_v5  ;;  %v2994_v14 = vadd.f32 %v2993_v28, %v2992_v2 }
 0x163   :  { %v2920_v51 = vpop.f32.mrf.mxu1  ;;  %v2995_v15 = vpop.f32.mrf.mxu0 }
 0x164   :  { %v4116_v18 = vadd.f32 %v2988_v54, %v1783_v9  ;;  %v2921_v20 = vadd.f32 %v2920_v51, %v2919_v4 }
 0x165   :  { %v2922_v12 = vpop.f32.mrf.mxu1  ;;  %v2996_v23 = vpop.f32.mrf.mxu0 }
 0x166   :  { %v1786_v24 = vadd.f32 %v2921_v20, %v1681_v17  ;;  %v2997_v37 = vadd.f32 %v2996_v23, %v2995_v15 }
 0x167   :  { %v2923_v57 = vpop.f32.mrf.mxu1  ;;  %v3084_v26 = vpop.f32.mrf.mxu0 }
 0x168   :  { %v4118_v30 = vadd.f32 %v2991_v1, %v1786_v24  ;;  %v2924_v31 = vadd.f32 %v2923_v57, %v2922_v12 }
 0x169   :  { %v2925_v33 = vpop.f32.mrf.mxu1  ;;  %v3085_v21 = vpop.f32.mrf.mxu0 }
 0x16a   :  { %v1791_v34 = vadd.f32 %v2924_v31, %v4029_v16  ;;  %v3086_v35 = vadd.f32 %v3085_v21, %v3084_v26 }
 0x16b   :  { %v2926_v39 = vpop.f32.mrf.mxu1  ;;  %v3087_v43 = vpop.f32.mrf.mxu0 }
 0x16c   :  { %v4121_v3 = vadd.f32 %v2994_v14, %v1791_v34  ;;  %v2927_v10 = vadd.f32 %v2926_v39, %v2925_v33 }
 0x16d   :  { %v3014_v40 = vpop.f32.mrf.mxu1  ;;  %v3088_v41 = vpop.f32.mrf.mxu0 }
 0x16e   :  { %v1794_v45 = vadd.f32 %v2927_v10, %v4038_v29  ;;  %v3089_v27 = vadd.f32 %v3088_v41, %v3087_v43 }
 0x16f   :  { %v3015_v13 = vpop.f32.mrf.mxu1  ;;  %v3090_v0 = vpop.f32.mrf.mxu0 }
 0x170   :  { %v4124_v48 = vadd.f32 %v2997_v37, %v1794_v45  ;;  %v3016_v52 = vadd.f32 %v3015_v13, %v3014_v40 }
 0x171   :  { %v3017_v49 = vpop.f32.mrf.mxu1  ;;  %v3091_v50 = vpop.f32.mrf.mxu0 }
 0x172   :  { %v1937_v16 = vadd.f32 %v3016_v52, %v4056_v46  ;;  %v3092_v54 = vadd.f32 %v3091_v50, %v3090_v0 }
 0x173   :  { %v3018_v36 = vpop.f32.mrf.mxu1  ;;  %v3093_v55 = vpop.f32.mrf.mxu0 }
 0x174   :  { %v4127_v56 = vadd.f32 %v3086_v35, %v1937_v16  ;;  %v3019_v22 = vadd.f32 %v3018_v36, %v3017_v49 }
 0x175   :  { %v3020_v58 = vpop.f32.mrf.mxu1  ;;  %v3094_v61 = vpop.f32.mrf.mxu0 }
 0x176   :  { %v1940_v29 = vadd.f32 %v3019_v22, %v4061_v59  ;;  %v3095_v62 = vadd.f32 %v3094_v61, %v3093_v55 }
 0x177   :  { %v3021_v1 = vpop.f32.mrf.mxu1  ;;  %v3096_v42 = vpop.f32.mrf.mxu0 }
 0x178   :  { %v4130_v2 = vadd.f32 %v3089_v27, %v1940_v29  ;;  %v3022_v5 = vadd.f32 %v3021_v1, %v3020_v58 }
 0x179   :  { %v3023_v8 = vpop.f32.mrf.mxu1  ;;  %v3097_v4 = vpop.f32.mrf.mxu0 }
 0x17a   :  { %v1945_v46 = vadd.f32 %v3022_v5, %v4068_v7  ;;  %v3098_v28 = vadd.f32 %v3097_v4, %v3096_v42 }
 0x17b   :  { %v3024_v9 = vpop.f32.mrf.mxu1  ;;  %v3099_v14 = vpop.f32.mrf.mxu0 }
 0x17c   :  { %v4133_v51 = vadd.f32 %v3092_v54, %v1945_v46  ;;  %v3025_v15 = vadd.f32 %v3024_v9, %v3023_v8 }
 0x17d   :  { %v3026_v17 = vpop.f32.mrf.mxu1  ;;  %v3100_v20 = vpop.f32.mrf.mxu0 }
 0x17e   :  { %v1948_v59 = vadd.f32 %v3025_v15, %v4072_v19  ;;  %v3101_v12 = vadd.f32 %v3100_v20, %v3099_v14 }
 0x17f   :  { %v3027_v23 = vpop.f32.mrf.mxu1  ;;  %v3102_v24 = vpop.f32.mrf.mxu0 }
 0x180   :  { %v4136_v37 = vadd.f32 %v3095_v62, %v1948_v59  ;;  %v3028_v57 = vadd.f32 %v3027_v23, %v3026_v17 }
 0x181   :  { %v3029_v26 = vpop.f32.mrf.mxu1  ;;  %v3103_v31 = vpop.f32.mrf.mxu0 }
 0x182   :  { %v1953_v7 = vadd.f32 %v3028_v57, %v4076_v32  ;;  %v3104_v33 = vadd.f32 %v3103_v31, %v3102_v24 }
 0x183   :  { %v3030_v21 = vpop.f32.mrf.mxu1  ;;  %v3105_v34 = vpop.f32.mrf.mxu0 }
 0x184   :  { %v4139_v35 = vadd.f32 %v3098_v28, %v1953_v7  ;;  %v3031_v39 = vadd.f32 %v3030_v21, %v3029_v26 }
 0x185   :  { %v3032_v43 = vpop.f32.mrf.mxu1  ;;  %v3106_v10 = vpop.f32.mrf.mxu0 }
 0x186   :  { %v1956_v19 = vadd.f32 %v3031_v39, %v4080_v44  ;;  %v3107_v40 = vadd.f32 %v3106_v10, %v3105_v34 }
 0x187   :  { %v3033_v41 = vpop.f32.mrf.mxu1  ;;  %v3108_v45 = vpop.f32.mrf.mxu0 }
 0x188   :  { %v4142_v27 = vadd.f32 %v3101_v12, %v1956_v19  ;;  %v3034_v13 = vadd.f32 %v3033_v41, %v3032_v43 }
 0x189   :  { %v3035_v0 = vpop.f32.mrf.mxu1  ;;  %v3109_v52 = vpop.f32.mrf.mxu0 }
 0x18a   :  { %v1961_v32 = vadd.f32 %v3034_v13, %v4084_v53  ;;  %v3110_v49 = vadd.f32 %v3109_v52, %v3108_v45 }
 0x18b   :  { %v3036_v50 = vpop.f32.mrf.mxu1  ;;  %v3111_v16 = vpop.f32.mrf.mxu0 }
 0x18c   :  { %v4145_v54 = vadd.f32 %v3104_v33, %v1961_v32  ;;  %v3037_v36 = vadd.f32 %v3036_v50, %v3035_v0 }
 0x18d   :  { %v3038_v55 = vpop.f32.mrf.mxu1  ;;  %v3112_v22 = vpop.f32.mrf.mxu0 }
 0x18e   :  { %v1964_v44 = vadd.f32 %v3037_v36, %v4088_v63  ;;  %v3113_v58 = vadd.f32 %v3112_v22, %v3111_v16 }
 0x18f   :  { %v3039_v61 = vpop.f32.mrf.mxu1  ;;  %v3114_v29 = vpop.f32.mrf.mxu0 }
 0x190   :  { %v4148_v62 = vadd.f32 %v3107_v40, %v1964_v44  ;;  %v3040_v1 = vadd.f32 %v3039_v61, %v3038_v55 }
 0x191   :  { %v3041_v42 = vpop.f32.mrf.mxu1  ;;  %v3115_v5 = vpop.f32.mrf.mxu0 }
 0x192   :  { %v1969_v53 = vadd.f32 %v3040_v1, %v4092_v11  ;;  %v3116_v8 = vadd.f32 %v3115_v5, %v3114_v29 }
 0x193   :  { %v3042_v4 = vpop.f32.mrf.mxu1  ;;  %v3117_v46 = vpop.f32.mrf.mxu0 }
 0x194   :  { %v4151_v28 = vadd.f32 %v3110_v49, %v1969_v53  ;;  %v3043_v9 = vadd.f32 %v3042_v4, %v3041_v42 }
 0x195   :  { %v3044_v14 = vpop.f32.mrf.mxu1  ;;  %v3118_v15 = vpop.f32.mrf.mxu0 }
 0x196   :  { %v1972_v63 = vadd.f32 %v3043_v9, %v4096_v25  ;;  %v3119_v17 = vadd.f32 %v3118_v15, %v3117_v46 }
 0x197   :  { %v3045_v20 = vpop.f32.mrf.mxu1  ;;  %v3120_v59 = vpop.f32.mrf.mxu0 }
 0x198   :  { %v4154_v12 = vadd.f32 %v3113_v58, %v1972_v63  ;;  %v3046_v23 = vadd.f32 %v3045_v20, %v3044_v14 }
 0x199   :  { %v3047_v24 = vpop.f32.mrf.mxu1  ;;  %v3121_v57 = vpop.f32.mrf.mxu0 }
 0x19a   :  { %v1977_v11 = vadd.f32 %v3046_v23, %v4100_v38  ;;  %v3122_v26 = vadd.f32 %v3121_v57, %v3120_v59 }
 0x19b   :  { %v3048_v31 = vpop.f32.mrf.mxu1  ;;  %v3123_v7 = vpop.f32.mrf.mxu0 }
 0x19c   :  { %v4157_v33 = vadd.f32 %v3116_v8, %v1977_v11  ;;  %v3049_v21 = vadd.f32 %v3048_v31, %v3047_v24 }
 0x19d   :  { %v3050_v34 = vpop.f32.mrf.mxu1  ;;  %v3124_v39 = vpop.f32.mrf.mxu0 }
 0x19e   :  { %v1980_v25 = vadd.f32 %v3049_v21, %v4104_v47  ;;  %v3125_v43 = vadd.f32 %v3124_v39, %v3123_v7 }
 0x19f   :  { %v3051_v10 = vpop.f32.mrf.mxu1  ;;  %v3126_v19 = vpop.f32.mrf.mxu0 }
 0x1a0   :  { %v4160_v40 = vadd.f32 %v3119_v17, %v1980_v25  ;;  %v3052_v41 = vadd.f32 %v3051_v10, %v3050_v34 }
 0x1a1   :  { %v3053_v45 = vpop.f32.mrf.mxu1  ;;  %v3127_v13 = vpop.f32.mrf.mxu0 }
 0x1a2   :  { %v1985_v38 = vadd.f32 %v3052_v41, %v4108_v60  ;;  %v3128_v0 = vadd.f32 %v3127_v13, %v3126_v19 }
 0x1a3   :  { %v3054_v52 = vpop.f32.mrf.mxu1  ;;  %v3129_v32 = vpop.f32.mrf.mxu0 }
 0x1a4   :  { %v4163_v49 = vadd.f32 %v3122_v26, %v1985_v38  ;;  %v3055_v50 = vadd.f32 %v3054_v52, %v3053_v45 }
 0x1a5   :  { %v3056_v16 = vpop.f32.mrf.mxu1  ;;  %v3130_v36 = vpop.f32.mrf.mxu0 }
 0x1a6   :  { %v1988_v47 = vadd.f32 %v3055_v50, %v4112_v6  ;;  %v3131_v55 = vadd.f32 %v3130_v36, %v3129_v32 }
 0x1a7   :  { %v3057_v22 = vpop.f32.mrf.mxu1  ;;  %v3132_v44 = vpop.f32.mrf.mxu0 }
 0x1a8   :  { %v4166_v58 = vadd.f32 %v3125_v43, %v1988_v47  ;;  %v3058_v61 = vadd.f32 %v3057_v22, %v3056_v16 }
 0x1a9   :  { %v3059_v29 = vpop.f32.mrf.mxu1  ;;  %v3133_v1 = vpop.f32.mrf.mxu0 }
 0x1aa   :  { %v1993_v60 = vadd.f32 %v3058_v61, %v4116_v18  ;;  %v3134_v42 = vadd.f32 %v3133_v1, %v3132_v44 }
 0x1ab   :  { %v3060_v5 = vpop.f32.mrf.mxu1  ;;  %v3135_v53 = vpop.f32.mrf.mxu0 }
 0x1ac   :  { %v4169_v8 = vadd.f32 %v3128_v0, %v1993_v60  ;;  %v3061_v4 = vadd.f32 %v3060_v5, %v3059_v29 }
 0x1ad   :  { %v3062_v46 = vpop.f32.mrf.mxu1  ;;  %v3136_v9 = vpop.f32.mrf.mxu0 }
 0x1ae   :  { %v1996_v6 = vadd.f32 %v3061_v4, %v4118_v30  ;;  %v3137_v14 = vadd.f32 %v3136_v9, %v3135_v53 }
 0x1af   :  { %v3063_v15 = vpop.f32.mrf.mxu1  ;;  %v2251_v63 = vpop.f32.mrf.mxu0 }
 0x1b0   :  { %v4172_v17 = vadd.f32 %v3131_v55, %v1996_v6  ;;  %v3064_v20 = vadd.f32 %v3063_v15, %v3062_v46 }
 0x1b1   :  { %v3065_v59 = vpop.f32.mrf.mxu1  ;;  %v3231_v23 = vpop.f32.mrf.mxu0 }
 0x1b2   :  { %v2001_v18 = vadd.f32 %v3064_v20, %v4121_v3 }
 0x1b3   :  { %v3066_v24 = vpop.f32.mrf.mxu1  ;;  %v2254_v57 = vpop.f32.mrf.mxu0 }
 0x1b4   :  { %v4175_v11 = vadd.f32 %v3134_v42, %v2001_v18  ;;  %v3067_v26 = vadd.f32 %v3066_v24, %v3065_v59 }
 0x1b5   :  { %v3154_v31 = vpop.f32.mrf.mxu1  ;;  %v3232_v7 = vpop.f32.mrf.mxu0 }
 0x1b6   :  { %v2004_v21 = vadd.f32 %v3067_v26, %v4124_v48 }
 0x1b7   :  { %v3155_v30 = vpop.f32.mrf.mxu1  ;;  %v2259_v34 = vpop.f32.mrf.mxu0 }
 0x1b8   :  { %v4178_v39 = vadd.f32 %v3137_v14, %v2004_v21  ;;  %v3156_v25 = vadd.f32 %v3155_v30, %v3154_v31 }
 0x1b9   :  { %v3157_v43 = vpop.f32.mrf.mxu1  ;;  %v3235_v10 = vpop.f32.mrf.mxu0 }
 0x1ba   :  { %v2147_v19 = vadd.f32 %v3156_v25, %v4127_v56 }
 0x1bb   :  { %v3158_v41 = vpop.f32.mrf.mxu1  ;;  %v2262_v3 = vpop.f32.mrf.mxu0 }
 0x1bc   :  { %v2252_v45 = vadd.f32 %v2251_v63, %v2147_v19  ;;  %v3159_v13 = vadd.f32 %v3158_v41, %v3157_v43 }
 0x1bd   :  { %v3160_v38 = vpop.f32.mrf.mxu1  ;;  %v3236_v0 = vpop.f32.mrf.mxu0 }
 0x1be   :  { %v2150_v52 = vadd.f32 %v3159_v13, %v4130_v2  ;;  %v2340_v48 = vmul.f32 0.01, %v2252_v45  ;;  %vm2322_vm2 = vcmp.ge.f32.partialorder %v2252_v45, 0.0 }
 0x1bf   :  { %v3161_v32 = vpop.f32.mrf.mxu1  ;;  %v2267_v50 = vpop.f32.mrf.mxu0 }
 0x1c0   :  { %v2255_v16 = vadd.f32 %v2254_v57, %v2150_v52  ;;  %v3162_v36 = vadd.f32 %v3161_v32, %v3160_v38  ;;  %v2358_v29 = vsel %vm2322_vm2, %v2252_v45, %v2340_v48 }
 0x1c1   :  { %v3163_v47 = vpop.f32.mrf.mxu1  ;;  %v3239_v55 = vpop.f32.mrf.mxu0 }
 0x1c2   :  { %vm2323_vm3 = vcmp.ge.f32.partialorder %v2255_v16, 0.0  ;;  %v2341_v22 = vmul.f32 0.01, %v2255_v16  ;;  %v2155_v56 = vadd.f32 %v3162_v36, %v4133_v51 }
 0x1c3   :  { %v3164_v44 = vpop.f32.mrf.mxu1  ;;  %v2270_v61 = vpop.f32.mrf.mxu0 }
 0x1c4   :  { %v2359_v1 = vsel %vm2323_vm3, %v2255_v16, %v2341_v22  ;;  %v2260_v60 = vadd.f32 %v2259_v34, %v2155_v56  ;;  %v3165_v42 = vadd.f32 %v3164_v44, %v3163_v47 }
 0x1c5   :  { %v2738_v5 = vpack.c.bf16 %v2359_v1, %v2358_v29  ;;  %v3166_v2 = vpop.f32.mrf.mxu1  ;;  %v3240_v53 = vpop.f32.mrf.mxu0 }
 0x1c6   :  { %v2158_v4 = vadd.f32 %v3165_v42, %v4136_v37  ;;  %v2342_v6 = vmul.f32 0.01, %v2260_v60  ;;  %vm2324_vm4 = vcmp.ge.f32.partialorder %v2260_v60, 0.0 }
 0x1c7   :  { %2739 = vst [vmem:[%s4228_s3] sm:$0xff] %v2738_v5   ;;  %v3167_v46 = vpop.f32.mrf.mxu1  ;;  %v2275_v9 = vpop.f32.mrf.mxu0 }
 0x1c8   :  { %v2263_v14 = vadd.f32 %v2262_v3, %v2158_v4  ;;  %v3168_v51 = vadd.f32 %v3167_v46, %v3166_v2  ;;  %v2360_v24 = vsel %vm2324_vm4, %v2260_v60, %v2342_v6 }
 0x1c9   :  { %v3169_v15 = vpop.f32.mrf.mxu1  ;;  %v3243_v63 = vpop.f32.mrf.mxu0 }
 0x1ca   :  { %vm2325_vm5 = vcmp.ge.f32.partialorder %v2263_v14, 0.0  ;;  %v2343_v20 = vmul.f32 0.01, %v2263_v14  ;;  %v2163_v59 = vadd.f32 %v3168_v51, %v4139_v35 }
 0x1cb   :  { %v3170_v23 = vpop.f32.mrf.mxu1  ;;  %v2278_v18 = vpop.f32.mrf.mxu0 }
 0x1cc   :  { %v2361_v37 = vsel %vm2325_vm5, %v2263_v14, %v2343_v20  ;;  %v2268_v57 = vadd.f32 %v2267_v50, %v2163_v59  ;;  %v3171_v26 = vadd.f32 %v3170_v23, %v3169_v15 }
 0x1cd   :  { %v2743_v31 = vpack.c.bf16 %v2361_v37, %v2360_v24  ;;  %v3172_v7 = vpop.f32.mrf.mxu1  ;;  %v3244_v21 = vpop.f32.mrf.mxu0 }
 0x1ce   :  { %v2166_v30 = vadd.f32 %v3171_v26, %v4142_v27  ;;  %v2344_v43 = vmul.f32 0.01, %v2268_v57  ;;  %vm2326_vm6 = vcmp.ge.f32.partialorder %v2268_v57, 0.0 }
 0x1cf   :  { %2780 = vst [vmem:[%s4228_s3 + $0x8] sm:$0xff] %v2743_v31   ;;  %v3173_v34 = vpop.f32.mrf.mxu1  ;;  %v2283_v25 = vpop.f32.mrf.mxu0 }
 0x1d0   :  { %v2271_v10 = vadd.f32 %v2270_v61, %v2166_v30  ;;  %v3174_v35 = vadd.f32 %v3173_v34, %v3172_v7  ;;  %v2362_v0 = vsel %vm2326_vm6, %v2268_v57, %v2344_v43 }
 0x1d1   :  { %v3175_v19 = vpop.f32.mrf.mxu1  ;;  %v3247_v41 = vpop.f32.mrf.mxu0 }
 0x1d2   :  { %vm2327_vm7 = vcmp.ge.f32.partialorder %v2271_v10, 0.0  ;;  %v2345_v3 = vmul.f32 0.01, %v2271_v10  ;;  %v2171_v45 = vadd.f32 %v3174_v35, %v4145_v54 }
 0x1d3   :  { %v3176_v13 = vpop.f32.mrf.mxu1  ;;  %v2286_v38 = vpop.f32.mrf.mxu0 }
 0x1d4   :  { %v2363_v27 = vsel %vm2327_vm7, %v2271_v10, %v2345_v3  ;;  %v2276_v52 = vadd.f32 %v2275_v9, %v2171_v45  ;;  %v3177_v32 = vadd.f32 %v3176_v13, %v3175_v19 }
 0x1d5   :  { %v2748_v50 = vpack.c.bf16 %v2363_v27, %v2362_v0  ;;  %v3178_v48 = vpop.f32.mrf.mxu1  ;;  %v3248_v16 = vpop.f32.mrf.mxu0 }
 0x1d6   :  { %v2174_v36 = vadd.f32 %v3177_v32, %v4148_v62  ;;  %v2346_v22 = vmul.f32 0.01, %v2276_v52  ;;  %vm2328_vm8 = vcmp.ge.f32.partialorder %v2276_v52, 0.0 }
 0x1d7   :  { %2781 = vst [vmem:[%s4228_s3 + $0x10] sm:$0xff] %v2748_v50   ;;  %v3179_v47 = vpop.f32.mrf.mxu1  ;;  %v2291_v55 = vpop.f32.mrf.mxu0 }
 0x1d8   :  { %v2279_v56 = vadd.f32 %v2278_v18, %v2174_v36  ;;  %v3180_v54 = vadd.f32 %v3179_v47, %v3178_v48  ;;  %v2364_v5 = vsel %vm2328_vm8, %v2276_v52, %v2346_v22 }
 0x1d9   :  { %v3181_v44 = vpop.f32.mrf.mxu1  ;;  %v3251_v61 = vpop.f32.mrf.mxu0 }
 0x1da   :  { %vm2329_vm9 = vcmp.ge.f32.partialorder %v2279_v56, 0.0  ;;  %v2347_v29 = vmul.f32 0.01, %v2279_v56  ;;  %v2179_v1 = vadd.f32 %v3180_v54, %v4151_v28 }
 0x1db   :  { %v3182_v60 = vpop.f32.mrf.mxu1  ;;  %v2294_v42 = vpop.f32.mrf.mxu0 }
 0x1dc   :  { %v2365_v62 = vsel %vm2329_vm9, %v2279_v56, %v2347_v29  ;;  %v2284_v2 = vadd.f32 %v2283_v25, %v2179_v1  ;;  %v3183_v53 = vadd.f32 %v3182_v60, %v3181_v44 }
 0x1dd   :  { %v2753_v4 = vpack.c.bf16 %v2365_v62, %v2364_v5  ;;  %v3184_v46 = vpop.f32.mrf.mxu1  ;;  %v3252_v9 = vpop.f32.mrf.mxu0 }
 0x1de   :  { %v2182_v6 = vadd.f32 %v3183_v53, %v4154_v12  ;;  %v2348_v15 = vmul.f32 0.01, %v2284_v2  ;;  %vm2330_vm10 = vcmp.ge.f32.partialorder %v2284_v2, 0.0 }
 0x1df   :  { %2782 = vst [vmem:[%s4228_s3 + $0x18] sm:$0xff] %v2753_v4   ;;  %v3185_v14 = vpop.f32.mrf.mxu1  ;;  %v2299_v51 = vpop.f32.mrf.mxu0 }
 0x1e0   :  { %v2287_v63 = vadd.f32 %v2286_v38, %v2182_v6  ;;  %v3186_v28 = vadd.f32 %v3185_v14, %v3184_v46  ;;  %v2366_v57 = vsel %vm2330_vm10, %v2284_v2, %v2348_v15 }
 0x1e1   :  { %v3187_v20 = vpop.f32.mrf.mxu1  ;;  %v3255_v59 = vpop.f32.mrf.mxu0 }
 0x1e2   :  { %vm2331_vm11 = vcmp.ge.f32.partialorder %v2287_v63, 0.0  ;;  %v2349_v23 = vmul.f32 0.01, %v2287_v63  ;;  %v2187_v18 = vadd.f32 %v3186_v28, %v4157_v33 }
 0x1e3   :  { %v3188_v24 = vpop.f32.mrf.mxu1  ;;  %v2302_v37 = vpop.f32.mrf.mxu0 }
 0x1e4   :  { %v2367_v12 = vsel %vm2331_vm11, %v2287_v63, %v2349_v23  ;;  %v2292_v26 = vadd.f32 %v2291_v55, %v2187_v18  ;;  %v3189_v31 = vadd.f32 %v3188_v24, %v3187_v20 }
 0x1e5   :  { %v2758_v7 = vpack.c.bf16 %v2367_v12, %v2366_v57  ;;  %v3190_v21 = vpop.f32.mrf.mxu1  ;;  %v3256_v30 = vpop.f32.mrf.mxu0 }
 0x1e6   :  { %v2190_v34 = vadd.f32 %v3189_v31, %v4160_v40  ;;  %v2350_v10 = vmul.f32 0.01, %v2292_v26  ;;  %vm2332_vm12 = vcmp.ge.f32.partialorder %v2292_v26, 0.0 }
 0x1e7   :  { %2783 = vst [vmem:[%s4228_s3 + $0x20] sm:$0xff] %v2758_v7   ;;  %v3191_v25 = vpop.f32.mrf.mxu1  ;;  %v2307_v43 = vpop.f32.mrf.mxu0 }
 0x1e8   :  { %v2295_v35 = vadd.f32 %v2294_v42, %v2190_v34  ;;  %v3192_v33 = vadd.f32 %v3191_v25, %v3190_v21  ;;  %v2368_v0 = vsel %vm2332_vm12, %v2292_v26, %v2350_v10 }
 0x1e9   :  { %v3193_v19 = vpop.f32.mrf.mxu1  ;;  %v3259_v41 = vpop.f32.mrf.mxu0 }
 0x1ea   :  { %vm2333_vm13 = vcmp.ge.f32.partialorder %v2295_v35, 0.0  ;;  %v2351_v3 = vmul.f32 0.01, %v2295_v35  ;;  %v2195_v45 = vadd.f32 %v3192_v33, %v4163_v49 }
 0x1eb   :  { %v3194_v13 = vpop.f32.mrf.mxu1  ;;  %v2310_v38 = vpop.f32.mrf.mxu0 }
 0x1ec   :  { %v2369_v40 = vsel %vm2333_vm13, %v2295_v35, %v2351_v3  ;;  %v2300_v27 = vadd.f32 %v2299_v51, %v2195_v45  ;;  %v3195_v52 = vadd.f32 %v3194_v13, %v3193_v19 }
 0x1ed   :  { %v2763_v32 = vpack.c.bf16 %v2369_v40, %v2368_v0  ;;  %v3196_v50 = vpop.f32.mrf.mxu1  ;;  %v3260_v48 = vpop.f32.mrf.mxu0 }
 0x1ee   :  { %v2198_v16 = vadd.f32 %v3195_v52, %v4166_v58  ;;  %v2352_v55 = vmul.f32 0.01, %v2300_v27  ;;  %vm2334_vm14 = vcmp.ge.f32.partialorder %v2300_v27, 0.0 }
 0x1ef   :  { %2784 = vst [vmem:[%s4228_s3 + $0x28] sm:$0xff] %v2763_v32   ;;  %v3197_v36 = vpop.f32.mrf.mxu1  ;;  %v2315_v47 = vpop.f32.mrf.mxu0 }
 0x1f0   :  { %v2303_v22 = vadd.f32 %v2302_v37, %v2198_v16  ;;  %v3198_v49 = vadd.f32 %v3197_v36, %v3196_v50  ;;  %v2370_v60 = vsel %vm2334_vm14, %v2300_v27, %v2352_v55 }
 0x1f1   :  { %v3199_v56 = vpop.f32.mrf.mxu1  ;;  %v3263_v54 = vpop.f32.mrf.mxu0 }
 0x1f2   :  { %vm2335_vm15 = vcmp.ge.f32.partialorder %v2303_v22, 0.0  ;;  %v2353_v44 = vmul.f32 0.01, %v2303_v22  ;;  %v2203_v61 = vadd.f32 %v3198_v49, %v4169_v8 }
 0x1f3   :  { %v3200_v29 = vpop.f32.mrf.mxu1  ;;  %v2318_v1 = vpop.f32.mrf.mxu0 }
 0x1f4   :  { %v2371_v58 = vsel %vm2335_vm15, %v2303_v22, %v2353_v44  ;;  %v2308_v42 = vadd.f32 %v2307_v43, %v2203_v61  ;;  %v3201_v5 = vadd.f32 %v3200_v29, %v3199_v56 }
 0x1f5   :  { %v2768_v62 = vpack.c.bf16 %v2371_v58, %v2370_v60  ;;  %v3202_v2 = vpop.f32.mrf.mxu1  ;;  %v3264_v53 = vpop.f32.mrf.mxu0 }
 0x1f6   :  { %v2206_v4 = vadd.f32 %v3201_v5, %v4172_v17  ;;  %v2354_v9 = vmul.f32 0.01, %v2308_v42  ;;  %vm2336_vm0 = vcmp.ge.f32.partialorder %v2308_v42, 0.0 }
 0x1f7   :  { %2785 = vst [vmem:[%s4228_s3 + $0x30] sm:$0xff] %v2768_v62   ;;  %v3203_v46 = vpop.f32.mrf.mxu1 }
 0x1f8   :  { %v2311_v6 = vadd.f32 %v2310_v38, %v2206_v4  ;;  %v3204_v14 = vadd.f32 %v3203_v46, %v3202_v2  ;;  %v2372_v28 = vsel %vm2336_vm0, %v2308_v42, %v2354_v9 }
 0x1f9   :  { %v3205_v8 = vpop.f32.mrf.mxu1 }
 0x1fa   :  { %vm2337_vm1 = vcmp.ge.f32.partialorder %v2311_v6, 0.0  ;;  %v2355_v51 = vmul.f32 0.01, %v2311_v6  ;;  %v2211_v15 = vadd.f32 %v3204_v14, %v4175_v11 }
 0x1fb   :  { %v3206_v63 = vpop.f32.mrf.mxu1 }
 0x1fc   :  { %v2373_v20 = vsel %vm2337_vm1, %v2311_v6, %v2355_v51  ;;  %v2316_v59 = vadd.f32 %v2315_v47, %v2211_v15  ;;  %v3207_v23 = vadd.f32 %v3206_v63, %v3205_v8 }
 0x1fd   :  { %v2773_v17 = vpack.c.bf16 %v2373_v20, %v2372_v28 }
 0x1fe   :  { %v2214_v18 = vadd.f32 %v3207_v23, %v4178_v39  ;;  %v2356_v24 = vmul.f32 0.01, %v2316_v59  ;;  %vm2338_vm2 = vcmp.ge.f32.partialorder %v2316_v59, 0.0 }
 0x1ff   :  { %2786 = vst [vmem:[%s4228_s3 + $0x38] sm:$0xff] %v2773_v17  }
 0x200   :  { %v2319_v37 = vadd.f32 %v2318_v1, %v2214_v18  ;;  %v2374_v12 = vsel %vm2338_vm2, %v2316_v59, %v2356_v24 }
 0x202   :  { %vm2339_vm3 = vcmp.ge.f32.partialorder %v2319_v37, 0.0  ;;  %v2357_v57 = vmul.f32 0.01, %v2319_v37 }
 0x204   :  { %v2375_v26 = vsel %vm2339_vm3, %v2319_v37, %v2357_v57 }
 0x205   :  { %v2778_v11 = vpack.c.bf16 %v2375_v26, %v2374_v12 }
 0x207   :  { %2787 = vst [vmem:[%s4228_s3 + $0x40] sm:$0xff] %v2778_v11  }
 0x208   :  { %2470 = vsyncpa [#allocation3], 1 }
 0x209   :  { %2471 = vsyncpa [#allocation5], 1 }

// kernel: net_forward.7
= control target key start
LH: loop header
LB: loop body
LE: loop exit
PB: predicated region body
PF: predicated region fallthrough
CT: control target
= control target key end

     0   :  { %s1197_s1 = inlined_call_operand.vmem [shape: bf16[1024,128], index: 1, kind: input, shape index: {}]   ;;  %s1198_s0 = inlined_call_operand.vmem [shape: bf16[8,1024], index: 0, kind: input, shape index: {}]   ;;  %s1199_s2 = inlined_call_operand.vmem [shape: f32[1,128], index: 2, kind: input, shape index: {}]   ;;  %s1200_s3 = inlined_call_operand.vmem [shape: f32[8,128], index: 3, kind: output, shape index: {}]  }
   0x1   :  { %v895_v0 = vld [vmem:[%s1197_s1 + $0x78] sm:$0xff]   ;;  %v899_v4 = vld [vmem:[%s1197_s1 + $0x70] sm:$0xff]   ;;  %v903_v8 = vld [vmem:[%s1197_s1 + $0x68] sm:$0xff]  }
   0x2   :  { %v896_v1 = vld [vmem:[%s1197_s1 + $0xf8] sm:$0xff]   ;;  %807 = vmatprep.subr.bf16.mxu0 %v895_v0  ;;  %v900_v5 = vld [vmem:[%s1197_s1 + $0xf0] sm:$0xff]   ;;  %v904_v9 = vld [vmem:[%s1197_s1 + $0xe8] sm:$0xff]  }
   0x3   :  { %v897_v2 = vld [vmem:[%s1197_s1 + $0x38] sm:$0xff]   ;;  %829 = vmatprep.subr.bf16.mxu1 %v896_v1  ;;  %v901_v6 = vld [vmem:[%s1197_s1 + $0x30] sm:$0xff]   ;;  %v905_v10 = vld [vmem:[%s1197_s1 + $0x28] sm:$0xff]  }
   0x4   :  { %v898_v3 = vld [vmem:[%s1197_s1 + $0xb8] sm:$0xff]   ;;  %808 = vmatpush3.bf16.msra.mxu0 %v897_v2  ;;  %v902_v7 = vld [vmem:[%s1197_s1 + $0xb0] sm:$0xff]   ;;  %v906_v11 = vld [vmem:[%s1197_s1 + $0xa8] sm:$0xff]  }
   0x5   :  { %830 = vmatpush3.bf16.msra.mxu1 %v898_v3  ;;  %809 = vmatprep.subr.bf16.mxu0 %v899_v4  ;;  %v907_v12 = vld [vmem:[%s1197_s1 + $0x60] sm:$0xff]   ;;  %v911_v16 = vld [vmem:[%s1197_s1 + $0x58] sm:$0xff]   ;;  %v915_v20 = vld [vmem:[%s1197_s1 + $0x50] sm:$0xff]  }
   0x6   :  { %831 = vmatprep.subr.bf16.mxu1 %v900_v5  ;;  %v908_v13 = vld [vmem:[%s1197_s1 + $0xe0] sm:$0xff]   ;;  %v912_v17 = vld [vmem:[%s1197_s1 + $0xd8] sm:$0xff]   ;;  %v916_v21 = vld [vmem:[%s1197_s1 + $0xd0] sm:$0xff]  }
   0x7   :  { %v909_v14 = vld [vmem:[%s1197_s1 + $0x20] sm:$0xff]   ;;  %v913_v18 = vld [vmem:[%s1197_s1 + $0x18] sm:$0xff]   ;;  %v917_v22 = vld [vmem:[%s1197_s1 + $0x10] sm:$0xff]  }
   0x8   :  { %810 = vmatpush3.bf16.msra.mxu0 %v901_v6  ;;  %v910_v15 = vld [vmem:[%s1197_s1 + $0xa0] sm:$0xff]   ;;  %v914_v19 = vld [vmem:[%s1197_s1 + $0x98] sm:$0xff]   ;;  %v918_v23 = vld [vmem:[%s1197_s1 + $0x90] sm:$0xff]  }
   0x9   :  { %832 = vmatpush3.bf16.msra.mxu1 %v902_v7  ;;  %811 = vmatprep.subr.bf16.mxu0 %v903_v8  ;;  %v919_v24 = vld [vmem:[%s1197_s1 + $0x48] sm:$0xff]   ;;  %v923_v28 = vld [vmem:[%s1197_s1 + $0x40] sm:$0xff]   ;;  %v931_v38 = vld [vmem:[%s1197_s1 + $0x178] sm:$0xff]  }
   0xa   :  { %833 = vmatprep.subr.bf16.mxu1 %v904_v9  ;;  %v920_v25 = vld [vmem:[%s1197_s1 + $0xc8] sm:$0xff]   ;;  %v924_v29 = vld [vmem:[%s1197_s1 + $0xc0] sm:$0xff]   ;;  %v932_v39 = vld [vmem:[%s1197_s1 + $0x1f8] sm:$0xff]  }
   0xb   :  { %v921_v26 = vld [vmem:[%s1197_s1 + $0x8] sm:$0xff]   ;;  %v925_v30 = vld [vmem:[%s1197_s1] sm:$0xff]   ;;  %v933_v40 = vld [vmem:[%s1197_s1 + $0x138] sm:$0xff]  }
   0xc   :  { %812 = vmatpush3.bf16.msra.mxu0 %v905_v10  ;;  %v922_v27 = vld [vmem:[%s1197_s1 + $0x88] sm:$0xff]   ;;  %v926_v31 = vld [vmem:[%s1197_s1 + $0x80] sm:$0xff]   ;;  %v934_v41 = vld [vmem:[%s1197_s1 + $0x1b8] sm:$0xff]  }
   0xd   :  { %834 = vmatpush3.bf16.msra.mxu1 %v906_v11  ;;  %813 = vmatprep.subr.bf16.mxu0 %v907_v12  ;;  %v15_v32 = vld [vmem:[%s1198_s0] sm:$0xff]  ;;  %v16_v33 = vld [vmem:[%s1198_s0 + $0x8] sm:$0xff]  ;;  %v935_v42 = vld [vmem:[%s1197_s1 + $0x170] sm:$0xff]  }
   0xe   :  { %835 = vmatprep.subr.bf16.mxu1 %v908_v13  ;;  %v735_v34 = vcombine.low %v15_v32, %v15_v32  ;;  %v736_v35 = vcombine.high %v15_v32, %v15_v32  ;;  %v737_v36 = vcombine.low %v16_v33, %v16_v33  ;;  %v738_v37 = vcombine.high %v16_v33, %v16_v33  ;;  %v936_v43 = vld [vmem:[%s1197_s1 + $0x1f0] sm:$0xff]   ;;  %v939_v46 = vld [vmem:[%s1197_s1 + $0x168] sm:$0xff]   ;;  %v943_v50 = vld [vmem:[%s1197_s1 + $0x160] sm:$0xff]  }
   0xf   :  { %v937_v44 = vld [vmem:[%s1197_s1 + $0x130] sm:$0xff]   ;;  %v940_v47 = vld [vmem:[%s1197_s1 + $0x1e8] sm:$0xff]   ;;  %v944_v51 = vld [vmem:[%s1197_s1 + $0x1e0] sm:$0xff]  }
  0x10   :  { %814 = vmatpush3.bf16.msra.mxu0 %v909_v14  ;;  %598 = vmatprep.mubr.bf16.mxu0 %v736_v35  ;;  %v938_v45 = vld [vmem:[%s1197_s1 + $0x1b0] sm:$0xff]   ;;  %v941_v48 = vld [vmem:[%s1197_s1 + $0x128] sm:$0xff]   ;;  %v945_v52 = vld [vmem:[%s1197_s1 + $0x120] sm:$0xff]  }
  0x11   :  { %836 = vmatpush3.bf16.msra.mxu1 %v910_v15  ;;  %815 = vmatprep.subr.bf16.mxu0 %v911_v16  ;;  %v942_v49 = vld [vmem:[%s1197_s1 + $0x1a8] sm:$0xff]   ;;  %v946_v53 = vld [vmem:[%s1197_s1 + $0x1a0] sm:$0xff]   ;;  %v947_v54 = vld [vmem:[%s1197_s1 + $0x158] sm:$0xff]  }
  0x12   :  { %837 = vmatprep.subr.bf16.mxu1 %v912_v17  ;;  %638 = vmatprep.mubr.bf16.mxu1 %v738_v37  ;;  %v948_v55 = vld [vmem:[%s1197_s1 + $0x1d8] sm:$0xff]   ;;  %v951_v58 = vld [vmem:[%s1197_s1 + $0x150] sm:$0xff]   ;;  %v955_v62 = vld [vmem:[%s1197_s1 + $0x148] sm:$0xff]  }
  0x13   :  { %v949_v56 = vld [vmem:[%s1197_s1 + $0x118] sm:$0xff]   ;;  %v952_v59 = vld [vmem:[%s1197_s1 + $0x1d0] sm:$0xff]   ;;  %v956_v63 = vld [vmem:[%s1197_s1 + $0x1c8] sm:$0xff]  }
  0x14   :  { %816 = vmatpush3.bf16.msra.mxu0 %v913_v18  ;;  %v950_v57 = vld [vmem:[%s1197_s1 + $0x198] sm:$0xff]   ;;  %v953_v60 = vld [vmem:[%s1197_s1 + $0x110] sm:$0xff]   ;;  %v957_v0 = vld [vmem:[%s1197_s1 + $0x108] sm:$0xff]  }
  0x15   :  { %838 = vmatpush3.bf16.msra.mxu1 %v914_v19  ;;  %817 = vmatprep.subr.bf16.mxu0 %v915_v20  ;;  %v954_v61 = vld [vmem:[%s1197_s1 + $0x190] sm:$0xff]   ;;  %v958_v1 = vld [vmem:[%s1197_s1 + $0x188] sm:$0xff]   ;;  %v959_v2 = vld [vmem:[%s1197_s1 + $0x140] sm:$0xff]  }
  0x16   :  { %839 = vmatprep.subr.bf16.mxu1 %v916_v21  ;;  %v960_v3 = vld [vmem:[%s1197_s1 + $0x1c0] sm:$0xff]   ;;  %v17_v6 = vld [vmem:[%s1198_s0 + $0x10] sm:$0xff]  ;;  %v18_v9 = vld [vmem:[%s1198_s0 + $0x18] sm:$0xff] }
  0x17   :  { %v961_v4 = vld [vmem:[%s1197_s1 + $0x100] sm:$0xff]   ;;  %v739_v7 = vcombine.low %v17_v6, %v17_v6  ;;  %v740_v8 = vcombine.high %v17_v6, %v17_v6  ;;  %v741_v10 = vcombine.low %v18_v9, %v18_v9  ;;  %v742_v11 = vcombine.high %v18_v9, %v18_v9 }
  0x18   :  { %818 = vmatpush3.bf16.msra.mxu0 %v917_v22  ;;  %v962_v5 = vld [vmem:[%s1197_s1 + $0x180] sm:$0xff]  }
  0x19   :  { %840 = vmatpush3.bf16.msra.mxu1 %v918_v23  ;;  %819 = vmatprep.subr.bf16.mxu0 %v919_v24  ;;  %v734_v21 = vld [vmem:[%s1199_s2] ss:$0 sm:$0xff] }
  0x1a   :  { %841 = vmatprep.subr.bf16.mxu1 %v920_v25 }
  0x1c   :  { %820 = vmatpush3.bf16.msra.mxu0 %v921_v26 }
  0x1d   :  { %842 = vmatpush3.bf16.msra.mxu1 %v922_v27  ;;  %821 = vmatprep.subr.bf16.mxu0 %v923_v28 }
  0x1e   :  { %843 = vmatprep.subr.bf16.mxu1 %v924_v29 }
  0x20   :  { %822 = vmatpush3.bf16.msra.mxu0 %v925_v30 }
  0x21   :  { %844 = vmatpush3.bf16.msra.mxu1 %v926_v31  ;;  %851 = vmatprep.subr.bf16.mxu0 %v931_v38 }
  0x22   :  { %873 = vmatprep.subr.bf16.mxu1 %v932_v39 }
  0x23   :  { %599 = vmatmul.mubr.bf16.vlgmr.msra.gmra.mxu0 %v735_v34 }
  0x24   :  { %639 = vmatmul.mubr.bf16.vlgmr.msra.gmra.mxu1 %v737_v36  ;;  %852 = vmatpush3.bf16.msra.mxu0 %v933_v40 }
  0x25   :  { %874 = vmatpush3.bf16.msra.mxu1 %v934_v41  ;;  %853 = vmatprep.subr.bf16.mxu0 %v935_v42 }
  0x26   :  { %875 = vmatprep.subr.bf16.mxu1 %v936_v43  ;;  %678 = vmatprep.mubr.bf16.mxu0 %v740_v8 }
  0x27   :  { %718 = vmatprep.mubr.bf16.mxu1 %v742_v11 }
  0x28   :  { %854 = vmatpush3.bf16.msra.mxu0 %v937_v44 }
  0x29   :  { %876 = vmatpush3.bf16.msra.mxu1 %v938_v45  ;;  %855 = vmatprep.subr.bf16.mxu0 %v939_v46 }
  0x2a   :  { %877 = vmatprep.subr.bf16.mxu1 %v940_v47 }
  0x2c   :  { %856 = vmatpush3.bf16.msra.mxu0 %v941_v48 }
  0x2d   :  { %878 = vmatpush3.bf16.msra.mxu1 %v942_v49  ;;  %857 = vmatprep.subr.bf16.mxu0 %v943_v50 }
  0x2e   :  { %879 = vmatprep.subr.bf16.mxu1 %v944_v51 }
  0x30   :  { %858 = vmatpush3.bf16.msra.mxu0 %v945_v52 }
  0x31   :  { %880 = vmatpush3.bf16.msra.mxu1 %v946_v53  ;;  %859 = vmatprep.subr.bf16.mxu0 %v947_v54 }
  0x32   :  { %881 = vmatprep.subr.bf16.mxu1 %v948_v55 }
  0x34   :  { %860 = vmatpush3.bf16.msra.mxu0 %v949_v56 }
  0x35   :  { %882 = vmatpush3.bf16.msra.mxu1 %v950_v57  ;;  %861 = vmatprep.subr.bf16.mxu0 %v951_v58 }
  0x36   :  { %883 = vmatprep.subr.bf16.mxu1 %v952_v59 }
  0x38   :  { %862 = vmatpush3.bf16.msra.mxu0 %v953_v60 }
  0x39   :  { %884 = vmatpush3.bf16.msra.mxu1 %v954_v61  ;;  %863 = vmatprep.subr.bf16.mxu0 %v955_v62 }
  0x3a   :  { %885 = vmatprep.subr.bf16.mxu1 %v956_v63 }
  0x3c   :  { %864 = vmatpush3.bf16.msra.mxu0 %v957_v0 }
  0x3d   :  { %886 = vmatpush3.bf16.msra.mxu1 %v958_v1  ;;  %865 = vmatprep.subr.bf16.mxu0 %v959_v2 }
  0x3e   :  { %887 = vmatprep.subr.bf16.mxu1 %v960_v3 }
  0x40   :  { %866 = vmatpush3.bf16.msra.mxu0 %v961_v4 }
  0x41   :  { %888 = vmatpush3.bf16.msra.mxu1 %v962_v5 }
  0x43   :  { %679 = vmatmul.mubr.bf16.vlgmr.msra.gmra.mxu0 %v739_v7 }
  0x44   :  { %719 = vmatmul.mubr.bf16.vlgmr.msra.gmra.mxu1 %v741_v10 }
  0xe3   :  { %v823_v12 = vpop.f32.mrf.mxu0 }
  0xe4   :  { %v845_v13 = vpop.f32.mrf.mxu1 }
  0xe5   :  { %v824_v14 = vpop.f32.mrf.mxu0 }
  0xe6   :  { %v846_v15 = vpop.f32.mrf.mxu1  ;;  %v825_v20 = vadd.f32 %v824_v14, %v823_v12 }
  0xe7   :  { %v826_v16 = vpop.f32.mrf.mxu0  ;;  %v847_v23 = vadd.f32 %v846_v15, %v845_v13 }
  0xe8   :  { %v848_v17 = vpop.f32.mrf.mxu1  ;;  %v601_v22 = vadd.f32 %v825_v20, %v734_v21 }
  0xe9   :  { %v827_v18 = vpop.f32.mrf.mxu0 }
  0xea   :  { %v849_v19 = vpop.f32.mrf.mxu1  ;;  %v641_v28 = vadd.f32 %v847_v23, %v601_v22 }
 0x103   :  { %v867_v24 = vpop.f32.mrf.mxu0 }
 0x104   :  { %v889_v25 = vpop.f32.mrf.mxu1 }
 0x105   :  { %v868_v26 = vpop.f32.mrf.mxu0 }
 0x106   :  { %v890_v27 = vpop.f32.mrf.mxu1  ;;  %v869_v29 = vadd.f32 %v868_v26, %v867_v24 }
 0x107   :  { %v870_v30 = vpop.f32.mrf.mxu0  ;;  %v891_v33 = vadd.f32 %v890_v27, %v889_v25 }
 0x108   :  { %v892_v31 = vpop.f32.mrf.mxu1  ;;  %v681_v32 = vadd.f32 %v869_v29, %v641_v28 }
 0x109   :  { %v871_v34 = vpop.f32.mrf.mxu0 }
 0x10a   :  { %v893_v35 = vpop.f32.mrf.mxu1  ;;  %v721_v36 = vadd.f32 %v891_v33, %v681_v32 }
 0x10c   :  { %vm726_vm0 = vcmp.ge.f32.partialorder %v721_v36, 0.0  ;;  %v727_v37 = vmul.f32 0.01, %v721_v36 }
 0x10e   :  { %v728_v38 = vsel %vm726_vm0, %v721_v36, %v727_v37 }
 0x10f   :  { %729 = vst [vmem:[%s1200_s3] sm:$0xff] %v728_v38 }

// kernel: net_forward.6
= control target key start
LH: loop header
LB: loop body
LE: loop exit
PB: predicated region body
PF: predicated region fallthrough
CT: control target
= control target key end

     0   :  { %s6088_s0 = inlined_call_operand.vmem [shape: bf16[8,8960], index: 0, kind: input, shape index: {}]   ;;  %s6089_s1 = inlined_call_operand.hbm [shape: bf16[8960,1024], index: 1, kind: input, shape index: {}]   ;;  %s6090_s2 = inlined_call_operand.hbm [shape: f32[1,1024], index: 2, kind: input, shape index: {}]   ;;  %s6091_s3 = inlined_call_operand.vmem [shape: bf16[8,1024], index: 3, kind: output, shape index: {}]  }
   0x1   :  { %6092 = sst [smem:[#allocation9_spill]] %s6088_s0 }
   0x2   :  { %6093 = sst [smem:[#allocation10_spill]] %s6089_s1 }
   0x3   :  { %6094 = sst [smem:[#allocation11_spill]] %s6091_s3 }
   0x4   :  { %8 = vsyncpa [#allocation4], 0 }
   0x5   :  { %10 = vsyncpa [#allocation4 + $0x1], 0 }
   0x6   :  { %11 = vsyncpa [#allocation6], 0 }
   0x7   :  { %13 = vsyncpa [#allocation6 + $0x1], 0  ;;  %s5292_s12 = smov 0   ;;  %s5294_s13 = smov 0  }
   0x8   :  { %s5296_s14 = smov 0   ;;  %s5298_s15 = smov 0  }
   0x9   :  { %s5300_s16 = smov 0   ;;  %s5302_s17 = smov 0  }
   0xa   :  { %s5304_s18 = smov 0   ;;  %s5306_s19 = smov 0  }
   0xb   :  { %s5308_s20 = smov 0   ;;  %s5310_s21 = smov 0  }
   0xc   :  { %s5312_s22 = smov 0  }
   0xd LB: > { %s31_s23 = sadd.s32 1, %s5256_s20  ;;  %p82_p1 = scmp.ne.s32.totalorder %s5244_s17, %s5240_s16  ;;  %s5264_s22 = sphi %s5312_s22, %s19_s22   ;;  %s5260_s21 = sphi %s5310_s21, %s6117_s21   ;;  %s5256_s20 = sphi %s5308_s20, %s6116_s20   ;;  %s5252_s19 = sphi %s5306_s19, %s6115_s19   ;;  %s5248_s18 = sphi %s5304_s18, %s6114_s18   ;;  %s5244_s17 = sphi %s5302_s17, %s6113_s17   ;;  %s5240_s16 = sphi %s5300_s16, %s6112_s16   ;;  %s5236_s15 = sphi %s5298_s15, %s6111_s15   ;;  %s5232_s14 = sphi %s5296_s14, %s6110_s14   ;;  %s5228_s13 = sphi %s5294_s13, %s6109_s13   ;;  %s5224_s12 = sphi %s5292_s12, %s6108_s12  }
   0xe   : > { %p5349_p0 = scmp.ge.s32.totalorder %s31_s23, 5  ;;  %p83_p2 = scmp.eq.s32.totalorder %s5264_s22, 0 }
   0xf   : > { %p4335_p4 = scmp.lt.s32.totalorder %s5264_s22, 10  ;;  %s179_s27 = sand.u32 1, %s5244_s17  }
  0x10   : > { %s6119_s23 = smov (%p5349_p0, %s31_s23), 0  ;;  %p84_p3 = por %p83_p2, %p82_p1 }
  0x11   : > { %s4322_s28 = smul.u32 3584, %s179_s27  ;;  %s3839_s29 = sshll.u32 %s5260_s21, 2 }
  0x12   : > { %s4318_s30 = smul.u32 1792, %s5256_s20  ;;  %p5370_p5 = pnand %p4335_p4, %p84_p3 }
  0x13   : > { %s183_s6 = scalar_lea.vmem [#allocation3], %s4322_s28  ;;  %s6097_s1 = sld [smem:[#allocation10_spill]] }
  0x14   : > { %s190_s5 = sadd.s32 %s4318_s30, %s3839_s29  ;;  %s193_s7 = sshll.u32 %s183_s6, 4  ;;  %s194_s7 = int_to_ptr.vmem [resolvable:$true] %s193_s7 }
  0x15   : > { %s3841_s8 = sshll.u32 %s190_s5, 6  ;;  %p3845_p6 = scmp.ge.s32.totalorder %s5264_s22, 1 }
  0x16   : > { %s180_s24 = scalar_lea.sflag [#allocation4], %s179_s27  ;;  %p5116_p7 = pneg %p5370_p5 }
  0x17   : > { %s5127_s26 = scalar_lea.vmem %s194_s7, 57344  ;;  %s5266_s0 = smov [#allocation3]  }
  0x18   : > { %p5128_p8 = scmp.ne.s32.totalorder %s194_s7, %s5127_s26  ;;  %s5132_s3 = sshll.u32 %s5266_s0, 4  ;;  %s5133_s3 = int_to_ptr.vmem [resolvable:$false] %s5132_s3 }
  0x19   : > { %s192_s11 = scalar_lea.hbm %s6097_s1, %s3841_s8  ;;  %s5134_s29 = scalar_lea.vmem %s5133_s3, 114688 }
  0x1a   : > { %p5130_p9 = pnand %p5128_p8, %p5116_p7  ;;  %p5135_p11 = scmp.lt.s32.totalorder %s194_s7, %s5133_s3 }
  0x1b   : > { %p5136_p12 = scmp.lt.s32.totalorder %s5134_s29, %s5127_s26 }
  0x1c   : > { %p5131_p10 = pneg %p5130_p9 }
  0x1d   : > { %p5137_p13 = por %p5136_p12, %p5135_p11 }
  0x1f   : > { %p5138_p1 = pnand %p5137_p13, %p5131_p10 }
  0x21   : > { %5141 = shalt.err (!%p5138_p1)
}
  0x22   : > { %s5267_s28 = smov 512   ;;  %s5268_s0 = smov 256  }
  0x23   : > { %s5269_s3 = smov 16   ;;  %p220_p3 = scmp.lt.s32.totalorder %s5264_s22, 11 }
  0x24   : > { %4331 = dma.hbm_to_vmem [thread:$0]  (!%p5370_p5), %s192_s11, 57344, %s194_s7, %s180_s24, %s5267_s28, %s5268_s0, %s5269_s3  }
  0x25   : > { %p5385_p7 = pnand %p3845_p6, %p220_p3  ;;  %s3835_s27 = sadd.s32 4294967295, %s5264_s22  }
  0x26   : > { %s34_s30 = sadd.s32 1, %s5260_s21  ;;  %p88_p8 = scmp.ne.s32.totalorder %s5240_s16, %s5236_s15 }
  0x27   : > { %s6121_s30 = smov (!%p5349_p0, %s34_s30), %s5260_s21  ;;  %p5396_p9 = scmp.eq.s32.totalorder %s3835_s27, 0 }
  0x28   : > { %p36_p5 = scmp.ge.s32.totalorder %s6121_s30, 2  ;;  %s101_s24 = sadd.s32 1, %s5232_s14 }
  0x29   : > { %p5403_p6 = por %p5396_p9, %p88_p8  ;;  %p108_p10 = scmp.ne.s32.totalorder %s5232_s14, %s5228_s13 }
  0x2a   : > { %s6123_s30 = smov (%p36_p5, %s6121_s30), 0  ;;  %p114_p11 = scmp.ne.s32.totalorder %s5228_s13, %s5224_s12 }
  0x2b   : > { %p5413_p0 = por %p108_p10, %p83_p2  ;;  %s71_s25 = ssub.s32 %s5260_s21, %s6123_s30 }
  0x2c   : > { %s203_s6 = sand.u32 1, %s5232_s14   ;;  %s6102_s7 = ssub.s32 %s5256_s20, %s6119_s23 }
  0x2d   : > { %s72_s8 = sor.u32 %s71_s25, %s6102_s7  ;;  %p99_p12 = scmp.eq.s32.totalorder %s71_s25, 0 }
  0x2e   : > { %p73_p13 = scmp.eq.s32.totalorder %s72_s8, 0  ;;  %p5427_p1 = por %p114_p11, %p5396_p9 }
  0x2f   : > { %s5432_s10 = scalar_select %p99_p12, %s5232_s14, %s101_s24  }
  0x30   : > { %s6104_s11 = sadd.s32 1, %s5244_s17  ;;  %s3842_s28 = sshll.u32 %s203_s6, 2 }
  0x31   : > { %s5437_s29 = scalar_select %p73_p13, %s5244_s17, %s6104_s11  }
  0x32   : > { %s4319_s0 = sshll.u32 %s5260_s21, 6  ;;  %s207_s1 = scalar_lea.vmem [#allocation5], %s3842_s28 }
  0x33   : > { %s213_s27 = scalar_lea.hbm %s6090_s2, %s4319_s0  ;;  %s215_s7 = sshll.u32 %s207_s1, 4  ;;  %s216_s7 = int_to_ptr.vmem [resolvable:$true] %s215_s7 }
  0x34   : > { %p5447_p2 = pnand %p4335_p4, %p5413_p0  ;;  %s204_s24 = scalar_lea.sflag [#allocation6], %s203_s6 }
  0x35   : > { %s5155_s25 = scalar_lea.vmem %s216_s7, 64  ;;  %s5270_s8 = smov [#allocation5]  }
  0x36   : > { %p5144_p3 = pneg %p5447_p2  ;;  %p5156_p8 = scmp.ne.s32.totalorder %s216_s7, %s5155_s25 }
  0x37   : > { %s5160_s11 = sshll.u32 %s5270_s8, 4  ;;  %s5161_s11 = int_to_ptr.vmem [resolvable:$false] %s5160_s11 }
  0x38   : > { %p5158_p9 = pnand %p5156_p8, %p5144_p3  ;;  %s5162_s28 = scalar_lea.vmem %s5161_s11, 128 }
  0x39   : > { %p5163_p10 = scmp.lt.s32.totalorder %s216_s7, %s5161_s11  ;;  %p5164_p11 = scmp.lt.s32.totalorder %s5162_s28, %s5155_s25 }
  0x3a   : > { %p5159_p5 = pneg %p5158_p9 }
  0x3b   : > { %p5165_p12 = por %p5164_p11, %p5163_p10 }
  0x3d   : > { %p5166_p13 = pnand %p5165_p12, %p5159_p5 }
  0x3f   : > { %5169 = shalt.err (!%p5166_p13)
}
  0x40   : > { %4334 = dma.hbm_to_vmem [thread:$0]  (!%p5447_p2), %s213_s27, 64, %s216_s7, %s204_s24  }
  0x41   : > { %224 = sbr.rel (%p5385_p7) target bundleno = 752 (0x2f0), region = 32  ;;  %s226_s1 = sand.u32 (!%p5385_p7), 1, %s5240_s16  }
  0x42   : > { %s4323_s15 = smul.u32 (!%p5385_p7), 3584, %s226_s1  ;;  %s227_s6 = scalar_lea.sflag (!%p5385_p7), [#allocation4], %s226_s1 }
  0x44   : > { %s5458_s0 = scalar_lea.vmem (!%p5385_p7), [#allocation3], %s4323_s15 }
  0x46   : > { %5215 = dma.done.wait (%p5403_p6), %s227_s6, 57344  }
  0x47   : > { %5217 = vsyncadd (%p5403_p6), %s227_s6, 4294909952  ;;  %s235_s3 = sand.u32 1, %s5228_s13  }
  0x48   : > { %s5465_s12 = sshll.u32 %s235_s3, 2  ;;  %s236_s26 = scalar_lea.sflag [#allocation6], %s235_s3 }
  0x49   : > { %s239_s27 = scalar_lea.vmem [#allocation5], %s5465_s12 }
  0x4a   : > { %5219 = dma.done.wait (%p5427_p1), %s236_s26, 64  }
  0x4b   : > { %5221 = vsyncadd (%p5427_p1), %s236_s26, 4294967232  ;;  %s280_s7 = smul.u32 14, %s5248_s18  ;;  %s3848_s4 = sshll.u32 %s5252_s19, 2 }
  0x4c   : > { %p296_p4 = scmp.lt.s32.totalorder %s3848_s4, 7  ;;  %s6106_s11 = sld [smem:[#allocation11_spill]] }
  0x4d   : > { %p283_p7 = scmp.lt.s32.totalorder %s280_s7, 69  ;;  %s6107_s6 = sld [smem:[#allocation9_spill]] }
  0x4e   : > { %s6125_s4 = smov (!%p296_p4, %s3848_s4), 7  ;;  %p3850_p6 = scmp.ne.s32.totalorder %s5248_s18, 0 }
  0x4f   : > { %s6127_s7 = smov (!%p283_p7, %s280_s7), 69  ;;  %s3849_s5 = sshll.u32 %s6125_s4, 2 }
  0x50   : > { %s3847_s24 = sshll.u32 %s6127_s7, 2  ;;  %306 = sbr.rel (%p3850_p6) target bundleno = 88 (0x58), region = 44 }
  0x52   : > { %s5477_s28 = scalar_lea.vmem %s6106_s11, %s3849_s5 }
  0x53   : > { %s5482_s9 = scalar_lea.vmem %s6107_s6, %s3847_s24 }
  0x55   : > { %v5271_v0 = vmov 0.0  }
  0x56   : > { %307 = vst [vmem:[#allocation2 + $0x10] sm:$0xff] %v5271_v0  ;;  %308 = vst [vmem:[#allocation2] sm:$0xff] %v5271_v0 }
  0x57   : > { %309 = vst [vmem:[#allocation2 + $0x18] sm:$0xff] %v5271_v0  ;;  %310 = vst [vmem:[#allocation2 + $0x8] sm:$0xff] %v5271_v0 }
  0x58 PF: > { %v4428_v1 = vld [vmem:[%s5458_s0 + $0xe4] ss:$16 sps:$4 sm:$0xff]   ;;  %v4432_v3 = vld [vmem:[%s5458_s0 + $0xe0] ss:$16 sps:$4 sm:$0xff]   ;;  %v316_v49 = vld [vmem:[%s5482_s9 + $0x8] sm:$0xff]  ;;  %p4313_p0 = scmp.ne.s32.totalorder %s5248_s18, 4 }
  0x59   : > { %v4430_v2 = vld [vmem:[%s5458_s0 + $0x2e4] ss:$16 sps:$4 sm:$0xff]   ;;  %3059 = vmatprep.subr.bf16.mxu0 %v4428_v1  ;;  %v4433_v4 = vld [vmem:[%s5458_s0 + $0x2e0] ss:$16 sps:$4 sm:$0xff]   ;;  %v5537_v52 = vcombine.high %v316_v49, %v316_v49 }
  0x5a   : > { %3100 = vmatprep.subr.bf16.mxu1 %v4430_v2  ;;  %v4434_v5 = vld [vmem:[%s5458_s0 + $0xc4] ss:$16 sps:$4 sm:$0xff]   ;;  %3060 = vmatpush1.bf16.msra.mxu0 %v4432_v3  ;;  %v4438_v7 = vld [vmem:[%s5458_s0 + $0xc0] ss:$16 sps:$4 sm:$0xff]  }
  0x5b   : > { %3101 = vmatpush1.bf16.msra.mxu1 %v4433_v4  ;;  %v4436_v6 = vld [vmem:[%s5458_s0 + $0x2c4] ss:$16 sps:$4 sm:$0xff]   ;;  %3061 = vmatprep.subr.bf16.mxu0 %v4434_v5  ;;  %v4439_v8 = vld [vmem:[%s5458_s0 + $0x2c0] ss:$16 sps:$4 sm:$0xff]  }
  0x5c   : > { %3102 = vmatprep.subr.bf16.mxu1 %v4436_v6  ;;  %v4440_v9 = vld [vmem:[%s5458_s0 + $0xa4] ss:$16 sps:$4 sm:$0xff]   ;;  %v4444_v11 = vld [vmem:[%s5458_s0 + $0xa0] ss:$16 sps:$4 sm:$0xff]   ;;  %3132 = vmatprep.mubr.bf16.mxu1 %v5537_v52 }
  0x5d   : > { %v4442_v10 = vld [vmem:[%s5458_s0 + $0x2a4] ss:$16 sps:$4 sm:$0xff]   ;;  %v4445_v12 = vld [vmem:[%s5458_s0 + $0x2a0] ss:$16 sps:$4 sm:$0xff]  }
  0x5e   : > { %3062 = vmatpush1.bf16.msra.mxu0 %v4438_v7  ;;  %v4446_v13 = vld [vmem:[%s5458_s0 + $0x84] ss:$16 sps:$4 sm:$0xff]   ;;  %v4450_v15 = vld [vmem:[%s5458_s0 + $0x80] ss:$16 sps:$4 sm:$0xff]  }
  0x5f   : > { %3103 = vmatpush1.bf16.msra.mxu1 %v4439_v8  ;;  %3063 = vmatprep.subr.bf16.mxu0 %v4440_v9  ;;  %v4448_v14 = vld [vmem:[%s5458_s0 + $0x284] ss:$16 sps:$4 sm:$0xff]   ;;  %v4451_v16 = vld [vmem:[%s5458_s0 + $0x280] ss:$16 sps:$4 sm:$0xff]   ;;  %v5561_v8 = vcombine.low %v316_v49, %v316_v49 }
  0x60   : > { %3104 = vmatprep.subr.bf16.mxu1 %v4442_v10  ;;  %v4452_v17 = vld [vmem:[%s5458_s0 + $0x64] ss:$16 sps:$4 sm:$0xff]   ;;  %v4456_v19 = vld [vmem:[%s5458_s0 + $0x60] ss:$16 sps:$4 sm:$0xff]  }
  0x61   : > { %v4454_v18 = vld [vmem:[%s5458_s0 + $0x264] ss:$16 sps:$4 sm:$0xff]   ;;  %v4457_v20 = vld [vmem:[%s5458_s0 + $0x260] ss:$16 sps:$4 sm:$0xff]  }
  0x62   : > { %3064 = vmatpush1.bf16.msra.mxu0 %v4444_v11  ;;  %v4458_v21 = vld [vmem:[%s5458_s0 + $0x44] ss:$16 sps:$4 sm:$0xff]   ;;  %v4462_v23 = vld [vmem:[%s5458_s0 + $0x40] ss:$16 sps:$4 sm:$0xff]  }
  0x63   : > { %3105 = vmatpush1.bf16.msra.mxu1 %v4445_v12  ;;  %3065 = vmatprep.subr.bf16.mxu0 %v4446_v13  ;;  %v4460_v22 = vld [vmem:[%s5458_s0 + $0x244] ss:$16 sps:$4 sm:$0xff]   ;;  %v4463_v24 = vld [vmem:[%s5458_s0 + $0x240] ss:$16 sps:$4 sm:$0xff]  }
  0x64   : > { %3106 = vmatprep.subr.bf16.mxu1 %v4448_v14  ;;  %v4464_v25 = vld [vmem:[%s5458_s0 + $0x24] ss:$16 sps:$4 sm:$0xff]   ;;  %v4468_v27 = vld [vmem:[%s5458_s0 + $0x20] ss:$16 sps:$4 sm:$0xff]  }
  0x65   : > { %v4466_v26 = vld [vmem:[%s5458_s0 + $0x224] ss:$16 sps:$4 sm:$0xff]   ;;  %v4469_v28 = vld [vmem:[%s5458_s0 + $0x220] ss:$16 sps:$4 sm:$0xff]  }
  0x66   : > { %3066 = vmatpush1.bf16.msra.mxu0 %v4450_v15  ;;  %v4470_v29 = vld [vmem:[%s5458_s0 + $0x4] ss:$16 sps:$4 sm:$0xff]   ;;  %v4474_v31 = vld [vmem:[%s5458_s0] ss:$16 sps:$4 sm:$0xff]  }
  0x67   : > { %3107 = vmatpush1.bf16.msra.mxu1 %v4451_v16  ;;  %3067 = vmatprep.subr.bf16.mxu0 %v4452_v17  ;;  %v4472_v30 = vld [vmem:[%s5458_s0 + $0x204] ss:$16 sps:$4 sm:$0xff]   ;;  %v4475_v32 = vld [vmem:[%s5458_s0 + $0x200] ss:$16 sps:$4 sm:$0xff]  }
  0x68   : > { %3108 = vmatprep.subr.bf16.mxu1 %v4454_v18  ;;  %v4476_v33 = vld [vmem:[%s5458_s0 + $0x1e4] ss:$16 sps:$4 sm:$0xff]   ;;  %v4480_v35 = vld [vmem:[%s5458_s0 + $0x1e0] ss:$16 sps:$4 sm:$0xff]  }
  0x69   : > { %v4478_v34 = vld [vmem:[%s5458_s0 + $0x3e4] ss:$16 sps:$4 sm:$0xff]   ;;  %v4481_v36 = vld [vmem:[%s5458_s0 + $0x3e0] ss:$16 sps:$4 sm:$0xff]  }
  0x6a   : > { %3068 = vmatpush1.bf16.msra.mxu0 %v4456_v19  ;;  %v4482_v37 = vld [vmem:[%s5458_s0 + $0x1c4] ss:$16 sps:$4 sm:$0xff]   ;;  %v4486_v39 = vld [vmem:[%s5458_s0 + $0x1c0] ss:$16 sps:$4 sm:$0xff]  }
  0x6b   : > { %3109 = vmatpush1.bf16.msra.mxu1 %v4457_v20  ;;  %3069 = vmatprep.subr.bf16.mxu0 %v4458_v21  ;;  %v4484_v38 = vld [vmem:[%s5458_s0 + $0x3c4] ss:$16 sps:$4 sm:$0xff]   ;;  %v4487_v40 = vld [vmem:[%s5458_s0 + $0x3c0] ss:$16 sps:$4 sm:$0xff]  }
  0x6c   : > { %3110 = vmatprep.subr.bf16.mxu1 %v4460_v22  ;;  %v4488_v41 = vld [vmem:[%s5458_s0 + $0x1a4] ss:$16 sps:$4 sm:$0xff]   ;;  %v4492_v43 = vld [vmem:[%s5458_s0 + $0x1a0] ss:$16 sps:$4 sm:$0xff]  }
  0x6d   : > { %v4490_v42 = vld [vmem:[%s5458_s0 + $0x3a4] ss:$16 sps:$4 sm:$0xff]   ;;  %v4493_v44 = vld [vmem:[%s5458_s0 + $0x3a0] ss:$16 sps:$4 sm:$0xff]  }
  0x6e   : > { %3070 = vmatpush1.bf16.msra.mxu0 %v4462_v23  ;;  %v4494_v45 = vld [vmem:[%s5458_s0 + $0x184] ss:$16 sps:$4 sm:$0xff]   ;;  %v4498_v50 = vld [vmem:[%s5458_s0 + $0x180] ss:$16 sps:$4 sm:$0xff]  }
  0x6f   : > { %3111 = vmatpush1.bf16.msra.mxu1 %v4463_v24  ;;  %3071 = vmatprep.subr.bf16.mxu0 %v4464_v25  ;;  %v4496_v46 = vld [vmem:[%s5458_s0 + $0x384] ss:$16 sps:$4 sm:$0xff]   ;;  %v4499_v51 = vld [vmem:[%s5458_s0 + $0x380] ss:$16 sps:$4 sm:$0xff]  }
  0x70   : > { %3112 = vmatprep.subr.bf16.mxu1 %v4466_v26  ;;  %v315_v47 = vld [vmem:[%s5482_s9] sm:$0xff] }
  0x71   : > { %v5532_v48 = vcombine.high %v315_v47, %v315_v47  ;;  %v4500_v53 = vld [vmem:[%s5458_s0 + $0x164] ss:$16 sps:$4 sm:$0xff]   ;;  %v4504_v55 = vld [vmem:[%s5458_s0 + $0x160] ss:$16 sps:$4 sm:$0xff]   ;;  %v5559_v7 = vcombine.low %v315_v47, %v315_v47 }
  0x72   : > { %3072 = vmatpush1.bf16.msra.mxu0 %v4468_v27  ;;  %v4502_v54 = vld [vmem:[%s5458_s0 + $0x364] ss:$16 sps:$4 sm:$0xff]   ;;  %v4505_v56 = vld [vmem:[%s5458_s0 + $0x360] ss:$16 sps:$4 sm:$0xff]  }
  0x73   : > { %3113 = vmatpush1.bf16.msra.mxu1 %v4469_v28  ;;  %3073 = vmatprep.subr.bf16.mxu0 %v4470_v29  ;;  %v4506_v57 = vld [vmem:[%s5458_s0 + $0x144] ss:$16 sps:$4 sm:$0xff]   ;;  %v4510_v59 = vld [vmem:[%s5458_s0 + $0x140] ss:$16 sps:$4 sm:$0xff]  }
  0x74   : > { %3114 = vmatprep.subr.bf16.mxu1 %v4472_v30  ;;  %3091 = vmatprep.mubr.bf16.mxu0 %v5532_v48  ;;  %v4508_v58 = vld [vmem:[%s5458_s0 + $0x344] ss:$16 sps:$4 sm:$0xff]   ;;  %v4511_v60 = vld [vmem:[%s5458_s0 + $0x340] ss:$16 sps:$4 sm:$0xff]  }
  0x75   : > { %v4512_v61 = vld [vmem:[%s5458_s0 + $0x124] ss:$16 sps:$4 sm:$0xff]   ;;  %v4516_v63 = vld [vmem:[%s5458_s0 + $0x120] ss:$16 sps:$4 sm:$0xff]  }
  0x76   : > { %3074 = vmatpush1.bf16.msra.mxu0 %v4474_v31  ;;  %v4514_v62 = vld [vmem:[%s5458_s0 + $0x324] ss:$16 sps:$4 sm:$0xff]   ;;  %v4517_v0 = vld [vmem:[%s5458_s0 + $0x320] ss:$16 sps:$4 sm:$0xff]  }
  0x77   : > { %3115 = vmatpush1.bf16.msra.mxu1 %v4475_v32  ;;  %3075 = vmatprep.subr.bf16.mxu0 %v4476_v33  ;;  %v4518_v1 = vld [vmem:[%s5458_s0 + $0x104] ss:$16 sps:$4 sm:$0xff]   ;;  %v4522_v3 = vld [vmem:[%s5458_s0 + $0x100] ss:$16 sps:$4 sm:$0xff]  }
  0x78   : > { %3116 = vmatprep.subr.bf16.mxu1 %v4478_v34  ;;  %v4520_v2 = vld [vmem:[%s5458_s0 + $0x304] ss:$16 sps:$4 sm:$0xff]   ;;  %v4523_v4 = vld [vmem:[%s5458_s0 + $0x300] ss:$16 sps:$4 sm:$0xff]   ;;  %v5593_v34 = vld [vmem:[%s5482_s9 + $0x18] sm:$0xff] }
  0x79   : > { %v4530_v5 = vld [vmem:[%s5458_s0 + $0x4e4] ss:$16 sps:$4 sm:$0xff]   ;;  %v4528_v9 = vld [vmem:[%s5458_s0 + $0x4e0] ss:$16 sps:$4 sm:$0xff]  }
  0x7a   : > { %3076 = vmatpush2.bf16.msra.mxu0 %v4480_v35  ;;  %v4533_v6 = vld [vmem:[%s5458_s0 + $0x6e4] ss:$16 sps:$4 sm:$0xff]   ;;  %v4531_v10 = vld [vmem:[%s5458_s0 + $0x6e0] ss:$16 sps:$4 sm:$0xff]  }
  0x7b   : > { %3117 = vmatpush2.bf16.msra.mxu1 %v4481_v36  ;;  %3077 = vmatprep.subr.bf16.mxu0 %v4482_v37  ;;  %v4536_v11 = vld [vmem:[%s5458_s0 + $0x4c4] ss:$16 sps:$4 sm:$0xff]   ;;  %v4534_v13 = vld [vmem:[%s5458_s0 + $0x4c0] ss:$16 sps:$4 sm:$0xff]  }
  0x7c   : > { %3118 = vmatprep.subr.bf16.mxu1 %v4484_v38  ;;  %v4539_v12 = vld [vmem:[%s5458_s0 + $0x6c4] ss:$16 sps:$4 sm:$0xff]   ;;  %v4537_v14 = vld [vmem:[%s5458_s0 + $0x6c0] ss:$16 sps:$4 sm:$0xff]   ;;  %v5603_v38 = vcombine.high %v5593_v34, %v5593_v34 }
  0x7d   : > { %v4542_v15 = vld [vmem:[%s5458_s0 + $0x4a4] ss:$16 sps:$4 sm:$0xff]   ;;  %v4540_v17 = vld [vmem:[%s5458_s0 + $0x4a0] ss:$16 sps:$4 sm:$0xff]  }
  0x7e   : > { %3078 = vmatpush2.bf16.msra.mxu0 %v4486_v39  ;;  %v4545_v16 = vld [vmem:[%s5458_s0 + $0x6a4] ss:$16 sps:$4 sm:$0xff]   ;;  %v4543_v18 = vld [vmem:[%s5458_s0 + $0x6a0] ss:$16 sps:$4 sm:$0xff]  }
  0x7f   : > { %3119 = vmatpush2.bf16.msra.mxu1 %v4487_v40  ;;  %3079 = vmatprep.subr.bf16.mxu0 %v4488_v41  ;;  %v4548_v19 = vld [vmem:[%s5458_s0 + $0x484] ss:$16 sps:$4 sm:$0xff]   ;;  %v4546_v21 = vld [vmem:[%s5458_s0 + $0x480] ss:$16 sps:$4 sm:$0xff]  }
  0x80   : > { %3120 = vmatprep.subr.bf16.mxu1 %v4490_v42  ;;  %v4551_v20 = vld [vmem:[%s5458_s0 + $0x684] ss:$16 sps:$4 sm:$0xff]   ;;  %v4549_v22 = vld [vmem:[%s5458_s0 + $0x680] ss:$16 sps:$4 sm:$0xff]  }
  0x81   : > { %v4554_v23 = vld [vmem:[%s5458_s0 + $0x464] ss:$16 sps:$4 sm:$0xff]   ;;  %v4552_v25 = vld [vmem:[%s5458_s0 + $0x460] ss:$16 sps:$4 sm:$0xff]  }
  0x82   : > { %3080 = vmatpush2.bf16.msra.mxu0 %v4492_v43  ;;  %v4557_v24 = vld [vmem:[%s5458_s0 + $0x664] ss:$16 sps:$4 sm:$0xff]   ;;  %v4555_v26 = vld [vmem:[%s5458_s0 + $0x660] ss:$16 sps:$4 sm:$0xff]  }
  0x83   : > { %3121 = vmatpush2.bf16.msra.mxu1 %v4493_v44  ;;  %3081 = vmatprep.subr.bf16.mxu0 %v4494_v45  ;;  %v4560_v27 = vld [vmem:[%s5458_s0 + $0x444] ss:$16 sps:$4 sm:$0xff]   ;;  %v4558_v29 = vld [vmem:[%s5458_s0 + $0x440] ss:$16 sps:$4 sm:$0xff]  }
  0x84   : > { %3122 = vmatprep.subr.bf16.mxu1 %v4496_v46  ;;  %v4563_v28 = vld [vmem:[%s5458_s0 + $0x644] ss:$16 sps:$4 sm:$0xff]   ;;  %v4561_v30 = vld [vmem:[%s5458_s0 + $0x640] ss:$16 sps:$4 sm:$0xff]  }
  0x85   : > { %v4566_v31 = vld [vmem:[%s5458_s0 + $0x424] ss:$16 sps:$4 sm:$0xff]   ;;  %v4564_v35 = vld [vmem:[%s5458_s0 + $0x420] ss:$16 sps:$4 sm:$0xff]  }
  0x86   : > { %3082 = vmatpush2.bf16.msra.mxu0 %v4498_v50  ;;  %v4569_v32 = vld [vmem:[%s5458_s0 + $0x624] ss:$16 sps:$4 sm:$0xff]   ;;  %v4567_v36 = vld [vmem:[%s5458_s0 + $0x620] ss:$16 sps:$4 sm:$0xff]  }
  0x87   : > { %3123 = vmatpush2.bf16.msra.mxu1 %v4499_v51  ;;  %3083 = vmatprep.subr.bf16.mxu0 %v4500_v53  ;;  %v5590_v33 = vld [vmem:[%s5482_s9 + $0x10] sm:$0xff] }
  0x88   : > { %3124 = vmatprep.subr.bf16.mxu1 %v4502_v54  ;;  %v5599_v37 = vcombine.high %v5590_v33, %v5590_v33  ;;  %v4572_v39 = vld [vmem:[%s5458_s0 + $0x404] ss:$16 sps:$4 sm:$0xff]   ;;  %v4570_v41 = vld [vmem:[%s5458_s0 + $0x400] ss:$16 sps:$4 sm:$0xff]  }
  0x89   : > { %v4575_v40 = vld [vmem:[%s5458_s0 + $0x604] ss:$16 sps:$4 sm:$0xff]   ;;  %v4573_v42 = vld [vmem:[%s5458_s0 + $0x600] ss:$16 sps:$4 sm:$0xff]  }
  0x8a   : > { %3084 = vmatpush2.bf16.msra.mxu0 %v4504_v55  ;;  %v4578_v43 = vld [vmem:[%s5458_s0 + $0x5e4] ss:$16 sps:$4 sm:$0xff]   ;;  %v4576_v45 = vld [vmem:[%s5458_s0 + $0x5e0] ss:$16 sps:$4 sm:$0xff]  }
  0x8b   : > { %3125 = vmatpush2.bf16.msra.mxu1 %v4505_v56  ;;  %3085 = vmatprep.subr.bf16.mxu0 %v4506_v57  ;;  %v4581_v44 = vld [vmem:[%s5458_s0 + $0x7e4] ss:$16 sps:$4 sm:$0xff]   ;;  %v4579_v46 = vld [vmem:[%s5458_s0 + $0x7e0] ss:$16 sps:$4 sm:$0xff]  }
  0x8c   : > { %3126 = vmatprep.subr.bf16.mxu1 %v4508_v58  ;;  %v4584_v47 = vld [vmem:[%s5458_s0 + $0x5c4] ss:$16 sps:$4 sm:$0xff]   ;;  %v4582_v50 = vld [vmem:[%s5458_s0 + $0x5c0] ss:$16 sps:$4 sm:$0xff]  }
  0x8d   : > { %v4587_v49 = vld [vmem:[%s5458_s0 + $0x7c4] ss:$16 sps:$4 sm:$0xff]   ;;  %v4585_v51 = vld [vmem:[%s5458_s0 + $0x7c0] ss:$16 sps:$4 sm:$0xff]  }
  0x8e   : > { %3086 = vmatpush2.bf16.msra.mxu0 %v4510_v59  ;;  %v4590_v53 = vld [vmem:[%s5458_s0 + $0x5a4] ss:$16 sps:$4 sm:$0xff]   ;;  %v4588_v55 = vld [vmem:[%s5458_s0 + $0x5a0] ss:$16 sps:$4 sm:$0xff]  }
  0x8f   : > { %3127 = vmatpush2.bf16.msra.mxu1 %v4511_v60  ;;  %3087 = vmatprep.subr.bf16.mxu0 %v4512_v61  ;;  %v4593_v54 = vld [vmem:[%s5458_s0 + $0x7a4] ss:$16 sps:$4 sm:$0xff]   ;;  %v4591_v56 = vld [vmem:[%s5458_s0 + $0x7a0] ss:$16 sps:$4 sm:$0xff]  }
  0x90   : > { %3128 = vmatprep.subr.bf16.mxu1 %v4514_v62  ;;  %v4596_v57 = vld [vmem:[%s5458_s0 + $0x584] ss:$16 sps:$4 sm:$0xff]   ;;  %v4594_v59 = vld [vmem:[%s5458_s0 + $0x580] ss:$16 sps:$4 sm:$0xff]  }
  0x91   : > { %v4599_v58 = vld [vmem:[%s5458_s0 + $0x784] ss:$16 sps:$4 sm:$0xff]   ;;  %v4597_v60 = vld [vmem:[%s5458_s0 + $0x780] ss:$16 sps:$4 sm:$0xff]  }
  0x92   : > { %3088 = vmatpush2.bf16.msra.mxu0 %v4516_v63  ;;  %v4602_v61 = vld [vmem:[%s5458_s0 + $0x564] ss:$16 sps:$4 sm:$0xff]   ;;  %v4600_v63 = vld [vmem:[%s5458_s0 + $0x560] ss:$16 sps:$4 sm:$0xff]  }
  0x93   : > { %3129 = vmatpush2.bf16.msra.mxu1 %v4517_v0  ;;  %3089 = vmatprep.subr.bf16.mxu0 %v4518_v1  ;;  %v4605_v62 = vld [vmem:[%s5458_s0 + $0x764] ss:$16 sps:$4 sm:$0xff]   ;;  %v4603_v0 = vld [vmem:[%s5458_s0 + $0x760] ss:$16 sps:$4 sm:$0xff]  }
  0x94   : > { %3130 = vmatprep.subr.bf16.mxu1 %v4520_v2  ;;  %v4608_v1 = vld [vmem:[%s5458_s0 + $0x544] ss:$16 sps:$4 sm:$0xff]  }
  0x95   : > { %v4611_v2 = vld [vmem:[%s5458_s0 + $0x744] ss:$16 sps:$4 sm:$0xff]  }
  0x96   : > { %3090 = vmatpush2.bf16.msra.mxu0 %v4522_v3  ;;  %v4606_v3 = vld [vmem:[%s5458_s0 + $0x540] ss:$16 sps:$4 sm:$0xff]  }
  0x97   : > { %3131 = vmatpush2.bf16.msra.mxu1 %v4523_v4  ;;  %3141 = vmatprep.subr.bf16.mxu0 %v4530_v5  ;;  %v4609_v4 = vld [vmem:[%s5458_s0 + $0x740] ss:$16 sps:$4 sm:$0xff]   ;;  %v4614_v5 = vld [vmem:[%s5458_s0 + $0x524] ss:$16 sps:$4 sm:$0xff]  }
  0x98   : > { %3182 = vmatprep.subr.bf16.mxu1 %v4533_v6  ;;  %v4617_v6 = vld [vmem:[%s5458_s0 + $0x724] ss:$16 sps:$4 sm:$0xff]  }
  0x99   : > { %3092 = vmatmul.mubr.bf16.vlgmr.msra.gmra.mxu0 %v5559_v7 }
  0x9a   : > { %3133 = vmatmul.mubr.bf16.vlgmr.msra.gmra.mxu1 %v5561_v8  ;;  %3142 = vmatpush1.bf16.msra.mxu0 %v4528_v9  ;;  %v4612_v9 = vld [vmem:[%s5458_s0 + $0x520] ss:$16 sps:$4 sm:$0xff]  }
  0x9b   : > { %3183 = vmatpush1.bf16.msra.mxu1 %v4531_v10  ;;  %3143 = vmatprep.subr.bf16.mxu0 %v4536_v11  ;;  %v4615_v10 = vld [vmem:[%s5458_s0 + $0x720] ss:$16 sps:$4 sm:$0xff]   ;;  %v4620_v11 = vld [vmem:[%s5458_s0 + $0x504] ss:$16 sps:$4 sm:$0xff]  }
  0x9c   : > { %3184 = vmatprep.subr.bf16.mxu1 %v4539_v12  ;;  %3173 = vmatprep.mubr.bf16.mxu0 %v5599_v37  ;;  %v4623_v12 = vld [vmem:[%s5458_s0 + $0x704] ss:$16 sps:$4 sm:$0xff]  }
  0x9d   : > { %3214 = vmatprep.mubr.bf16.mxu1 %v5603_v38 }
  0x9e   : > { %3144 = vmatpush1.bf16.msra.mxu0 %v4534_v13  ;;  %v4618_v13 = vld [vmem:[%s5458_s0 + $0x500] ss:$16 sps:$4 sm:$0xff]  }
  0x9f   : > { %3185 = vmatpush1.bf16.msra.mxu1 %v4537_v14  ;;  %3145 = vmatprep.subr.bf16.mxu0 %v4542_v15  ;;  %v4621_v14 = vld [vmem:[%s5458_s0 + $0x700] ss:$16 sps:$4 sm:$0xff]   ;;  %v4630_v15 = vld [vmem:[%s5458_s0 + $0x8e4] ss:$16 sps:$4 sm:$0xff]  }
  0xa0   : > { %3186 = vmatprep.subr.bf16.mxu1 %v4545_v16  ;;  %v4633_v16 = vld [vmem:[%s5458_s0 + $0xae4] ss:$16 sps:$4 sm:$0xff]  }
  0xa2   : > { %3146 = vmatpush1.bf16.msra.mxu0 %v4540_v17  ;;  %v5647_v17 = vcombine.low %v5590_v33, %v5590_v33  ;;  %v4648_v33 = vld [vmem:[%s5458_s0 + $0x884] ss:$16 sps:$4 sm:$0xff]  }
  0xa3   : > { %3187 = vmatpush1.bf16.msra.mxu1 %v4543_v18  ;;  %3147 = vmatprep.subr.bf16.mxu0 %v4548_v19  ;;  %v5651_v18 = vcombine.low %v5593_v34, %v5593_v34  ;;  %v4628_v19 = vld [vmem:[%s5458_s0 + $0x8e0] ss:$16 sps:$4 sm:$0xff]   ;;  %v4651_v34 = vld [vmem:[%s5458_s0 + $0xa84] ss:$16 sps:$4 sm:$0xff]  }
  0xa4   : > { %3188 = vmatprep.subr.bf16.mxu1 %v4551_v20  ;;  %v4631_v20 = vld [vmem:[%s5458_s0 + $0xae0] ss:$16 sps:$4 sm:$0xff]  }
  0xa6   : > { %3148 = vmatpush1.bf16.msra.mxu0 %v4546_v21  ;;  %v4636_v21 = vld [vmem:[%s5458_s0 + $0x8c4] ss:$16 sps:$4 sm:$0xff]  }
  0xa7   : > { %3189 = vmatpush1.bf16.msra.mxu1 %v4549_v22  ;;  %3149 = vmatprep.subr.bf16.mxu0 %v4554_v23  ;;  %v4639_v22 = vld [vmem:[%s5458_s0 + $0xac4] ss:$16 sps:$4 sm:$0xff]  }
  0xa8   : > { %3190 = vmatprep.subr.bf16.mxu1 %v4557_v24  ;;  %v5658_v23 = vld [vmem:[%s5482_s9 + $0x20] sm:$0xff]  ;;  %v5661_v24 = vld [vmem:[%s5482_s9 + $0x28] sm:$0xff] }
  0xaa   : > { %3150 = vmatpush1.bf16.msra.mxu0 %v4552_v25  ;;  %v5665_v25 = vcombine.high %v5658_v23, %v5658_v23 }
  0xab   : > { %3191 = vmatpush1.bf16.msra.mxu1 %v4555_v26  ;;  %3151 = vmatprep.subr.bf16.mxu0 %v4560_v27  ;;  %v5669_v26 = vcombine.high %v5661_v24, %v5661_v24  ;;  %v4634_v27 = vld [vmem:[%s5458_s0 + $0x8c0] ss:$16 sps:$4 sm:$0xff]  }
  0xac   : > { %3192 = vmatprep.subr.bf16.mxu1 %v4563_v28  ;;  %v4637_v28 = vld [vmem:[%s5458_s0 + $0xac0] ss:$16 sps:$4 sm:$0xff]  }
  0xae   : > { %3152 = vmatpush1.bf16.msra.mxu0 %v4558_v29  ;;  %v4642_v29 = vld [vmem:[%s5458_s0 + $0x8a4] ss:$16 sps:$4 sm:$0xff]  }
  0xaf   : > { %3193 = vmatpush1.bf16.msra.mxu1 %v4561_v30  ;;  %3153 = vmatprep.subr.bf16.mxu0 %v4566_v31  ;;  %v4645_v30 = vld [vmem:[%s5458_s0 + $0xaa4] ss:$16 sps:$4 sm:$0xff]   ;;  %v4640_v31 = vld [vmem:[%s5458_s0 + $0x8a0] ss:$16 sps:$4 sm:$0xff]  }
  0xb0   : > { %3194 = vmatprep.subr.bf16.mxu1 %v4569_v32  ;;  %v4643_v32 = vld [vmem:[%s5458_s0 + $0xaa0] ss:$16 sps:$4 sm:$0xff]  }
  0xb2   : > { %3154 = vmatpush1.bf16.msra.mxu0 %v4564_v35  ;;  %v4646_v35 = vld [vmem:[%s5458_s0 + $0x880] ss:$16 sps:$4 sm:$0xff]  }
  0xb3   : > { %3195 = vmatpush1.bf16.msra.mxu1 %v4567_v36  ;;  %3155 = vmatprep.subr.bf16.mxu0 %v4572_v39  ;;  %v4649_v36 = vld [vmem:[%s5458_s0 + $0xa80] ss:$16 sps:$4 sm:$0xff]   ;;  %v4654_v39 = vld [vmem:[%s5458_s0 + $0x864] ss:$16 sps:$4 sm:$0xff]  }
  0xb4   : > { %3196 = vmatprep.subr.bf16.mxu1 %v4575_v40  ;;  %v4657_v40 = vld [vmem:[%s5458_s0 + $0xa64] ss:$16 sps:$4 sm:$0xff]  }
  0xb6   : > { %3156 = vmatpush1.bf16.msra.mxu0 %v4570_v41  ;;  %v4652_v41 = vld [vmem:[%s5458_s0 + $0x860] ss:$16 sps:$4 sm:$0xff]  }
  0xb7   : > { %3197 = vmatpush1.bf16.msra.mxu1 %v4573_v42  ;;  %3157 = vmatprep.subr.bf16.mxu0 %v4578_v43  ;;  %v4655_v42 = vld [vmem:[%s5458_s0 + $0xa60] ss:$16 sps:$4 sm:$0xff]   ;;  %v4660_v43 = vld [vmem:[%s5458_s0 + $0x844] ss:$16 sps:$4 sm:$0xff]  }
  0xb8   : > { %3198 = vmatprep.subr.bf16.mxu1 %v4581_v44  ;;  %v4663_v44 = vld [vmem:[%s5458_s0 + $0xa44] ss:$16 sps:$4 sm:$0xff]  }
  0xba   : > { %3158 = vmatpush2.bf16.msra.mxu0 %v4576_v45  ;;  %v4658_v45 = vld [vmem:[%s5458_s0 + $0x840] ss:$16 sps:$4 sm:$0xff]  }
  0xbb   : > { %3199 = vmatpush2.bf16.msra.mxu1 %v4579_v46  ;;  %3159 = vmatprep.subr.bf16.mxu0 %v4584_v47  ;;  %v4661_v46 = vld [vmem:[%s5458_s0 + $0xa40] ss:$16 sps:$4 sm:$0xff]   ;;  %v4666_v47 = vld [vmem:[%s5458_s0 + $0x824] ss:$16 sps:$4 sm:$0xff]  }
  0xbc   : > { %3200 = vmatprep.subr.bf16.mxu1 %v4587_v49  ;;  %v4669_v49 = vld [vmem:[%s5458_s0 + $0xa24] ss:$16 sps:$4 sm:$0xff]  }
  0xbe   : > { %3160 = vmatpush2.bf16.msra.mxu0 %v4582_v50  ;;  %v4664_v50 = vld [vmem:[%s5458_s0 + $0x820] ss:$16 sps:$4 sm:$0xff]  }
  0xbf   : > { %3201 = vmatpush2.bf16.msra.mxu1 %v4585_v51  ;;  %3161 = vmatprep.subr.bf16.mxu0 %v4590_v53  ;;  %v4667_v51 = vld [vmem:[%s5458_s0 + $0xa20] ss:$16 sps:$4 sm:$0xff]   ;;  %v4672_v53 = vld [vmem:[%s5458_s0 + $0x804] ss:$16 sps:$4 sm:$0xff]  }
  0xc0   : > { %3202 = vmatprep.subr.bf16.mxu1 %v4593_v54  ;;  %v4675_v54 = vld [vmem:[%s5458_s0 + $0xa04] ss:$16 sps:$4 sm:$0xff]  }
  0xc2   : > { %3162 = vmatpush2.bf16.msra.mxu0 %v4588_v55  ;;  %v4670_v55 = vld [vmem:[%s5458_s0 + $0x800] ss:$16 sps:$4 sm:$0xff]  }
  0xc3   : > { %3203 = vmatpush2.bf16.msra.mxu1 %v4591_v56  ;;  %3163 = vmatprep.subr.bf16.mxu0 %v4596_v57  ;;  %v4673_v56 = vld [vmem:[%s5458_s0 + $0xa00] ss:$16 sps:$4 sm:$0xff]   ;;  %v4678_v57 = vld [vmem:[%s5458_s0 + $0x9e4] ss:$16 sps:$4 sm:$0xff]  }
  0xc4   : > { %3204 = vmatprep.subr.bf16.mxu1 %v4599_v58  ;;  %v4681_v58 = vld [vmem:[%s5458_s0 + $0xbe4] ss:$16 sps:$4 sm:$0xff]  }
  0xc6   : > { %3164 = vmatpush2.bf16.msra.mxu0 %v4594_v59  ;;  %v4676_v59 = vld [vmem:[%s5458_s0 + $0x9e0] ss:$16 sps:$4 sm:$0xff]  }
  0xc7   : > { %3205 = vmatpush2.bf16.msra.mxu1 %v4597_v60  ;;  %3165 = vmatprep.subr.bf16.mxu0 %v4602_v61  ;;  %v4679_v60 = vld [vmem:[%s5458_s0 + $0xbe0] ss:$16 sps:$4 sm:$0xff]   ;;  %v4684_v61 = vld [vmem:[%s5458_s0 + $0x9c4] ss:$16 sps:$4 sm:$0xff]  }
  0xc8   : > { %3206 = vmatprep.subr.bf16.mxu1 %v4605_v62  ;;  %v4687_v62 = vld [vmem:[%s5458_s0 + $0xbc4] ss:$16 sps:$4 sm:$0xff]  }
  0xca   : > { %3166 = vmatpush2.bf16.msra.mxu0 %v4600_v63  ;;  %v4682_v63 = vld [vmem:[%s5458_s0 + $0x9c0] ss:$16 sps:$4 sm:$0xff]  }
  0xcb   : > { %3207 = vmatpush2.bf16.msra.mxu1 %v4603_v0  ;;  %3167 = vmatprep.subr.bf16.mxu0 %v4608_v1  ;;  %v4685_v0 = vld [vmem:[%s5458_s0 + $0xbc0] ss:$16 sps:$4 sm:$0xff]   ;;  %v4690_v1 = vld [vmem:[%s5458_s0 + $0x9a4] ss:$16 sps:$4 sm:$0xff]  }
  0xcc   : > { %3208 = vmatprep.subr.bf16.mxu1 %v4611_v2  ;;  %v4693_v2 = vld [vmem:[%s5458_s0 + $0xba4] ss:$16 sps:$4 sm:$0xff]  }
  0xce   : > { %3168 = vmatpush2.bf16.msra.mxu0 %v4606_v3  ;;  %v4688_v3 = vld [vmem:[%s5458_s0 + $0x9a0] ss:$16 sps:$4 sm:$0xff]  }
  0xcf   : > { %3209 = vmatpush2.bf16.msra.mxu1 %v4609_v4  ;;  %3169 = vmatprep.subr.bf16.mxu0 %v4614_v5  ;;  %v4691_v4 = vld [vmem:[%s5458_s0 + $0xba0] ss:$16 sps:$4 sm:$0xff]   ;;  %v4696_v5 = vld [vmem:[%s5458_s0 + $0x984] ss:$16 sps:$4 sm:$0xff]  }
  0xd0   : > { %3210 = vmatprep.subr.bf16.mxu1 %v4617_v6  ;;  %v4699_v6 = vld [vmem:[%s5458_s0 + $0xb84] ss:$16 sps:$4 sm:$0xff]  }
  0xd2   : > { %3170 = vmatpush2.bf16.msra.mxu0 %v4612_v9  ;;  %v4694_v9 = vld [vmem:[%s5458_s0 + $0x980] ss:$16 sps:$4 sm:$0xff]  }
  0xd3   : > { %3211 = vmatpush2.bf16.msra.mxu1 %v4615_v10  ;;  %3171 = vmatprep.subr.bf16.mxu0 %v4620_v11  ;;  %v4697_v10 = vld [vmem:[%s5458_s0 + $0xb80] ss:$16 sps:$4 sm:$0xff]   ;;  %v4702_v11 = vld [vmem:[%s5458_s0 + $0x964] ss:$16 sps:$4 sm:$0xff]  }
  0xd4   : > { %3212 = vmatprep.subr.bf16.mxu1 %v4623_v12  ;;  %v4705_v12 = vld [vmem:[%s5458_s0 + $0xb64] ss:$16 sps:$4 sm:$0xff]  }
  0xd6   : > { %3172 = vmatpush2.bf16.msra.mxu0 %v4618_v13  ;;  %v4700_v13 = vld [vmem:[%s5458_s0 + $0x960] ss:$16 sps:$4 sm:$0xff]  }
  0xd7   : > { %3213 = vmatpush2.bf16.msra.mxu1 %v4621_v14  ;;  %3223 = vmatprep.subr.bf16.mxu0 %v4630_v15  ;;  %v4703_v14 = vld [vmem:[%s5458_s0 + $0xb60] ss:$16 sps:$4 sm:$0xff]   ;;  %v4708_v15 = vld [vmem:[%s5458_s0 + $0x944] ss:$16 sps:$4 sm:$0xff]  }
  0xd8   : > { %3264 = vmatprep.subr.bf16.mxu1 %v4633_v16  ;;  %v4711_v16 = vld [vmem:[%s5458_s0 + $0xb44] ss:$16 sps:$4 sm:$0xff]  }
  0xd9   : > { %3174 = vmatmul.mubr.bf16.vlgmr.msra.gmra.mxu0 %v5647_v17 }
  0xda   : > { %3215 = vmatmul.mubr.bf16.vlgmr.msra.gmra.mxu1 %v5651_v18  ;;  %3224 = vmatpush1.bf16.msra.mxu0 %v4628_v19  ;;  %v4706_v19 = vld [vmem:[%s5458_s0 + $0x940] ss:$16 sps:$4 sm:$0xff]  }
  0xdb   : > { %3265 = vmatpush1.bf16.msra.mxu1 %v4631_v20  ;;  %3225 = vmatprep.subr.bf16.mxu0 %v4636_v21  ;;  %v4709_v20 = vld [vmem:[%s5458_s0 + $0xb40] ss:$16 sps:$4 sm:$0xff]   ;;  %v4714_v21 = vld [vmem:[%s5458_s0 + $0x924] ss:$16 sps:$4 sm:$0xff]  }
  0xdc   : > { %3266 = vmatprep.subr.bf16.mxu1 %v4639_v22  ;;  %3255 = vmatprep.mubr.bf16.mxu0 %v5665_v25  ;;  %v4717_v22 = vld [vmem:[%s5458_s0 + $0xb24] ss:$16 sps:$4 sm:$0xff]  }
  0xdd   : > { %3296 = vmatprep.mubr.bf16.mxu1 %v5669_v26 }
  0xde   : > { %3226 = vmatpush1.bf16.msra.mxu0 %v4634_v27  ;;  %v4712_v27 = vld [vmem:[%s5458_s0 + $0x920] ss:$16 sps:$4 sm:$0xff]  }
  0xdf   : > { %3267 = vmatpush1.bf16.msra.mxu1 %v4637_v28  ;;  %3227 = vmatprep.subr.bf16.mxu0 %v4642_v29  ;;  %v4715_v28 = vld [vmem:[%s5458_s0 + $0xb20] ss:$16 sps:$4 sm:$0xff]   ;;  %v4720_v29 = vld [vmem:[%s5458_s0 + $0x904] ss:$16 sps:$4 sm:$0xff]  }
  0xe0   : > { %3268 = vmatprep.subr.bf16.mxu1 %v4645_v30  ;;  %v4723_v30 = vld [vmem:[%s5458_s0 + $0xb04] ss:$16 sps:$4 sm:$0xff]  }
  0xe2   : > { %3228 = vmatpush1.bf16.msra.mxu0 %v4640_v31  ;;  %v4718_v31 = vld [vmem:[%s5458_s0 + $0x900] ss:$16 sps:$4 sm:$0xff]  }
  0xe3   : > { %3269 = vmatpush1.bf16.msra.mxu1 %v4643_v32  ;;  %3229 = vmatprep.subr.bf16.mxu0 %v4648_v33  ;;  %v4721_v32 = vld [vmem:[%s5458_s0 + $0xb00] ss:$16 sps:$4 sm:$0xff]   ;;  %v4730_v33 = vld [vmem:[%s5458_s0 + $0xce4] ss:$16 sps:$4 sm:$0xff]  }
  0xe4   : > { %3270 = vmatprep.subr.bf16.mxu1 %v4651_v34  ;;  %v4733_v34 = vld [vmem:[%s5458_s0 + $0xec] ss:$16 sps:$4 sm:$0xff]  }
  0xe6   : > { %3230 = vmatpush1.bf16.msra.mxu0 %v4646_v35  ;;  %v5737_v35 = vcombine.low %v5658_v23, %v5658_v23 }
  0xe7   : > { %3271 = vmatpush1.bf16.msra.mxu1 %v4649_v36  ;;  %3231 = vmatprep.subr.bf16.mxu0 %v4654_v39  ;;  %v5741_v36 = vcombine.low %v5661_v24, %v5661_v24  ;;  %v4728_v39 = vld [vmem:[%s5458_s0 + $0xce0] ss:$16 sps:$4 sm:$0xff]  }
  0xe8   : > { %3272 = vmatprep.subr.bf16.mxu1 %v4657_v40  ;;  %v5745_v40 = vld [vmem:[%s5482_s9 + $0x30] sm:$0xff] }
  0xe9   : > { %v5752_v23 = vcombine.high %v5745_v40, %v5745_v40  ;;  %v4734_v24 = vld [vmem:[%s5458_s0 + $0xcc0] ss:$16 sps:$4 sm:$0xff]  }
  0xea   : > { %3232 = vmatpush1.bf16.msra.mxu0 %v4652_v41  ;;  %v4731_v41 = vld [vmem:[%s5458_s0 + $0xe8] ss:$16 sps:$4 sm:$0xff]  }
  0xeb   : > { %3273 = vmatpush1.bf16.msra.mxu1 %v4655_v42  ;;  %3233 = vmatprep.subr.bf16.mxu0 %v4660_v43  ;;  %v4736_v42 = vld [vmem:[%s5458_s0 + $0xcc4] ss:$16 sps:$4 sm:$0xff]   ;;  %v4739_v43 = vld [vmem:[%s5458_s0 + $0xcc] ss:$16 sps:$4 sm:$0xff]  }
  0xec   : > { %3274 = vmatprep.subr.bf16.mxu1 %v4663_v44  ;;  %v4737_v44 = vld [vmem:[%s5458_s0 + $0xc8] ss:$16 sps:$4 sm:$0xff]  }
  0xee   : > { %3234 = vmatpush1.bf16.msra.mxu0 %v4658_v45  ;;  %v4742_v45 = vld [vmem:[%s5458_s0 + $0xca4] ss:$16 sps:$4 sm:$0xff]  }
  0xef   : > { %3275 = vmatpush1.bf16.msra.mxu1 %v4661_v46  ;;  %3235 = vmatprep.subr.bf16.mxu0 %v4666_v47  ;;  %v4745_v46 = vld [vmem:[%s5458_s0 + $0xac] ss:$16 sps:$4 sm:$0xff]   ;;  %v4740_v47 = vld [vmem:[%s5458_s0 + $0xca0] ss:$16 sps:$4 sm:$0xff]  }
  0xf0   : > { %3276 = vmatprep.subr.bf16.mxu1 %v4669_v49  ;;  %v4743_v49 = vld [vmem:[%s5458_s0 + $0xa8] ss:$16 sps:$4 sm:$0xff]  }
  0xf2   : > { %3236 = vmatpush1.bf16.msra.mxu0 %v4664_v50  ;;  %v4748_v50 = vld [vmem:[%s5458_s0 + $0xc84] ss:$16 sps:$4 sm:$0xff]  }
  0xf3   : > { %3277 = vmatpush1.bf16.msra.mxu1 %v4667_v51  ;;  %3237 = vmatprep.subr.bf16.mxu0 %v4672_v53  ;;  %v4751_v51 = vld [vmem:[%s5458_s0 + $0x8c] ss:$16 sps:$4 sm:$0xff]   ;;  %v4746_v53 = vld [vmem:[%s5458_s0 + $0xc80] ss:$16 sps:$4 sm:$0xff]  }
  0xf4   : > { %3278 = vmatprep.subr.bf16.mxu1 %v4675_v54  ;;  %v4749_v54 = vld [vmem:[%s5458_s0 + $0x88] ss:$16 sps:$4 sm:$0xff]  }
  0xf6   : > { %3238 = vmatpush1.bf16.msra.mxu0 %v4670_v55  ;;  %v4757_v55 = vld [vmem:[%s5458_s0 + $0x6c] ss:$16 sps:$4 sm:$0xff]  }
  0xf7   : > { %3279 = vmatpush1.bf16.msra.mxu1 %v4673_v56  ;;  %3239 = vmatprep.subr.bf16.mxu0 %v4678_v57  ;;  %v4752_v56 = vld [vmem:[%s5458_s0 + $0xc60] ss:$16 sps:$4 sm:$0xff]   ;;  %v4755_v57 = vld [vmem:[%s5458_s0 + $0x68] ss:$16 sps:$4 sm:$0xff]  }
  0xf8   : > { %3280 = vmatprep.subr.bf16.mxu1 %v4681_v58  ;;  %v4760_v58 = vld [vmem:[%s5458_s0 + $0xc44] ss:$16 sps:$4 sm:$0xff]  }
  0xfa   : > { %3240 = vmatpush2.bf16.msra.mxu0 %v4676_v59  ;;  %v4763_v59 = vld [vmem:[%s5458_s0 + $0x4c] ss:$16 sps:$4 sm:$0xff]  }
  0xfb   : > { %3281 = vmatpush2.bf16.msra.mxu1 %v4679_v60  ;;  %3241 = vmatprep.subr.bf16.mxu0 %v4684_v61  ;;  %v4758_v60 = vld [vmem:[%s5458_s0 + $0xc40] ss:$16 sps:$4 sm:$0xff]   ;;  %v4761_v61 = vld [vmem:[%s5458_s0 + $0x48] ss:$16 sps:$4 sm:$0xff]  }
  0xfc   : > { %3282 = vmatprep.subr.bf16.mxu1 %v4687_v62  ;;  %v4766_v62 = vld [vmem:[%s5458_s0 + $0xc24] ss:$16 sps:$4 sm:$0xff]  }
  0xfe   : > { %3242 = vmatpush2.bf16.msra.mxu0 %v4682_v63  ;;  %v4769_v63 = vld [vmem:[%s5458_s0 + $0x2c] ss:$16 sps:$4 sm:$0xff]  }
  0xff   : > { %3283 = vmatpush2.bf16.msra.mxu1 %v4685_v0  ;;  %3243 = vmatprep.subr.bf16.mxu0 %v4690_v1  ;;  %v4764_v0 = vld [vmem:[%s5458_s0 + $0xc20] ss:$16 sps:$4 sm:$0xff]   ;;  %v4767_v1 = vld [vmem:[%s5458_s0 + $0x28] ss:$16 sps:$4 sm:$0xff]  }
 0x100   : > { %3284 = vmatprep.subr.bf16.mxu1 %v4693_v2  ;;  %v4772_v2 = vld [vmem:[%s5458_s0 + $0xc04] ss:$16 sps:$4 sm:$0xff]  }
 0x102   : > { %3244 = vmatpush2.bf16.msra.mxu0 %v4688_v3  ;;  %v4775_v3 = vld [vmem:[%s5458_s0 + $0xc] ss:$16 sps:$4 sm:$0xff]  }
 0x103   : > { %3285 = vmatpush2.bf16.msra.mxu1 %v4691_v4  ;;  %3245 = vmatprep.subr.bf16.mxu0 %v4696_v5  ;;  %v4770_v4 = vld [vmem:[%s5458_s0 + $0xc00] ss:$16 sps:$4 sm:$0xff]   ;;  %v4773_v5 = vld [vmem:[%s5458_s0 + $0x8] ss:$16 sps:$4 sm:$0xff]  }
 0x104   : > { %3286 = vmatprep.subr.bf16.mxu1 %v4699_v6  ;;  %v4778_v6 = vld [vmem:[%s5458_s0 + $0xde4] ss:$16 sps:$4 sm:$0xff]  }
 0x106   : > { %3246 = vmatpush2.bf16.msra.mxu0 %v4694_v9  ;;  %v4781_v9 = vld [vmem:[%s5458_s0 + $0x1ec] ss:$16 sps:$4 sm:$0xff]  }
 0x107   : > { %3287 = vmatpush2.bf16.msra.mxu1 %v4697_v10  ;;  %3247 = vmatprep.subr.bf16.mxu0 %v4702_v11  ;;  %v4776_v10 = vld [vmem:[%s5458_s0 + $0xde0] ss:$16 sps:$4 sm:$0xff]   ;;  %v4779_v11 = vld [vmem:[%s5458_s0 + $0x1e8] ss:$16 sps:$4 sm:$0xff]  }
 0x108   : > { %3288 = vmatprep.subr.bf16.mxu1 %v4705_v12  ;;  %v4784_v12 = vld [vmem:[%s5458_s0 + $0xdc4] ss:$16 sps:$4 sm:$0xff]  }
 0x10a   : > { %3248 = vmatpush2.bf16.msra.mxu0 %v4700_v13  ;;  %v4787_v13 = vld [vmem:[%s5458_s0 + $0x1cc] ss:$16 sps:$4 sm:$0xff]  }
 0x10b   : > { %3289 = vmatpush2.bf16.msra.mxu1 %v4703_v14  ;;  %3249 = vmatprep.subr.bf16.mxu0 %v4708_v15  ;;  %v4782_v14 = vld [vmem:[%s5458_s0 + $0xdc0] ss:$16 sps:$4 sm:$0xff]   ;;  %v4785_v15 = vld [vmem:[%s5458_s0 + $0x1c8] ss:$16 sps:$4 sm:$0xff]  }
 0x10c   : > { %3290 = vmatprep.subr.bf16.mxu1 %v4711_v16  ;;  %v4790_v16 = vld [vmem:[%s5458_s0 + $0xda4] ss:$16 sps:$4 sm:$0xff]  }
 0x10e   : > { %3250 = vmatpush2.bf16.msra.mxu0 %v4706_v19  ;;  %v4793_v19 = vld [vmem:[%s5458_s0 + $0x1ac] ss:$16 sps:$4 sm:$0xff]  }
 0x10f   : > { %3291 = vmatpush2.bf16.msra.mxu1 %v4709_v20  ;;  %3251 = vmatprep.subr.bf16.mxu0 %v4714_v21  ;;  %v4788_v20 = vld [vmem:[%s5458_s0 + $0xda0] ss:$16 sps:$4 sm:$0xff]   ;;  %v4791_v21 = vld [vmem:[%s5458_s0 + $0x1a8] ss:$16 sps:$4 sm:$0xff]  }
 0x110   : > { %3292 = vmatprep.subr.bf16.mxu1 %v4717_v22  ;;  %v4796_v22 = vld [vmem:[%s5458_s0 + $0xd84] ss:$16 sps:$4 sm:$0xff]  }
 0x112   : > { %3252 = vmatpush2.bf16.msra.mxu0 %v4712_v27  ;;  %v4799_v27 = vld [vmem:[%s5458_s0 + $0x18c] ss:$16 sps:$4 sm:$0xff]  }
 0x113   : > { %3293 = vmatpush2.bf16.msra.mxu1 %v4715_v28  ;;  %3253 = vmatprep.subr.bf16.mxu0 %v4720_v29  ;;  %v4794_v28 = vld [vmem:[%s5458_s0 + $0xd80] ss:$16 sps:$4 sm:$0xff]   ;;  %v4797_v29 = vld [vmem:[%s5458_s0 + $0x188] ss:$16 sps:$4 sm:$0xff]  }
 0x114   : > { %3294 = vmatprep.subr.bf16.mxu1 %v4723_v30  ;;  %v4802_v30 = vld [vmem:[%s5458_s0 + $0xd64] ss:$16 sps:$4 sm:$0xff]  }
 0x116   : > { %3254 = vmatpush2.bf16.msra.mxu0 %v4718_v31  ;;  %v4805_v31 = vld [vmem:[%s5458_s0 + $0x16c] ss:$16 sps:$4 sm:$0xff]  }
 0x117   : > { %3295 = vmatpush2.bf16.msra.mxu1 %v4721_v32  ;;  %3305 = vmatprep.subr.bf16.mxu0 %v4730_v33  ;;  %v4800_v32 = vld [vmem:[%s5458_s0 + $0xd60] ss:$16 sps:$4 sm:$0xff]   ;;  %v4803_v33 = vld [vmem:[%s5458_s0 + $0x168] ss:$16 sps:$4 sm:$0xff]  }
 0x118   : > { %3346 = vmatprep.subr.bf16.mxu1 %v4733_v34  ;;  %v4808_v34 = vld [vmem:[%s5458_s0 + $0xd44] ss:$16 sps:$4 sm:$0xff]  }
 0x119   : > { %3256 = vmatmul.mubr.bf16.vlgmr.msra.gmra.mxu0 %v5737_v35 }
 0x11a   : > { %3297 = vmatmul.mubr.bf16.vlgmr.msra.gmra.mxu1 %v5741_v36  ;;  %3306 = vmatpush1.bf16.msra.mxu0 %v4728_v39  ;;  %v4811_v39 = vld [vmem:[%s5458_s0 + $0x14c] ss:$16 sps:$4 sm:$0xff]  }
 0x11b   : > { %3347 = vmatpush1.bf16.msra.mxu1 %v4731_v41  ;;  %3307 = vmatprep.subr.bf16.mxu0 %v4736_v42  ;;  %v4806_v41 = vld [vmem:[%s5458_s0 + $0xd40] ss:$16 sps:$4 sm:$0xff]   ;;  %v4809_v42 = vld [vmem:[%s5458_s0 + $0x148] ss:$16 sps:$4 sm:$0xff]  }
 0x11c   : > { %3348 = vmatprep.subr.bf16.mxu1 %v4739_v43  ;;  %3337 = vmatprep.mubr.bf16.mxu0 %v5752_v23  ;;  %v4814_v43 = vld [vmem:[%s5458_s0 + $0xd24] ss:$16 sps:$4 sm:$0xff]  }
 0x11d   : > { %3378 = vmatprep.mubr.bf16.mxu1 %v5532_v48  ;;  %v4754_v48 = vld [vmem:[%s5458_s0 + $0xc64] ss:$16 sps:$4 sm:$0xff]  }
 0x11e   : > { %3308 = vmatpush1.bf16.msra.mxu0 %v4734_v24  ;;  %v4817_v24 = vld [vmem:[%s5458_s0 + $0x12c] ss:$16 sps:$4 sm:$0xff]  }
 0x11f   : > { %3349 = vmatpush1.bf16.msra.mxu1 %v4737_v44  ;;  %3309 = vmatprep.subr.bf16.mxu0 %v4742_v45  ;;  %v4812_v44 = vld [vmem:[%s5458_s0 + $0xd20] ss:$16 sps:$4 sm:$0xff]   ;;  %v4815_v45 = vld [vmem:[%s5458_s0 + $0x128] ss:$16 sps:$4 sm:$0xff]  }
 0x120   : > { %3350 = vmatprep.subr.bf16.mxu1 %v4745_v46  ;;  %v4820_v46 = vld [vmem:[%s5458_s0 + $0xd04] ss:$16 sps:$4 sm:$0xff]  }
 0x122   : > { %3310 = vmatpush1.bf16.msra.mxu0 %v4740_v47  ;;  %v4823_v47 = vld [vmem:[%s5458_s0 + $0x10c] ss:$16 sps:$4 sm:$0xff]  }
 0x123   : > { %3351 = vmatpush1.bf16.msra.mxu1 %v4743_v49  ;;  %3311 = vmatprep.subr.bf16.mxu0 %v4748_v50  ;;  %v4818_v49 = vld [vmem:[%s5458_s0 + $0xd00] ss:$16 sps:$4 sm:$0xff]   ;;  %v4821_v50 = vld [vmem:[%s5458_s0 + $0x108] ss:$16 sps:$4 sm:$0xff]  }
 0x124   : > { %3352 = vmatprep.subr.bf16.mxu1 %v4751_v51  ;;  %v4828_v51 = vld [vmem:[%s5458_s0 + $0x2ec] ss:$16 sps:$4 sm:$0xff]  }
 0x126   : > { %3312 = vmatpush1.bf16.msra.mxu0 %v4746_v53  ;;  %v4831_v53 = vld [vmem:[%s5458_s0 + $0x4ec] ss:$16 sps:$4 sm:$0xff]  }
 0x127   : > { %3353 = vmatpush1.bf16.msra.mxu1 %v4749_v54  ;;  %3313 = vmatprep.subr.bf16.mxu0 %v4754_v48  ;;  %v5820_v54 = vcombine.low %v5745_v40, %v5745_v40  ;;  %v4826_v48 = vld [vmem:[%s5458_s0 + $0x2e8] ss:$16 sps:$4 sm:$0xff]  }
 0x128   : > { %3354 = vmatprep.subr.bf16.mxu1 %v4757_v55  ;;  %v4829_v55 = vld [vmem:[%s5458_s0 + $0x4e8] ss:$16 sps:$4 sm:$0xff]  }
 0x12a   : > { %3314 = vmatpush1.bf16.msra.mxu0 %v4752_v56  ;;  %v4834_v56 = vld [vmem:[%s5458_s0 + $0x2cc] ss:$16 sps:$4 sm:$0xff]  }
 0x12b   : > { %3355 = vmatpush1.bf16.msra.mxu1 %v4755_v57  ;;  %3315 = vmatprep.subr.bf16.mxu0 %v4760_v58  ;;  %v4837_v57 = vld [vmem:[%s5458_s0 + $0x4cc] ss:$16 sps:$4 sm:$0xff]  }
 0x12c   : > { %3356 = vmatprep.subr.bf16.mxu1 %v4763_v59 }
 0x12e   : > { %3316 = vmatpush1.bf16.msra.mxu0 %v4758_v60  ;;  %v4832_v60 = vld [vmem:[%s5458_s0 + $0x2c8] ss:$16 sps:$4 sm:$0xff]  }
 0x12f   : > { %3357 = vmatpush1.bf16.msra.mxu1 %v4761_v61  ;;  %3317 = vmatprep.subr.bf16.mxu0 %v4766_v62  ;;  %v4835_v61 = vld [vmem:[%s5458_s0 + $0x4c8] ss:$16 sps:$4 sm:$0xff]   ;;  %v4840_v62 = vld [vmem:[%s5458_s0 + $0x2ac] ss:$16 sps:$4 sm:$0xff]  }
 0x130   : > { %3358 = vmatprep.subr.bf16.mxu1 %v4769_v63 }
 0x132   : > { %3318 = vmatpush1.bf16.msra.mxu0 %v4764_v0 }
 0x133   : > { %3359 = vmatpush1.bf16.msra.mxu1 %v4767_v1  ;;  %3319 = vmatprep.subr.bf16.mxu0 %v4772_v2  ;;  %v4843_v1 = vld [vmem:[%s5458_s0 + $0x4ac] ss:$16 sps:$4 sm:$0xff]  }
 0x134   : > { %3360 = vmatprep.subr.bf16.mxu1 %v4775_v3 }
 0x136   : > { %3320 = vmatpush1.bf16.msra.mxu0 %v4770_v4  ;;  %v4838_v4 = vld [vmem:[%s5458_s0 + $0x2a8] ss:$16 sps:$4 sm:$0xff]  }
 0x137   : > { %3361 = vmatpush1.bf16.msra.mxu1 %v4773_v5  ;;  %3321 = vmatprep.subr.bf16.mxu0 %v4778_v6  ;;  %v4841_v5 = vld [vmem:[%s5458_s0 + $0x4a8] ss:$16 sps:$4 sm:$0xff]  }
 0x138   : > { %3362 = vmatprep.subr.bf16.mxu1 %v4781_v9 }
 0x13a   : > { %3322 = vmatpush2.bf16.msra.mxu0 %v4776_v10  ;;  %v4846_v10 = vld [vmem:[%s5458_s0 + $0x28c] ss:$16 sps:$4 sm:$0xff]  }
 0x13b   : > { %3363 = vmatpush2.bf16.msra.mxu1 %v4779_v11  ;;  %3323 = vmatprep.subr.bf16.mxu0 %v4784_v12  ;;  %v4847_v11 = vld [vmem:[%s5458_s0 + $0x488] ss:$16 sps:$4 sm:$0xff]   ;;  %v4852_v12 = vld [vmem:[%s5458_s0 + $0x26c] ss:$16 sps:$4 sm:$0xff]  }
 0x13c   : > { %3364 = vmatprep.subr.bf16.mxu1 %v4787_v13  ;;  %v4855_v13 = vld [vmem:[%s5458_s0 + $0x46c] ss:$16 sps:$4 sm:$0xff]  }
 0x13e   : > { %3324 = vmatpush2.bf16.msra.mxu0 %v4782_v14  ;;  %v4850_v14 = vld [vmem:[%s5458_s0 + $0x268] ss:$16 sps:$4 sm:$0xff]  }
 0x13f   : > { %3365 = vmatpush2.bf16.msra.mxu1 %v4785_v15  ;;  %3325 = vmatprep.subr.bf16.mxu0 %v4790_v16  ;;  %v4853_v15 = vld [vmem:[%s5458_s0 + $0x468] ss:$16 sps:$4 sm:$0xff]   ;;  %v4858_v16 = vld [vmem:[%s5458_s0 + $0x24c] ss:$16 sps:$4 sm:$0xff]  }
 0x140   : > { %3366 = vmatprep.subr.bf16.mxu1 %v4793_v19  ;;  %v4861_v19 = vld [vmem:[%s5458_s0 + $0x44c] ss:$16 sps:$4 sm:$0xff]  }
 0x142   : > { %3326 = vmatpush2.bf16.msra.mxu0 %v4788_v20  ;;  %v4856_v20 = vld [vmem:[%s5458_s0 + $0x248] ss:$16 sps:$4 sm:$0xff]  }
 0x143   : > { %3367 = vmatpush2.bf16.msra.mxu1 %v4791_v21  ;;  %3327 = vmatprep.subr.bf16.mxu0 %v4796_v22  ;;  %v4859_v21 = vld [vmem:[%s5458_s0 + $0x448] ss:$16 sps:$4 sm:$0xff]   ;;  %v4864_v22 = vld [vmem:[%s5458_s0 + $0x22c] ss:$16 sps:$4 sm:$0xff]  }
 0x144   : > { %3368 = vmatprep.subr.bf16.mxu1 %v4799_v27  ;;  %v4867_v27 = vld [vmem:[%s5458_s0 + $0x42c] ss:$16 sps:$4 sm:$0xff]  }
 0x146   : > { %3328 = vmatpush2.bf16.msra.mxu0 %v4794_v28  ;;  %v4862_v28 = vld [vmem:[%s5458_s0 + $0x228] ss:$16 sps:$4 sm:$0xff]  }
 0x147   : > { %3369 = vmatpush2.bf16.msra.mxu1 %v4797_v29  ;;  %3329 = vmatprep.subr.bf16.mxu0 %v4802_v30  ;;  %v4865_v29 = vld [vmem:[%s5458_s0 + $0x428] ss:$16 sps:$4 sm:$0xff]   ;;  %v4870_v30 = vld [vmem:[%s5458_s0 + $0x20c] ss:$16 sps:$4 sm:$0xff]  }
 0x148   : > { %3370 = vmatprep.subr.bf16.mxu1 %v4805_v31  ;;  %v4873_v31 = vld [vmem:[%s5458_s0 + $0x40c] ss:$16 sps:$4 sm:$0xff]  }
 0x14a   : > { %3330 = vmatpush2.bf16.msra.mxu0 %v4800_v32  ;;  %v4868_v32 = vld [vmem:[%s5458_s0 + $0x208] ss:$16 sps:$4 sm:$0xff]  }
 0x14b   : > { %3371 = vmatpush2.bf16.msra.mxu1 %v4803_v33  ;;  %3331 = vmatprep.subr.bf16.mxu0 %v4808_v34  ;;  %v4871_v33 = vld [vmem:[%s5458_s0 + $0x408] ss:$16 sps:$4 sm:$0xff]   ;;  %v4876_v34 = vld [vmem:[%s5458_s0 + $0x3ec] ss:$16 sps:$4 sm:$0xff]  }
 0x14c   : > { %3372 = vmatprep.subr.bf16.mxu1 %v4811_v39  ;;  %v4879_v39 = vld [vmem:[%s5458_s0 + $0x5ec] ss:$16 sps:$4 sm:$0xff]  }
 0x14e   : > { %3332 = vmatpush2.bf16.msra.mxu0 %v4806_v41  ;;  %v4874_v41 = vld [vmem:[%s5458_s0 + $0x3e8] ss:$16 sps:$4 sm:$0xff]  }
 0x14f   : > { %3373 = vmatpush2.bf16.msra.mxu1 %v4809_v42  ;;  %3333 = vmatprep.subr.bf16.mxu0 %v4814_v43  ;;  %v4877_v42 = vld [vmem:[%s5458_s0 + $0x5e8] ss:$16 sps:$4 sm:$0xff]   ;;  %v4882_v43 = vld [vmem:[%s5458_s0 + $0x3cc] ss:$16 sps:$4 sm:$0xff]  }
 0x150   : > { %3374 = vmatprep.subr.bf16.mxu1 %v4817_v24  ;;  %v4885_v24 = vld [vmem:[%s5458_s0 + $0x5cc] ss:$16 sps:$4 sm:$0xff]  }
 0x152   : > { %3334 = vmatpush2.bf16.msra.mxu0 %v4812_v44  ;;  %v4880_v44 = vld [vmem:[%s5458_s0 + $0x3c8] ss:$16 sps:$4 sm:$0xff]  }
 0x153   : > { %3375 = vmatpush2.bf16.msra.mxu1 %v4815_v45  ;;  %3335 = vmatprep.subr.bf16.mxu0 %v4820_v46  ;;  %v4883_v45 = vld [vmem:[%s5458_s0 + $0x5c8] ss:$16 sps:$4 sm:$0xff]   ;;  %v4888_v46 = vld [vmem:[%s5458_s0 + $0x3ac] ss:$16 sps:$4 sm:$0xff]  }
 0x154   : > { %3376 = vmatprep.subr.bf16.mxu1 %v4823_v47  ;;  %v4891_v47 = vld [vmem:[%s5458_s0 + $0x5ac] ss:$16 sps:$4 sm:$0xff]  }
 0x156   : > { %3336 = vmatpush2.bf16.msra.mxu0 %v4818_v49  ;;  %v4886_v49 = vld [vmem:[%s5458_s0 + $0x3a8] ss:$16 sps:$4 sm:$0xff]  }
 0x157   : > { %3377 = vmatpush2.bf16.msra.mxu1 %v4821_v50  ;;  %3387 = vmatprep.subr.bf16.mxu0 %v4828_v51  ;;  %v4889_v50 = vld [vmem:[%s5458_s0 + $0x5a8] ss:$16 sps:$4 sm:$0xff]   ;;  %v4894_v51 = vld [vmem:[%s5458_s0 + $0x38c] ss:$16 sps:$4 sm:$0xff]  }
 0x158   : > { %3428 = vmatprep.subr.bf16.mxu1 %v4831_v53  ;;  %v4897_v53 = vld [vmem:[%s5458_s0 + $0x58c] ss:$16 sps:$4 sm:$0xff]  }
 0x159   : > { %v3093_v58 = vpop.f32.mrf.mxu0  ;;  %3338 = vmatmul.mubr.bf16.vlgmr.msra.gmra.mxu0 %v5820_v54 }
 0x15a   : > { %v3134_v59 = vpop.f32.mrf.mxu1  ;;  %3379 = vmatmul.mubr.bf16.vlgmr.msra.gmra.mxu1 %v5559_v7  ;;  %3388 = vmatpush1.bf16.msra.mxu0 %v4826_v48  ;;  %v4892_v48 = vld [vmem:[%s5458_s0 + $0x388] ss:$16 sps:$4 sm:$0xff]  }
 0x15b   : > { %v5829_v40 = vadd.f32 %v3134_v59, %v3093_v58  ;;  %3429 = vmatpush1.bf16.msra.mxu1 %v4829_v55  ;;  %v3095_v63 = vpop.f32.mrf.mxu0  ;;  %3389 = vmatprep.subr.bf16.mxu0 %v4834_v56  ;;  %v4895_v55 = vld [vmem:[%s5458_s0 + $0x588] ss:$16 sps:$4 sm:$0xff]   ;;  %v4900_v56 = vld [vmem:[%s5458_s0 + $0x36c] ss:$16 sps:$4 sm:$0xff]  }
 0x15c   : > { %v3136_v0 = vpop.f32.mrf.mxu1  ;;  %3430 = vmatprep.subr.bf16.mxu1 %v4837_v57  ;;  %3419 = vmatprep.mubr.bf16.mxu0 %v5537_v52  ;;  %v4849_v52 = vld [vmem:[%s5458_s0 + $0x48c] ss:$16 sps:$4 sm:$0xff]   ;;  %v4898_v58 = vld [vmem:[%s5458_s0 + $0x368] ss:$16 sps:$4 sm:$0xff]  }
 0x15d   : > { %v5834_v2 = vadd.f32 %v3136_v0, %v3095_v63  ;;  %3460 = vmatprep.mubr.bf16.mxu1 %v5599_v37  ;;  %v3097_v7 = vpop.f32.mrf.mxu0  ;;  %v4844_v37 = vld [vmem:[%s5458_s0 + $0x288] ss:$16 sps:$4 sm:$0xff]   ;;  %v4903_v57 = vld [vmem:[%s5458_s0 + $0x56c] ss:$16 sps:$4 sm:$0xff]  }
 0x15e   : > { %v3138_v3 = vpop.f32.mrf.mxu1  ;;  %3390 = vmatpush1.bf16.msra.mxu0 %v4832_v60  ;;  %v4901_v59 = vld [vmem:[%s5458_s0 + $0x568] ss:$16 sps:$4 sm:$0xff]   ;;  %v4906_v60 = vld [vmem:[%s5458_s0 + $0x34c] ss:$16 sps:$4 sm:$0xff]  }
 0x15f   : > { %3431 = vmatpush1.bf16.msra.mxu1 %v4835_v61  ;;  %v3098_v6 = vpop.f32.mrf.mxu0  ;;  %3391 = vmatprep.subr.bf16.mxu0 %v4840_v62  ;;  %v4909_v61 = vld [vmem:[%s5458_s0 + $0x54c] ss:$16 sps:$4 sm:$0xff]   ;;  %v4904_v62 = vld [vmem:[%s5458_s0 + $0x348] ss:$16 sps:$4 sm:$0xff]  }
 0x160   : > { %v3139_v9 = vpop.f32.mrf.mxu1  ;;  %3432 = vmatprep.subr.bf16.mxu1 %v4843_v1  ;;  %v4907_v63 = vld [vmem:[%s5458_s0 + $0x548] ss:$16 sps:$4 sm:$0xff]   ;;  %v4912_v0 = vld [vmem:[%s5458_s0 + $0x32c] ss:$16 sps:$4 sm:$0xff]  }
 0x161   : > { %v4915_v1 = vld [vmem:[%s5458_s0 + $0x52c] ss:$16 sps:$4 sm:$0xff]   ;;  %v4910_v7 = vld [vmem:[%s5458_s0 + $0x328] ss:$16 sps:$4 sm:$0xff]  }
 0x162   : > { %3392 = vmatpush1.bf16.msra.mxu0 %v4838_v4  ;;  %v4913_v3 = vld [vmem:[%s5458_s0 + $0x528] ss:$16 sps:$4 sm:$0xff]   ;;  %v4918_v4 = vld [vmem:[%s5458_s0 + $0x30c] ss:$16 sps:$4 sm:$0xff]  }
 0x163   : > { %3433 = vmatpush1.bf16.msra.mxu1 %v4841_v5  ;;  %3393 = vmatprep.subr.bf16.mxu0 %v4846_v10  ;;  %v4921_v5 = vld [vmem:[%s5458_s0 + $0x50c] ss:$16 sps:$4 sm:$0xff]   ;;  %v4916_v6 = vld [vmem:[%s5458_s0 + $0x308] ss:$16 sps:$4 sm:$0xff]  }
 0x164   : > { %3434 = vmatprep.subr.bf16.mxu1 %v4849_v52  ;;  %v4919_v9 = vld [vmem:[%s5458_s0 + $0x508] ss:$16 sps:$4 sm:$0xff]   ;;  %v4924_v10 = vld [vmem:[%s5458_s0 + $0x6ec] ss:$16 sps:$4 sm:$0xff]  }
 0x165   : > { %v4927_v52 = vld [vmem:[%s5458_s0 + $0x8ec] ss:$16 sps:$4 sm:$0xff]  }
 0x166   : > { %3394 = vmatpush1.bf16.msra.mxu0 %v4844_v37  ;;  %v4922_v37 = vld [vmem:[%s5458_s0 + $0x6e8] ss:$16 sps:$4 sm:$0xff]  }
 0x167   : > { %3435 = vmatpush1.bf16.msra.mxu1 %v4847_v11  ;;  %3395 = vmatprep.subr.bf16.mxu0 %v4852_v12  ;;  %v4925_v11 = vld [vmem:[%s5458_s0 + $0x8e8] ss:$16 sps:$4 sm:$0xff]   ;;  %v4930_v12 = vld [vmem:[%s5458_s0 + $0x6cc] ss:$16 sps:$4 sm:$0xff]  }
 0x168   : > { %3436 = vmatprep.subr.bf16.mxu1 %v4855_v13  ;;  %v4933_v13 = vld [vmem:[%s5458_s0 + $0x8cc] ss:$16 sps:$4 sm:$0xff]  }
 0x16a   : > { %3396 = vmatpush1.bf16.msra.mxu0 %v4850_v14 }
 0x16b   : > { %3437 = vmatpush1.bf16.msra.mxu1 %v4853_v15  ;;  %3397 = vmatprep.subr.bf16.mxu0 %v4858_v16 }
 0x16c   : > { %3438 = vmatprep.subr.bf16.mxu1 %v4861_v19  ;;  %v4928_v19 = vld [vmem:[%s5458_s0 + $0x6c8] ss:$16 sps:$4 sm:$0xff]  }
 0x16e   : > { %3398 = vmatpush1.bf16.msra.mxu0 %v4856_v20  ;;  %v4931_v20 = vld [vmem:[%s5458_s0 + $0x8c8] ss:$16 sps:$4 sm:$0xff]  }
 0x16f   : > { %3439 = vmatpush1.bf16.msra.mxu1 %v4859_v21  ;;  %3399 = vmatprep.subr.bf16.mxu0 %v4864_v22 }
 0x170   : > { %3440 = vmatprep.subr.bf16.mxu1 %v4867_v27  ;;  %v4936_v27 = vld [vmem:[%s5458_s0 + $0x6ac] ss:$16 sps:$4 sm:$0xff]  }
 0x172   : > { %3400 = vmatpush1.bf16.msra.mxu0 %v4862_v28  ;;  %v4939_v28 = vld [vmem:[%s5458_s0 + $0x8ac] ss:$16 sps:$4 sm:$0xff]  }
 0x173   : > { %3441 = vmatpush1.bf16.msra.mxu1 %v4865_v29  ;;  %3401 = vmatprep.subr.bf16.mxu0 %v4870_v30 }
 0x174   : > { %3442 = vmatprep.subr.bf16.mxu1 %v4873_v31  ;;  %v4934_v31 = vld [vmem:[%s5458_s0 + $0x6a8] ss:$16 sps:$4 sm:$0xff]  }
 0x176   : > { %3402 = vmatpush1.bf16.msra.mxu0 %v4868_v32  ;;  %v4937_v32 = vld [vmem:[%s5458_s0 + $0x8a8] ss:$16 sps:$4 sm:$0xff]  }
 0x177   : > { %3443 = vmatpush1.bf16.msra.mxu1 %v4871_v33  ;;  %3403 = vmatprep.subr.bf16.mxu0 %v4876_v34 }
 0x178   : > { %3444 = vmatprep.subr.bf16.mxu1 %v4879_v39  ;;  %v4943_v39 = vld [vmem:[%s5458_s0 + $0x888] ss:$16 sps:$4 sm:$0xff]  }
 0x17a   : > { %3404 = vmatpush2.bf16.msra.mxu0 %v4874_v41  ;;  %v4948_v41 = vld [vmem:[%s5458_s0 + $0x66c] ss:$16 sps:$4 sm:$0xff]  }
 0x17b   : > { %3445 = vmatpush2.bf16.msra.mxu1 %v4877_v42  ;;  %3405 = vmatprep.subr.bf16.mxu0 %v4882_v43  ;;  %v4951_v42 = vld [vmem:[%s5458_s0 + $0x86c] ss:$16 sps:$4 sm:$0xff]   ;;  %v4946_v43 = vld [vmem:[%s5458_s0 + $0x668] ss:$16 sps:$4 sm:$0xff]  }
 0x17c   : > { %3446 = vmatprep.subr.bf16.mxu1 %v4885_v24  ;;  %v4949_v24 = vld [vmem:[%s5458_s0 + $0x868] ss:$16 sps:$4 sm:$0xff]  }
 0x17e   : > { %3406 = vmatpush2.bf16.msra.mxu0 %v4880_v44  ;;  %v4954_v44 = vld [vmem:[%s5458_s0 + $0x64c] ss:$16 sps:$4 sm:$0xff]  }
 0x17f   : > { %3447 = vmatpush2.bf16.msra.mxu1 %v4883_v45  ;;  %3407 = vmatprep.subr.bf16.mxu0 %v4888_v46  ;;  %v4957_v45 = vld [vmem:[%s5458_s0 + $0x84c] ss:$16 sps:$4 sm:$0xff]   ;;  %v4952_v46 = vld [vmem:[%s5458_s0 + $0x648] ss:$16 sps:$4 sm:$0xff]  }
 0x180   : > { %3448 = vmatprep.subr.bf16.mxu1 %v4891_v47  ;;  %v4955_v47 = vld [vmem:[%s5458_s0 + $0x848] ss:$16 sps:$4 sm:$0xff]  }
 0x182   : > { %3408 = vmatpush2.bf16.msra.mxu0 %v4886_v49  ;;  %v4960_v49 = vld [vmem:[%s5458_s0 + $0x62c] ss:$16 sps:$4 sm:$0xff]  }
 0x183   : > { %3449 = vmatpush2.bf16.msra.mxu1 %v4889_v50  ;;  %3409 = vmatprep.subr.bf16.mxu0 %v4894_v51  ;;  %v4963_v50 = vld [vmem:[%s5458_s0 + $0x82c] ss:$16 sps:$4 sm:$0xff]   ;;  %v4958_v51 = vld [vmem:[%s5458_s0 + $0x628] ss:$16 sps:$4 sm:$0xff]  }
 0x184   : > { %3450 = vmatprep.subr.bf16.mxu1 %v4897_v53  ;;  %v4961_v53 = vld [vmem:[%s5458_s0 + $0x828] ss:$16 sps:$4 sm:$0xff]  }
 0x186   : > { %3410 = vmatpush2.bf16.msra.mxu0 %v4892_v48  ;;  %v4966_v48 = vld [vmem:[%s5458_s0 + $0x60c] ss:$16 sps:$4 sm:$0xff]  }
 0x187   : > { %3451 = vmatpush2.bf16.msra.mxu1 %v4895_v55  ;;  %3411 = vmatprep.subr.bf16.mxu0 %v4900_v56  ;;  %v4969_v55 = vld [vmem:[%s5458_s0 + $0x80c] ss:$16 sps:$4 sm:$0xff]   ;;  %v4964_v56 = vld [vmem:[%s5458_s0 + $0x608] ss:$16 sps:$4 sm:$0xff]  }
 0x188   : > { %3452 = vmatprep.subr.bf16.mxu1 %v4903_v57  ;;  %v4967_v57 = vld [vmem:[%s5458_s0 + $0x808] ss:$16 sps:$4 sm:$0xff]  }
 0x18a   : > { %3412 = vmatpush2.bf16.msra.mxu0 %v4898_v58  ;;  %v4972_v58 = vld [vmem:[%s5458_s0 + $0x7ec] ss:$16 sps:$4 sm:$0xff]  }
 0x18b   : > { %3453 = vmatpush2.bf16.msra.mxu1 %v4901_v59  ;;  %3413 = vmatprep.subr.bf16.mxu0 %v4906_v60  ;;  %v4975_v59 = vld [vmem:[%s5458_s0 + $0x9ec] ss:$16 sps:$4 sm:$0xff]   ;;  %v4970_v60 = vld [vmem:[%s5458_s0 + $0x7e8] ss:$16 sps:$4 sm:$0xff]  }
 0x18c   : > { %3454 = vmatprep.subr.bf16.mxu1 %v4909_v61  ;;  %v4973_v61 = vld [vmem:[%s5458_s0 + $0x9e8] ss:$16 sps:$4 sm:$0xff]  }
 0x18e   : > { %3414 = vmatpush2.bf16.msra.mxu0 %v4904_v62  ;;  %v4978_v62 = vld [vmem:[%s5458_s0 + $0x7cc] ss:$16 sps:$4 sm:$0xff]  }
 0x18f   : > { %3455 = vmatpush2.bf16.msra.mxu1 %v4907_v63  ;;  %3415 = vmatprep.subr.bf16.mxu0 %v4912_v0  ;;  %v4981_v63 = vld [vmem:[%s5458_s0 + $0x9cc] ss:$16 sps:$4 sm:$0xff]   ;;  %v4976_v0 = vld [vmem:[%s5458_s0 + $0x7c8] ss:$16 sps:$4 sm:$0xff]  }
 0x190   : > { %3456 = vmatprep.subr.bf16.mxu1 %v4915_v1  ;;  %v4979_v1 = vld [vmem:[%s5458_s0 + $0x9c8] ss:$16 sps:$4 sm:$0xff]  }
 0x192   : > { %3416 = vmatpush2.bf16.msra.mxu0 %v4910_v7  ;;  %v4984_v7 = vld [vmem:[%s5458_s0 + $0x7ac] ss:$16 sps:$4 sm:$0xff]  }
 0x193   : > { %3457 = vmatpush2.bf16.msra.mxu1 %v4913_v3  ;;  %3417 = vmatprep.subr.bf16.mxu0 %v4918_v4  ;;  %v4987_v3 = vld [vmem:[%s5458_s0 + $0x9ac] ss:$16 sps:$4 sm:$0xff]   ;;  %v4982_v4 = vld [vmem:[%s5458_s0 + $0x7a8] ss:$16 sps:$4 sm:$0xff]  }
 0x194   : > { %3458 = vmatprep.subr.bf16.mxu1 %v4921_v5  ;;  %v4985_v5 = vld [vmem:[%s5458_s0 + $0x9a8] ss:$16 sps:$4 sm:$0xff]  }
 0x196   : > { %3418 = vmatpush2.bf16.msra.mxu0 %v4916_v6  ;;  %v4990_v6 = vld [vmem:[%s5458_s0 + $0x78c] ss:$16 sps:$4 sm:$0xff]  }
 0x197   : > { %3459 = vmatpush2.bf16.msra.mxu1 %v4919_v9  ;;  %3469 = vmatprep.subr.bf16.mxu0 %v4924_v10  ;;  %v4993_v9 = vld [vmem:[%s5458_s0 + $0x98c] ss:$16 sps:$4 sm:$0xff]   ;;  %v4988_v10 = vld [vmem:[%s5458_s0 + $0x788] ss:$16 sps:$4 sm:$0xff]  }
 0x198   : > { %3510 = vmatprep.subr.bf16.mxu1 %v4927_v52  ;;  %v4991_v52 = vld [vmem:[%s5458_s0 + $0x988] ss:$16 sps:$4 sm:$0xff]  }
 0x199   : > { %v3175_v14 = vpop.f32.mrf.mxu0  ;;  %3420 = vmatmul.mubr.bf16.vlgmr.msra.gmra.mxu0 %v5561_v8 }
 0x19a   : > { %v3216_v15 = vpop.f32.mrf.mxu1  ;;  %3461 = vmatmul.mubr.bf16.vlgmr.msra.gmra.mxu1 %v5647_v17  ;;  %v3176_v16 = vadd.f32 %v3175_v14, %v5829_v40  ;;  %3470 = vmatpush1.bf16.msra.mxu0 %v4922_v37  ;;  %v4996_v37 = vld [vmem:[%s5458_s0 + $0x76c] ss:$16 sps:$4 sm:$0xff]  }
 0x19b   : > { %3511 = vmatpush1.bf16.msra.mxu1 %v4925_v11  ;;  %v3177_v21 = vpop.f32.mrf.mxu0  ;;  %3471 = vmatprep.subr.bf16.mxu0 %v4930_v12  ;;  %v4999_v11 = vld [vmem:[%s5458_s0 + $0x96c] ss:$16 sps:$4 sm:$0xff]   ;;  %v4994_v12 = vld [vmem:[%s5458_s0 + $0x768] ss:$16 sps:$4 sm:$0xff]  }
 0x19c   : > { %v3218_v22 = vpop.f32.mrf.mxu1  ;;  %3512 = vmatprep.subr.bf16.mxu1 %v4933_v13  ;;  %v5905_v29 = vadd.f32 %v3216_v15, %v3176_v16  ;;  %v3178_v8 = vadd.f32 %v3177_v21, %v5834_v2  ;;  %3501 = vmatprep.mubr.bf16.mxu0 %v5603_v38  ;;  %v4942_v38 = vld [vmem:[%s5458_s0 + $0x68c] ss:$16 sps:$4 sm:$0xff]   ;;  %v4940_v2 = vld [vmem:[%s5458_s0 + $0x688] ss:$16 sps:$4 sm:$0xff]  }
 0x19d   : > { %3542 = vmatprep.mubr.bf16.mxu1 %v5665_v25  ;;  %v3179_v17 = vpop.f32.mrf.mxu0  ;;  %v4945_v25 = vld [vmem:[%s5458_s0 + $0x88c] ss:$16 sps:$4 sm:$0xff]   ;;  %v4997_v13 = vld [vmem:[%s5458_s0 + $0x968] ss:$16 sps:$4 sm:$0xff]  }
 0x19e   : > { %v3220_v40 = vpop.f32.mrf.mxu1  ;;  %v5910_v30 = vadd.f32 %v3218_v22, %v3178_v8  ;;  %3472 = vmatpush1.bf16.msra.mxu0 %v4928_v19  ;;  %v5002_v14 = vld [vmem:[%s5458_s0 + $0x74c] ss:$16 sps:$4 sm:$0xff]   ;;  %v5000_v16 = vld [vmem:[%s5458_s0 + $0x748] ss:$16 sps:$4 sm:$0xff]  }
 0x19f   : > { %3513 = vmatpush1.bf16.msra.mxu1 %v4931_v20  ;;  %v3180_v33 = vpop.f32.mrf.mxu0  ;;  %3473 = vmatprep.subr.bf16.mxu0 %v4936_v27  ;;  %v5005_v15 = vld [vmem:[%s5458_s0 + $0x94c] ss:$16 sps:$4 sm:$0xff]   ;;  %v5003_v19 = vld [vmem:[%s5458_s0 + $0x948] ss:$16 sps:$4 sm:$0xff]  }
 0x1a0   : > { %v3221_v34 = vpop.f32.mrf.mxu1  ;;  %3514 = vmatprep.subr.bf16.mxu1 %v4939_v28  ;;  %v5008_v20 = vld [vmem:[%s5458_s0 + $0x72c] ss:$16 sps:$4 sm:$0xff]   ;;  %v5006_v22 = vld [vmem:[%s5458_s0 + $0x728] ss:$16 sps:$4 sm:$0xff]  }
 0x1a1   : > { %v5011_v21 = vld [vmem:[%s5458_s0 + $0x92c] ss:$16 sps:$4 sm:$0xff]   ;;  %v5009_v27 = vld [vmem:[%s5458_s0 + $0x928] ss:$16 sps:$4 sm:$0xff]  }
 0x1a2   : > { %3474 = vmatpush1.bf16.msra.mxu0 %v4934_v31  ;;  %v5014_v28 = vld [vmem:[%s5458_s0 + $0x70c] ss:$16 sps:$4 sm:$0xff]   ;;  %v5012_v17 = vld [vmem:[%s5458_s0 + $0x708] ss:$16 sps:$4 sm:$0xff]  }
 0x1a3   : > { %3515 = vmatpush1.bf16.msra.mxu1 %v4937_v32  ;;  %3475 = vmatprep.subr.bf16.mxu0 %v4942_v38  ;;  %v5017_v8 = vld [vmem:[%s5458_s0 + $0x90c] ss:$16 sps:$4 sm:$0xff]   ;;  %v5015_v40 = vld [vmem:[%s5458_s0 + $0x908] ss:$16 sps:$4 sm:$0xff]  }
 0x1a4   : > { %3516 = vmatprep.subr.bf16.mxu1 %v4945_v25  ;;  %v5020_v31 = vld [vmem:[%s5458_s0 + $0xaec] ss:$16 sps:$4 sm:$0xff]   ;;  %v5018_v33 = vld [vmem:[%s5458_s0 + $0xae8] ss:$16 sps:$4 sm:$0xff]  }
 0x1a5   : > { %v5023_v32 = vld [vmem:[%s5458_s0 + $0xcec] ss:$16 sps:$4 sm:$0xff]   ;;  %v5021_v34 = vld [vmem:[%s5458_s0 + $0xce8] ss:$16 sps:$4 sm:$0xff]  }
 0x1a6   : > { %3476 = vmatpush1.bf16.msra.mxu0 %v4940_v2  ;;  %v5026_v38 = vld [vmem:[%s5458_s0 + $0xacc] ss:$16 sps:$4 sm:$0xff]  }
 0x1a7   : > { %3517 = vmatpush1.bf16.msra.mxu1 %v4943_v39  ;;  %3477 = vmatprep.subr.bf16.mxu0 %v4948_v41  ;;  %v5029_v25 = vld [vmem:[%s5458_s0 + $0xccc] ss:$16 sps:$4 sm:$0xff]   ;;  %v5024_v41 = vld [vmem:[%s5458_s0 + $0xac8] ss:$16 sps:$4 sm:$0xff]  }
 0x1a8   : > { %3518 = vmatprep.subr.bf16.mxu1 %v4951_v42  ;;  %v5027_v42 = vld [vmem:[%s5458_s0 + $0xcc8] ss:$16 sps:$4 sm:$0xff]  }
 0x1aa   : > { %3478 = vmatpush1.bf16.msra.mxu0 %v4946_v43 }
 0x1ab   : > { %3519 = vmatpush1.bf16.msra.mxu1 %v4949_v24  ;;  %3479 = vmatprep.subr.bf16.mxu0 %v4954_v44  ;;  %v5032_v44 = vld [vmem:[%s5458_s0 + $0xaac] ss:$16 sps:$4 sm:$0xff]  }
 0x1ac   : > { %3520 = vmatprep.subr.bf16.mxu1 %v4957_v45  ;;  %v5035_v45 = vld [vmem:[%s5458_s0 + $0xcac] ss:$16 sps:$4 sm:$0xff]  }
 0x1ae   : > { %3480 = vmatpush1.bf16.msra.mxu0 %v4952_v46  ;;  %v5030_v46 = vld [vmem:[%s5458_s0 + $0xaa8] ss:$16 sps:$4 sm:$0xff]  }
 0x1af   : > { %3521 = vmatpush1.bf16.msra.mxu1 %v4955_v47  ;;  %3481 = vmatprep.subr.bf16.mxu0 %v4960_v49  ;;  %v5033_v47 = vld [vmem:[%s5458_s0 + $0xca8] ss:$16 sps:$4 sm:$0xff]  }
 0x1b0   : > { %3522 = vmatprep.subr.bf16.mxu1 %v4963_v50 }
 0x1b2   : > { %3482 = vmatpush1.bf16.msra.mxu0 %v4958_v51  ;;  %v5038_v51 = vld [vmem:[%s5458_s0 + $0xa8c] ss:$16 sps:$4 sm:$0xff]  }
 0x1b3   : > { %3523 = vmatpush1.bf16.msra.mxu1 %v4961_v53  ;;  %3483 = vmatprep.subr.bf16.mxu0 %v4966_v48  ;;  %v5039_v53 = vld [vmem:[%s5458_s0 + $0xc88] ss:$16 sps:$4 sm:$0xff]   ;;  %v5044_v48 = vld [vmem:[%s5458_s0 + $0xa6c] ss:$16 sps:$4 sm:$0xff]  }
 0x1b4   : > { %3524 = vmatprep.subr.bf16.mxu1 %v4969_v55  ;;  %v5047_v55 = vld [vmem:[%s5458_s0 + $0xc6c] ss:$16 sps:$4 sm:$0xff]  }
 0x1b6   : > { %3484 = vmatpush1.bf16.msra.mxu0 %v4964_v56  ;;  %v5042_v56 = vld [vmem:[%s5458_s0 + $0xa68] ss:$16 sps:$4 sm:$0xff]  }
 0x1b7   : > { %3525 = vmatpush1.bf16.msra.mxu1 %v4967_v57  ;;  %3485 = vmatprep.subr.bf16.mxu0 %v4972_v58  ;;  %v5045_v57 = vld [vmem:[%s5458_s0 + $0xc68] ss:$16 sps:$4 sm:$0xff]   ;;  %v5050_v58 = vld [vmem:[%s5458_s0 + $0xa4c] ss:$16 sps:$4 sm:$0xff]  }
 0x1b8   : > { %3526 = vmatprep.subr.bf16.mxu1 %v4975_v59  ;;  %v5053_v59 = vld [vmem:[%s5458_s0 + $0xc4c] ss:$16 sps:$4 sm:$0xff]  }
 0x1ba   : > { %3486 = vmatpush2.bf16.msra.mxu0 %v4970_v60  ;;  %v5048_v60 = vld [vmem:[%s5458_s0 + $0xa48] ss:$16 sps:$4 sm:$0xff]  }
 0x1bb   : > { %3527 = vmatpush2.bf16.msra.mxu1 %v4973_v61  ;;  %3487 = vmatprep.subr.bf16.mxu0 %v4978_v62  ;;  %v5051_v61 = vld [vmem:[%s5458_s0 + $0xc48] ss:$16 sps:$4 sm:$0xff]   ;;  %v5056_v62 = vld [vmem:[%s5458_s0 + $0xa2c] ss:$16 sps:$4 sm:$0xff]  }
 0x1bc   : > { %3528 = vmatprep.subr.bf16.mxu1 %v4981_v63  ;;  %v5059_v63 = vld [vmem:[%s5458_s0 + $0xc2c] ss:$16 sps:$4 sm:$0xff]  }
 0x1be   : > { %3488 = vmatpush2.bf16.msra.mxu0 %v4976_v0  ;;  %v5054_v0 = vld [vmem:[%s5458_s0 + $0xa28] ss:$16 sps:$4 sm:$0xff]  }
 0x1bf   : > { %3529 = vmatpush2.bf16.msra.mxu1 %v4979_v1  ;;  %3489 = vmatprep.subr.bf16.mxu0 %v4984_v7  ;;  %v5057_v1 = vld [vmem:[%s5458_s0 + $0xc28] ss:$16 sps:$4 sm:$0xff]   ;;  %v5062_v7 = vld [vmem:[%s5458_s0 + $0xa0c] ss:$16 sps:$4 sm:$0xff]  }
 0x1c0   : > { %3530 = vmatprep.subr.bf16.mxu1 %v4987_v3  ;;  %v5065_v3 = vld [vmem:[%s5458_s0 + $0xc0c] ss:$16 sps:$4 sm:$0xff]  }
 0x1c2   : > { %3490 = vmatpush2.bf16.msra.mxu0 %v4982_v4  ;;  %v5060_v4 = vld [vmem:[%s5458_s0 + $0xa08] ss:$16 sps:$4 sm:$0xff]  }
 0x1c3   : > { %3531 = vmatpush2.bf16.msra.mxu1 %v4985_v5  ;;  %3491 = vmatprep.subr.bf16.mxu0 %v4990_v6  ;;  %v5063_v5 = vld [vmem:[%s5458_s0 + $0xc08] ss:$16 sps:$4 sm:$0xff]   ;;  %v5068_v6 = vld [vmem:[%s5458_s0 + $0xbec] ss:$16 sps:$4 sm:$0xff]  }
 0x1c4   : > { %3532 = vmatprep.subr.bf16.mxu1 %v4993_v9  ;;  %v5071_v9 = vld [vmem:[%s5458_s0 + $0xdec] ss:$16 sps:$4 sm:$0xff]  }
 0x1c6   : > { %3492 = vmatpush2.bf16.msra.mxu0 %v4988_v10  ;;  %v5066_v10 = vld [vmem:[%s5458_s0 + $0xbe8] ss:$16 sps:$4 sm:$0xff]  }
 0x1c7   : > { %3533 = vmatpush2.bf16.msra.mxu1 %v4991_v52  ;;  %3493 = vmatprep.subr.bf16.mxu0 %v4996_v37  ;;  %v5069_v52 = vld [vmem:[%s5458_s0 + $0xde8] ss:$16 sps:$4 sm:$0xff]   ;;  %v5074_v37 = vld [vmem:[%s5458_s0 + $0xbcc] ss:$16 sps:$4 sm:$0xff]  }
 0x1c8   : > { %3534 = vmatprep.subr.bf16.mxu1 %v4999_v11  ;;  %v5077_v11 = vld [vmem:[%s5458_s0 + $0xdcc] ss:$16 sps:$4 sm:$0xff]  }
 0x1ca   : > { %3494 = vmatpush2.bf16.msra.mxu0 %v4994_v12  ;;  %v5072_v12 = vld [vmem:[%s5458_s0 + $0xbc8] ss:$16 sps:$4 sm:$0xff]  }
 0x1cb   : > { %3535 = vmatpush2.bf16.msra.mxu1 %v4997_v13  ;;  %3495 = vmatprep.subr.bf16.mxu0 %v5002_v14  ;;  %v5075_v13 = vld [vmem:[%s5458_s0 + $0xdc8] ss:$16 sps:$4 sm:$0xff]   ;;  %v5080_v14 = vld [vmem:[%s5458_s0 + $0xbac] ss:$16 sps:$4 sm:$0xff]  }
 0x1cc   : > { %3536 = vmatprep.subr.bf16.mxu1 %v5005_v15  ;;  %v5083_v15 = vld [vmem:[%s5458_s0 + $0xdac] ss:$16 sps:$4 sm:$0xff]  }
 0x1ce   : > { %3496 = vmatpush2.bf16.msra.mxu0 %v5000_v16  ;;  %v5078_v16 = vld [vmem:[%s5458_s0 + $0xba8] ss:$16 sps:$4 sm:$0xff]  }
 0x1cf   : > { %3537 = vmatpush2.bf16.msra.mxu1 %v5003_v19  ;;  %3497 = vmatprep.subr.bf16.mxu0 %v5008_v20  ;;  %v5081_v19 = vld [vmem:[%s5458_s0 + $0xda8] ss:$16 sps:$4 sm:$0xff]   ;;  %v5086_v20 = vld [vmem:[%s5458_s0 + $0xb8c] ss:$16 sps:$4 sm:$0xff]  }
 0x1d0   : > { %3538 = vmatprep.subr.bf16.mxu1 %v5011_v21  ;;  %v5089_v21 = vld [vmem:[%s5458_s0 + $0xd8c] ss:$16 sps:$4 sm:$0xff]  }
 0x1d2   : > { %3498 = vmatpush2.bf16.msra.mxu0 %v5006_v22  ;;  %v5084_v22 = vld [vmem:[%s5458_s0 + $0xb88] ss:$16 sps:$4 sm:$0xff]  }
 0x1d3   : > { %3539 = vmatpush2.bf16.msra.mxu1 %v5009_v27  ;;  %3499 = vmatprep.subr.bf16.mxu0 %v5014_v28  ;;  %v5087_v27 = vld [vmem:[%s5458_s0 + $0xd88] ss:$16 sps:$4 sm:$0xff]   ;;  %v5092_v28 = vld [vmem:[%s5458_s0 + $0xb6c] ss:$16 sps:$4 sm:$0xff]  }
 0x1d4   : > { %3540 = vmatprep.subr.bf16.mxu1 %v5017_v8  ;;  %v5095_v8 = vld [vmem:[%s5458_s0 + $0xd6c] ss:$16 sps:$4 sm:$0xff]  }
 0x1d6   : > { %3500 = vmatpush2.bf16.msra.mxu0 %v5012_v17  ;;  %v5090_v17 = vld [vmem:[%s5458_s0 + $0xb68] ss:$16 sps:$4 sm:$0xff]  }
 0x1d7   : > { %3541 = vmatpush2.bf16.msra.mxu1 %v5015_v40  ;;  %3551 = vmatprep.subr.bf16.mxu0 %v5020_v31  ;;  %v5093_v40 = vld [vmem:[%s5458_s0 + $0xd68] ss:$16 sps:$4 sm:$0xff]   ;;  %v5098_v31 = vld [vmem:[%s5458_s0 + $0xb4c] ss:$16 sps:$4 sm:$0xff]  }
 0x1d8   : > { %3592 = vmatprep.subr.bf16.mxu1 %v5023_v32  ;;  %v5101_v32 = vld [vmem:[%s5458_s0 + $0xd4c] ss:$16 sps:$4 sm:$0xff]  }
 0x1d9   : > { %v5972_v2 = vpop.f32.mrf.mxu0  ;;  %3502 = vmatmul.mubr.bf16.vlgmr.msra.gmra.mxu0 %v5651_v18 }
 0x1da   : > { %v5974_v39 = vpop.f32.mrf.mxu1  ;;  %3543 = vmatmul.mubr.bf16.vlgmr.msra.gmra.mxu1 %v5737_v35  ;;  %3552 = vmatpush1.bf16.msra.mxu0 %v5018_v33  ;;  %v5096_v33 = vld [vmem:[%s5458_s0 + $0xb48] ss:$16 sps:$4 sm:$0xff]  }
 0x1db   : > { %3593 = vmatpush1.bf16.msra.mxu1 %v5021_v34  ;;  %v5980_v43 = vpop.f32.mrf.mxu0  ;;  %3553 = vmatprep.subr.bf16.mxu0 %v5026_v38  ;;  %v5099_v34 = vld [vmem:[%s5458_s0 + $0xd48] ss:$16 sps:$4 sm:$0xff]   ;;  %v5104_v38 = vld [vmem:[%s5458_s0 + $0xb2c] ss:$16 sps:$4 sm:$0xff]  }
 0x1dc   : > { %v5982_v24 = vpop.f32.mrf.mxu1  ;;  %3594 = vmatprep.subr.bf16.mxu1 %v5029_v25  ;;  %3583 = vmatprep.mubr.bf16.mxu0 %v5669_v26  ;;  %v5041_v26 = vld [vmem:[%s5458_s0 + $0xc8c] ss:$16 sps:$4 sm:$0xff]  }
 0x1dd   : > { %3624 = vmatprep.mubr.bf16.mxu1 %v5752_v23  ;;  %v3261_v18 = vpop.f32.mrf.mxu0  ;;  %v5036_v23 = vld [vmem:[%s5458_s0 + $0xa88] ss:$16 sps:$4 sm:$0xff]   ;;  %v5107_v25 = vld [vmem:[%s5458_s0 + $0xd2c] ss:$16 sps:$4 sm:$0xff]  }
 0x1de   : > { %v3302_v35 = vpop.f32.mrf.mxu1  ;;  %3554 = vmatpush1.bf16.msra.mxu0 %v5024_v41  ;;  %v5102_v41 = vld [vmem:[%s5458_s0 + $0xb28] ss:$16 sps:$4 sm:$0xff]  }
 0x1df   : > { %3595 = vmatpush1.bf16.msra.mxu1 %v5027_v42  ;;  %v3262_v49 = vpop.f32.mrf.mxu0  ;;  %3555 = vmatprep.subr.bf16.mxu0 %v5032_v44  ;;  %v5105_v42 = vld [vmem:[%s5458_s0 + $0xd28] ss:$16 sps:$4 sm:$0xff]   ;;  %v5110_v44 = vld [vmem:[%s5458_s0 + $0xb0c] ss:$16 sps:$4 sm:$0xff]  }
 0x1e0   : > { %v3303_v50 = vpop.f32.mrf.mxu1  ;;  %3596 = vmatprep.subr.bf16.mxu1 %v5035_v45  ;;  %v5113_v45 = vld [vmem:[%s5458_s0 + $0xd0c] ss:$16 sps:$4 sm:$0xff]   ;;  %v5108_v18 = vld [vmem:[%s5458_s0 + $0xb08] ss:$16 sps:$4 sm:$0xff]  }
 0x1e1   : > { %v5111_v35 = vld [vmem:[%s5458_s0 + $0xd08] ss:$16 sps:$4 sm:$0xff]   ;;  %v311_v50 = vld [vmem:[#allocation2 + $0x10] sm:$0xff] }
 0x1e2   : > { %3556 = vmatpush1.bf16.msra.mxu0 %v5030_v46  ;;  %v3258_v46 = vadd.f32 %v5972_v2, %v5905_v29 }
 0x1e3   : > { %3597 = vmatpush1.bf16.msra.mxu1 %v5033_v47  ;;  %3557 = vmatprep.subr.bf16.mxu0 %v5038_v51  ;;  %v3260_v47 = vadd.f32 %v5980_v43, %v5910_v30 }
 0x1e4   : > { %3598 = vmatprep.subr.bf16.mxu1 %v5041_v26  ;;  %v3299_v49 = vadd.f32 %v5974_v39, %v3258_v46 }
 0x1e6   : > { %3558 = vmatpush1.bf16.msra.mxu0 %v5036_v23  ;;  %v3301_v23 = vadd.f32 %v5982_v24, %v3260_v47 }
 0x1e7   : > { %3599 = vmatpush1.bf16.msra.mxu1 %v5039_v53  ;;  %3559 = vmatprep.subr.bf16.mxu0 %v5044_v48  ;;  %v312_v48 = vld [vmem:[#allocation2] sm:$0xff] }
 0x1e8   : > { %3600 = vmatprep.subr.bf16.mxu1 %v5047_v55 }
 0x1ea   : > { %3560 = vmatpush1.bf16.msra.mxu0 %v5042_v56 }
 0x1eb   : > { %3601 = vmatpush1.bf16.msra.mxu1 %v5045_v57  ;;  %3561 = vmatprep.subr.bf16.mxu0 %v5050_v58 }
 0x1ec   : > { %3602 = vmatprep.subr.bf16.mxu1 %v5053_v59 }
 0x1ee   : > { %3562 = vmatpush1.bf16.msra.mxu0 %v5048_v60 }
 0x1ef   : > { %3603 = vmatpush1.bf16.msra.mxu1 %v5051_v61  ;;  %3563 = vmatprep.subr.bf16.mxu0 %v5056_v62 }
 0x1f0   : > { %3604 = vmatprep.subr.bf16.mxu1 %v5059_v63 }
 0x1f2   : > { %3564 = vmatpush1.bf16.msra.mxu0 %v5054_v0 }
 0x1f3   : > { %3605 = vmatpush1.bf16.msra.mxu1 %v5057_v1  ;;  %3565 = vmatprep.subr.bf16.mxu0 %v5062_v7 }
 0x1f4   : > { %3606 = vmatprep.subr.bf16.mxu1 %v5065_v3 }
 0x1f6   : > { %3566 = vmatpush1.bf16.msra.mxu0 %v5060_v4 }
 0x1f7   : > { %3607 = vmatpush1.bf16.msra.mxu1 %v5063_v5  ;;  %3567 = vmatprep.subr.bf16.mxu0 %v5068_v6 }
 0x1f8   : > { %3608 = vmatprep.subr.bf16.mxu1 %v5071_v9 }
 0x1fa   : > { %3568 = vmatpush2.bf16.msra.mxu0 %v5066_v10 }
 0x1fb   : > { %3609 = vmatpush2.bf16.msra.mxu1 %v5069_v52  ;;  %3569 = vmatprep.subr.bf16.mxu0 %v5074_v37 }
 0x1fc   : > { %3610 = vmatprep.subr.bf16.mxu1 %v5077_v11 }
 0x1fe   : > { %3570 = vmatpush2.bf16.msra.mxu0 %v5072_v12 }
 0x1ff   : > { %3611 = vmatpush2.bf16.msra.mxu1 %v5075_v13  ;;  %3571 = vmatprep.subr.bf16.mxu0 %v5080_v14 }
 0x200   : > { %3612 = vmatprep.subr.bf16.mxu1 %v5083_v15 }
 0x202   : > { %3572 = vmatpush2.bf16.msra.mxu0 %v5078_v16 }
 0x203   : > { %3613 = vmatpush2.bf16.msra.mxu1 %v5081_v19  ;;  %3573 = vmatprep.subr.bf16.mxu0 %v5086_v20 }
 0x204   : > { %3614 = vmatprep.subr.bf16.mxu1 %v5089_v21  ;;  %v313_v21 = vld [vmem:[#allocation2 + $0x18] sm:$0xff] }
 0x206   : > { %3574 = vmatpush2.bf16.msra.mxu0 %v5084_v22 }
 0x207   : > { %3615 = vmatpush2.bf16.msra.mxu1 %v5087_v27  ;;  %3575 = vmatprep.subr.bf16.mxu0 %v5092_v28 }
 0x208   : > { %3616 = vmatprep.subr.bf16.mxu1 %v5095_v8 }
 0x20a   : > { %3576 = vmatpush2.bf16.msra.mxu0 %v5090_v17  ;;  %v314_v17 = vld [vmem:[#allocation2 + $0x8] sm:$0xff] }
 0x20b   : > { %3617 = vmatpush2.bf16.msra.mxu1 %v5093_v40  ;;  %3577 = vmatprep.subr.bf16.mxu0 %v5098_v31 }
 0x20c   : > { %3618 = vmatprep.subr.bf16.mxu1 %v5101_v32 }
 0x20e   : > { %3578 = vmatpush2.bf16.msra.mxu0 %v5096_v33 }
 0x20f   : > { %3619 = vmatpush2.bf16.msra.mxu1 %v5099_v34  ;;  %3579 = vmatprep.subr.bf16.mxu0 %v5104_v38 }
 0x210   : > { %3620 = vmatprep.subr.bf16.mxu1 %v5107_v25 }
 0x212   : > { %3580 = vmatpush2.bf16.msra.mxu0 %v5102_v41 }
 0x213   : > { %3621 = vmatpush2.bf16.msra.mxu1 %v5105_v42  ;;  %3581 = vmatprep.subr.bf16.mxu0 %v5110_v44 }
 0x214   : > { %3622 = vmatprep.subr.bf16.mxu1 %v5113_v45 }
 0x216   : > { %3582 = vmatpush2.bf16.msra.mxu0 %v5108_v18 }
 0x217   : > { %3623 = vmatpush2.bf16.msra.mxu1 %v5111_v35 }
 0x219   : > { %v3339_v51 = vpop.f32.mrf.mxu0  ;;  %3584 = vmatmul.mubr.bf16.vlgmr.msra.gmra.mxu0 %v5741_v36 }
 0x21a   : > { %v3380_v26 = vpop.f32.mrf.mxu1  ;;  %3625 = vmatmul.mubr.bf16.vlgmr.msra.gmra.mxu1 %v5820_v54  ;;  %v3340_v53 = vadd.f32 %v3339_v51, %v3299_v49 }
 0x21b   : > { %v3341_v55 = vpop.f32.mrf.mxu0 }
 0x21c   : > { %v3382_v29 = vpop.f32.mrf.mxu1  ;;  %v3633_v2 = vadd.f32 %v3340_v53, %v311_v50  ;;  %v3342_v56 = vadd.f32 %v3341_v55, %v3301_v23 }
 0x21d   : > { %v3343_v30 = vpop.f32.mrf.mxu0 }
 0x21e   : > { %v3384_v43 = vpop.f32.mrf.mxu1  ;;  %3637 = vst [vmem:[#allocation2 + $0x10] sm:$0xff] %v3633_v2  ;;  %v3634_v57 = vadd.f32 %v3342_v56, %v312_v48 }
 0x21f   : > { %v3344_v39 = vpop.f32.mrf.mxu0 }
 0x220   : > { %v3385_v58 = vpop.f32.mrf.mxu1  ;;  %3638 = vst [vmem:[#allocation2] sm:$0xff] %v3634_v57 }
 0x259   : > { %v3421_v59 = vpop.f32.mrf.mxu0 }
 0x25a   : > { %v3462_v60 = vpop.f32.mrf.mxu1  ;;  %v3422_v36 = vadd.f32 %v3421_v59, %v3380_v26 }
 0x25b   : > { %v3423_v61 = vpop.f32.mrf.mxu0 }
 0x25c   : > { %v3464_v54 = vpop.f32.mrf.mxu1  ;;  %v3463_v62 = vadd.f32 %v3462_v60, %v3422_v36  ;;  %v3424_v24 = vadd.f32 %v3423_v61, %v3382_v29 }
 0x25d   : > { %v3425_v63 = vpop.f32.mrf.mxu0 }
 0x25e   : > { %v3466_v0 = vpop.f32.mrf.mxu1  ;;  %v3465_v1 = vadd.f32 %v3464_v54, %v3424_v24 }
 0x25f   : > { %v3426_v7 = vpop.f32.mrf.mxu0 }
 0x260   : > { %v3467_v3 = vpop.f32.mrf.mxu1 }
 0x299   : > { %v3503_v4 = vpop.f32.mrf.mxu0 }
 0x29a   : > { %v3544_v5 = vpop.f32.mrf.mxu1  ;;  %v3504_v12 = vadd.f32 %v3503_v4, %v3463_v62 }
 0x29b   : > { %v3505_v6 = vpop.f32.mrf.mxu0 }
 0x29c   : > { %v3546_v9 = vpop.f32.mrf.mxu1  ;;  %v3506_v13 = vadd.f32 %v3505_v6, %v3465_v1  ;;  %v3545_v14 = vadd.f32 %v3544_v5, %v3504_v12 }
 0x29d   : > { %v3507_v10 = vpop.f32.mrf.mxu0 }
 0x29e   : > { %v3548_v52 = vpop.f32.mrf.mxu1  ;;  %v3547_v19 = vadd.f32 %v3546_v9, %v3506_v13 }
 0x29f   : > { %v3508_v37 = vpop.f32.mrf.mxu0 }
 0x2a0   : > { %v3549_v11 = vpop.f32.mrf.mxu1 }
 0x2d9   : > { %v3585_v15 = vpop.f32.mrf.mxu0 }
 0x2da   : > { %v3626_v16 = vpop.f32.mrf.mxu1  ;;  %v3586_v20 = vadd.f32 %v3585_v15, %v3545_v14 }
 0x2db   : > { %v3587_v22 = vpop.f32.mrf.mxu0 }
 0x2dc   : > { %v3628_v27 = vpop.f32.mrf.mxu1  ;;  %v3627_v28 = vadd.f32 %v3626_v16, %v3586_v20  ;;  %v3588_v8 = vadd.f32 %v3587_v22, %v3547_v19 }
 0x2dd   : > { %v3589_v40 = vpop.f32.mrf.mxu0 }
 0x2de   : > { %v3630_v31 = vpop.f32.mrf.mxu1  ;;  %v3635_v32 = vadd.f32 %v3627_v28, %v313_v21  ;;  %v3629_v33 = vadd.f32 %v3628_v27, %v3588_v8  ;;  %3644 = sbr.rel (%p4313_p0) target bundleno = 752 (0x2f0), region = 48 }
 0x2df   : > { %v3590_v34 = vpop.f32.mrf.mxu0 }
 0x2e0   : > { %v3631_v38 = vpop.f32.mrf.mxu1  ;;  %3639 = vst [vmem:[#allocation2 + $0x18] sm:$0xff] %v3635_v32  ;;  %v3636_v25 = vadd.f32 %v3629_v33, %v314_v17 }
 0x2e2   : > { %3640 = vst [vmem:[#allocation2 + $0x8] sm:$0xff] %v3636_v25 }
 0x2e3   : > { %v3651_v41 = vlaneseq  ;;  %v3649_v44 = vld [vmem:[%s239_s27] sm:$0xf]  ;;  %v3645_v45 = vld [vmem:[#allocation2 + $0x10] sm:$0xff] }
 0x2e4   : > { %v3646_v49 = vld [vmem:[#allocation2] sm:$0xff] }
 0x2e5   : > { %v3652_v42 = vshrl.u32 %v3651_v41, 7 }
 0x2e7   : > { %v3653_v18 = vsub.s32 0, %v3652_v42  ;;  %v3657_v35 = vsub.s32 1, %v3652_v42  ;;  %v3661_v46 = vsub.s32 2, %v3652_v42  ;;  %v3665_v47 = vsub.s32 3, %v3652_v42  ;;  %v3647_v50 = vld [vmem:[#allocation2 + $0x18] sm:$0xff] }
 0x2e9   : > { %v3648_v51 = vld [vmem:[#allocation2 + $0x8] sm:$0xff]  ;;  %v3654_v26 = vrot.slane %v3649_v44, %v3653_v18  ;;  %v3658_v23 = vrot.slane %v3649_v44, %v3657_v35  ;;  %v3662_v53 = vrot.slane %v3649_v44, %v3661_v46  ;;  %v3666_v48 = vrot.slane %v3649_v44, %v3665_v47 }
 0x2eb   : > { %v3671_v55 = vadd.f32 %v3654_v26, %v3645_v45  ;;  %v3672_v29 = vadd.f32 %v3658_v23, %v3646_v49  ;;  %v3673_v2 = vadd.f32 %v3662_v53, %v3647_v50  ;;  %v3674_v56 = vadd.f32 %v3666_v48, %v3648_v51 }
 0x2ed   : > { %v4320_v30 = vpack.c.bf16 %v3672_v29, %v3671_v55  ;;  %v4321_v43 = vpack.c.bf16 %v3674_v56, %v3673_v2 }
 0x2ef   : > { %3691 = vst [vmem:[%s5477_s28] sm:$0xff] %v4320_v30  ;;  %3692 = vst [vmem:[%s5477_s28 + $0x8] sm:$0xff] %v4321_v43 }
 0x2f0 PF: > { %s19_s22 = sadd.s32 1, %s5264_s22   ;;  %s6108_s12 = smov %s5228_s13 }
 0x2f1   : > { %p16_p1 = scmp.ge.s32.totalorder %s19_s22, 12   ;;  %s6109_s13 = smov %s5232_s14 }
 0x2f2   : > { %s6110_s14 = smov %s5432_s10  ;;  %s6111_s15 = smov %s5240_s16 }
 0x2f3   : > { %s6112_s16 = smov %s5244_s17  ;;  %s6113_s17 = smov %s5437_s29 }
 0x2f4   : > { %s6114_s18 = smov %s5256_s20  ;;  %s6115_s19 = smov %s5260_s21 }
 0x2f5   : > { %s6116_s20 = smov %s6119_s23  ;;  %s6117_s21 = smov %s6123_s30 }
 0x2f6   :  { %18 = sbr.rel (!%p16_p1) target bundleno = 13 (0xd), region = 96 }
 0x2fb   :  { %3723 = vsyncpa [#allocation4], 1 }
 0x2fc   :  { %3725 = vsyncpa [#allocation4 + $0x1], 1 }
 0x2fd   :  { %3726 = vsyncpa [#allocation6], 1 }
 0x2fe   :  { %3728 = vsyncpa [#allocation6 + $0x1], 1 }

</bundles_post_ra>
